<compile_context>
chip_gen: v7x
topology: tpu7x:2x2x1
jax: 0.10.0
libtpu: 0.0.40
codegen_flags: <defaults>
</compile_context>

<pallas_src>
import jax
import jax.numpy as jnp
from jax.experimental import pallas as pl
from jax.experimental.pallas import tpu as pltpu

BN_EPS = 1e-5
LANE = 128                      # pad channel dims to a multiple of this
TILE_M_TARGET = 512             # rows per grid step
VMEM_LIMIT = 40 * 1024 * 1024   # scoped-VMEM cap (fits v7x's 64 MiB physical)

# (inplanes, planes, stride) of the four Bottlenecks in BasicResNet.block.
BLOCK_CFG = ((2, 32, 2), (32, 32, 1), (32, 64, 2), (64, 64, 1))


# ------------------------------ small helpers ------------------------------

def _round_up(x, m):
    return (x + m - 1) // m * m


def _choose_tile(m):
    """Row tile: multiple of 8 (sublane), <= TILE_M_TARGET, little waste."""
    if m <= TILE_M_TARGET:
        return _round_up(m, 8)
    for t in range(TILE_M_TARGET, 7, -8):
        if m % t == 0:
            return t
    return TILE_M_TARGET


def _pad_cols(a, width):
    return jnp.pad(a, ((0, 0), (0, width - a.shape[1])))


def _pad_vec(v, width):
    return jnp.pad(v, (0, width - v.shape[0])).reshape(1, width)


def _torch_w_to_mat(w_oihw):
    """(Cout, Cin, kh, kw) -> (kh*kw*Cin, Cout), matching im2col ordering."""
    return jnp.transpose(w_oihw, (2, 3, 1, 0)).reshape(-1, w_oihw.shape[0])


def _im2col(x_nhwc, k, stride, pad):
    """Extract (kh, kw, ci)-ordered patches: (N*Ho*Wo, k*k*C)."""
    # TODO(synk): host-side im2col duplicates the 3x3 activation 9x in HBM; an
    # implicit-GEMM kernel (9 shifted accumulating dots) would remove that.
    n, h, w, c = x_nhwc.shape
    xp = jnp.pad(x_nhwc, ((0, 0), (pad, pad), (pad, pad), (0, 0)))
    ho = (h + 2 * pad - k) // stride + 1
    wo = (w + 2 * pad - k) // stride + 1
    cols = []
    for kh in range(k):
        for kw in range(k):
            cols.append(xp[:, kh:kh + ho * stride:stride,
                           kw:kw + wo * stride:stride, :])
    patches = jnp.concatenate(cols, axis=-1)          # (N, Ho, Wo, k*k*C)
    return patches.reshape(n * ho * wo, k * k * c), ho, wo


# ----------------------------- Pallas kernels ------------------------------

def _conv_stats_kernel(x_ref, w_ref, y_ref, s_ref, ss_ref):
    """Pass 1: y_tile = x_tile @ w; accumulate per-channel sum / sum-of-sq."""
    @pl.when(pl.program_id(0) == 0)
    def _():
        s_ref[...] = jnp.zeros_like(s_ref)
        ss_ref[...] = jnp.zeros_like(ss_ref)

    y = jnp.dot(x_ref[...], w_ref[...], preferred_element_type=jnp.float32)
    y_ref[...] = y
    s_ref[...] += jnp.sum(y, axis=0, keepdims=True)
    ss_ref[...] += jnp.sum(y * y, axis=0, keepdims=True)


def _bn(y, s, ss, g, b, inv_m):
    """Training-mode BatchNorm from accumulated sum / sum-of-squares."""
    mean = s * inv_m
    var = jnp.maximum(ss * inv_m - mean * mean, 0.0)     # biased variance
    return (y - mean) * (jax.lax.rsqrt(var + BN_EPS) * g) + b


def _make_bn_act_kernel(m_true, relu):
    inv_m = 1.0 / float(m_true)

    def kernel(y_ref, s_ref, ss_ref, g_ref, b_ref, o_ref):
        out = _bn(y_ref[...], s_ref[...], ss_ref[...],
                  g_ref[...], b_ref[...], inv_m)
        if relu:
            out = jnp.maximum(out, 0.0)
        o_ref[...] = out

    return kernel


def _make_bn_add_relu_kernel(m_true):
    """Pass 2 for conv3 when identity is the raw block input."""
    inv_m = 1.0 / float(m_true)

    def kernel(y_ref, id_ref, s_ref, ss_ref, g_ref, b_ref, o_ref):
        out = _bn(y_ref[...], s_ref[...], ss_ref[...],
                  g_ref[...], b_ref[...], inv_m)
        o_ref[...] = jnp.maximum(out + id_ref[...], 0.0)

    return kernel


def _make_bn2_add_relu_kernel(m_true):
    """Pass 2 for conv3 with fused downsample BN: relu(bn3(y) + bnd(yd))."""
    inv_m = 1.0 / float(m_true)

    def kernel(y_ref, yd_ref, s_ref, ss_ref, g_ref, b_ref,
               sd_ref, ssd_ref, gd_ref, bd_ref, o_ref):
        out = _bn(y_ref[...], s_ref[...], ss_ref[...],
                  g_ref[...], b_ref[...], inv_m)
        idn = _bn(yd_ref[...], sd_ref[...], ssd_ref[...],
                  gd_ref[...], bd_ref[...], inv_m)
        o_ref[...] = jnp.maximum(out + idn, 0.0)

    return kernel


def _global_maxpool_kernel(x_ref, o_ref):
    o_ref[...] = jnp.max(x_ref[...], axis=0, keepdims=True)


def _fc_sigmoid_kernel(x_ref, w_ref, b_ref, o_ref):
    y = jnp.dot(x_ref[...], w_ref[...], preferred_element_type=jnp.float32)
    o_ref[...] = jax.nn.sigmoid(y + b_ref[...])


# --------------------------- pallas_call wrappers ---------------------------

def _conv_pass1(x, w_mat):
    """x: (M, K) f32, w_mat: (K, Cout).  Returns pre-BN y (Mp, Cp), per-channel
    sum and sum-of-squares (1, Cp), and the row-tile size used."""
    m, k = x.shape
    cout = w_mat.shape[1]
    cp = _round_up(cout, LANE)
    tile = _choose_tile(m)
    mp = _round_up(m, tile)
    if mp != m:
        x = jnp.pad(x, ((0, mp - m), (0, 0)))   # zero rows leave sums unchanged
    w_pad = _pad_cols(w_mat, cp)
    nt = mp // tile

    y, s, ss = pl.pallas_call(
        _conv_stats_kernel,
        out_shape=(
            jax.ShapeDtypeStruct((mp, cp), jnp.float32),
            jax.ShapeDtypeStruct((1, cp), jnp.float32),
            jax.ShapeDtypeStruct((1, cp), jnp.float32),
        ),
        grid=(nt,),
        in_specs=[
            pl.BlockSpec((tile, k), lambda i: (i, 0)),
            pl.BlockSpec((k, cp), lambda i: (0, 0)),      # weight stays resident
        ],
        out_specs=(
            pl.BlockSpec((tile, cp), lambda i: (i, 0)),
            pl.BlockSpec((1, cp), lambda i: (0, 0)),      # resident accumulators
            pl.BlockSpec((1, cp), lambda i: (0, 0)),
        ),
        compiler_params=pltpu.CompilerParams(
            dimension_semantics=("arbitrary",),           # stats reduce over M
            vmem_limit_bytes=VMEM_LIMIT),
        cost_estimate=pl.CostEstimate(
            flops=2 * mp * k * cp,
            transcendentals=0,
            bytes_accessed=4 * (mp * k + k * cp + 2 * mp * cp)),
    )(x, w_pad)
    return y, s, ss, tile


def _pass2(kernel, tiled, small, tile):
    """Tiled element-wise pass over M; `tiled` arrays share y's (Mp, Cp) shape,
    `small` arrays are (1, Cp) and stay resident."""
    mp, cp = tiled[0].shape
    nt = mp // tile
    tiled_spec = pl.BlockSpec((tile, cp), lambda i: (i, 0))
    small_spec = pl.BlockSpec((1, cp), lambda i: (0, 0))
    return pl.pallas_call(
        kernel,
        out_shape=jax.ShapeDtypeStruct((mp, cp), jnp.float32),
        grid=(nt,),
        in_specs=[tiled_spec] * len(tiled) + [small_spec] * len(small),
        out_specs=tiled_spec,
        compiler_params=pltpu.CompilerParams(
            dimension_semantics=("parallel",),   # M tiles independent here
            vmem_limit_bytes=VMEM_LIMIT),
    )(*tiled, *small)


def conv_bn(x, w_oihw, g, b, relu):
    """conv-as-matmul + training-mode BatchNorm (+ optional ReLU).
    x: (M, K) patches/activations.  Returns (M, Cout) f32."""
    m = x.shape[0]
    w_mat = _torch_w_to_mat(w_oihw)
    cout = w_mat.shape[1]
    y, s, ss, tile = _conv_pass1(x, w_mat)
    cp = y.shape[1]
    out = _pass2(_make_bn_act_kernel(m, relu),
                 tiled=[y],
                 small=[s, ss, _pad_vec(g, cp), _pad_vec(b, cp)],
                 tile=tile)
    return out[:m, :cout]


def global_maxpool(x_nhwc):
    """AdaptiveMaxPool2d(1): max over H*W, done as a 2-D sublane reduce with a
    lane-dense (N*C) column layout."""
    n, h, w, c = x_nhwc.shape
    xt = jnp.transpose(x_nhwc, (1, 2, 0, 3)).reshape(h * w, n * c)
    pooled = pl.pallas_call(
        _global_maxpool_kernel,
        out_shape=jax.ShapeDtypeStruct((1, n * c), jnp.float32),
        in_specs=[pl.BlockSpec(memory_space=pltpu.MemorySpace.VMEM)],
        out_specs=pl.BlockSpec(memory_space=pltpu.MemorySpace.VMEM),
    )(xt)
    return pooled.reshape(n, c)


def fc_sigmoid(x, w_torch, b):
    """x: (N, F); w_torch: (1, F) PyTorch layout; b: (1,)."""
    n, _ = x.shape
    w = _pad_cols(jnp.transpose(w_torch), LANE)   # (F, 128) lane-dense
    bp = _pad_vec(b, LANE)                        # (1, 128)
    out = pl.pallas_call(
        _fc_sigmoid_kernel,
        out_shape=jax.ShapeDtypeStruct((n, LANE), jnp.float32),
        in_specs=[pl.BlockSpec(memory_space=pltpu.MemorySpace.VMEM)] * 3,
        out_specs=pl.BlockSpec(memory_space=pltpu.MemorySpace.VMEM),
    )(x, w, bp)
    return out[:, :1]


# ------------------------------ model forward -------------------------------

def bottleneck_forward(x_nhwc, p, stride):
    n, h, w, cin = x_nhwc.shape
    mid = p["w1"].shape[0]
    planes = p["w3"].shape[0]

    # conv1 (1x1, stride 1) + bn1 + relu
    o1 = conv_bn(x_nhwc.reshape(n * h * w, cin),
                 p["w1"], p["g1"], p["b1"], relu=True)
    o1 = o1.reshape(n, h, w, mid)

    # conv2 (3x3, stride, pad 1) + bn2 + relu
    patches, ho, wo = _im2col(o1, 3, stride, 1)
    m2 = n * ho * wo
    o2 = conv_bn(patches, p["w2"], p["g2"], p["b2"], relu=True)   # (m2, mid)

    # conv3 (1x1) + bn3, with residual add + relu fused into its pass-2 kernel
    y3, s3, ss3, tile = _conv_pass1(o2, _torch_w_to_mat(p["w3"]))
    cp = y3.shape[1]
    g3, b3 = _pad_vec(p["g3"], cp), _pad_vec(p["b3"], cp)

    if "wd" in p:
        # downsample 1x1 stride-s conv == strided slice + matmul; its BN is
        # applied inside the fused pass-2 kernel (no normalized HBM round trip)
        xd = x_nhwc[:, ::stride, ::stride, :].reshape(m2, cin)
        yd, sd, ssd, tile_d = _conv_pass1(xd, _torch_w_to_mat(p["wd"]))
        assert tile_d == tile and yd.shape == y3.shape
        out = _pass2(
            _make_bn2_add_relu_kernel(m2),
            tiled=[y3, yd],
            small=[s3, ss3, g3, b3, sd, ssd,
                   _pad_vec(p["gd"], cp), _pad_vec(p["bd"], cp)],
            tile=tile)
    else:
        ident = x_nhwc.reshape(m2, cin)           # cin == planes here
        ident = jnp.pad(ident, ((0, y3.shape[0] - m2), (0, cp - cin)))
        out = _pass2(_make_bn_add_relu_kernel(m2),
                     tiled=[y3, ident], small=[s3, ss3, g3, b3], tile=tile)

    return out[:m2, :planes].reshape(n, ho, wo, planes)


def basic_resnet_forward(x, params):
    """x: (N, 3, 2, H, W) — BasicResNet.forward runs the shared block on
    x[:, 0], x[:, 1], x[:, 2] separately (per-stream BN batch stats)."""
    feats = []
    for s in range(3):
        h = jnp.transpose(x[:, s], (0, 2, 3, 1))          # NCHW -> NHWC
        for blk_params, (_, _, stride) in zip(params["blocks"], BLOCK_CFG):
            h = bottleneck_forward(h, blk_params, stride)
        # TODO(synk): nn.Dropout2d(0.2) is stochastic in train mode; treated as
        # identity (eval-mode behaviour) so the forward is deterministic.
        feats.append(global_maxpool(h))                   # AdaptiveMaxPool2d(1)
    f = jnp.concatenate(feats, axis=1)                    # (N, 192)
    return fc_sigmoid(f, params["fc_w"], params["fc_b"])  # (N, 1)


# --------------------------- pure-JAX reference ------------------------------

def _ref_conv(x, w, s, pad):
    return jax.lax.conv_general_dilated(
        x, w, (s, s), [(pad, pad), (pad, pad)],
        dimension_numbers=("NCHW", "OIHW", "NCHW"))


def _ref_bn(y, g, b):
    mean = y.mean(axis=(0, 2, 3), keepdims=True)
    var = ((y - mean) ** 2).mean(axis=(0, 2, 3), keepdims=True)
    return ((y - mean) * jax.lax.rsqrt(var + BN_EPS)
            * g.reshape(1, -1, 1, 1) + b.reshape(1, -1, 1, 1))


def _ref_bottleneck(x, p, stride):
    out = jax.nn.relu(_ref_bn(_ref_conv(x, p["w1"], 1, 0), p["g1"], p["b1"]))
    out = jax.nn.relu(_ref_bn(_ref_conv(out, p["w2"], stride, 1),
                              p["g2"], p["b2"]))
    out = _ref_bn(_ref_conv(out, p["w3"], 1, 0), p["g3"], p["b3"])
    if "wd" in p:
        identity = _ref_bn(_ref_conv(x, p["wd"], stride, 0), p["gd"], p["bd"])
    else:
        identity = x
    return jax.nn.relu(out + identity)


def ref_forward(x, params):
    feats = []
    for s in range(3):
        h = x[:, s]
        for blk_params, (_, _, stride) in zip(params["blocks"], BLOCK_CFG):
            h = _ref_bottleneck(h, blk_params, stride)
        feats.append(jnp.max(h, axis=(2, 3)))
    f = jnp.concatenate(feats, axis=1)
    return jax.nn.sigmoid(f @ params["fc_w"].T + params["fc_b"])


# --------------------------------- params -----------------------------------

def _init_bottleneck(key, inplanes, planes, stride):
    mid = planes // 2
    ks = jax.random.split(key, 12)
    nrm = lambda k, shape: 0.1 * jax.random.normal(k, shape, jnp.float32)
    p = {
        "w1": nrm(ks[0], (mid, inplanes, 1, 1)),
        "g1": 1.0 + nrm(ks[1], (mid,)), "b1": nrm(ks[2], (mid,)),
        "w2": nrm(ks[3], (mid, mid, 3, 3)),
        "g2": 1.0 + nrm(ks[4], (mid,)), "b2": nrm(ks[5], (mid,)),
        "w3": nrm(ks[6], (planes, mid, 1, 1)),
        "g3": 1.0 + nrm(ks[7], (planes,)), "b3": nrm(ks[8], (planes,)),
    }
    if stride != 1 or inplanes != planes:
        p["wd"] = nrm(ks[9], (planes, inplanes, 1, 1))
        p["gd"] = 1.0 + nrm(ks[10], (planes,))
        p["bd"] = nrm(ks[11], (planes,))
    return p


# ---------------------------------- main -------------------------------------

if __name__ == "__main__":
    key = jax.random.PRNGKey(0)
    k_blocks, k_fc, k_x = jax.random.split(key, 3)
    bkeys = jax.random.split(k_blocks, len(BLOCK_CFG))
    blocks = [_init_bottleneck(bk, inp, pla, st)
              for bk, (inp, pla, st) in zip(bkeys, BLOCK_CFG)]
    kw, kb = jax.random.split(k_fc)
    params = {
        "blocks": blocks,
        "fc_w": 0.05 * jax.random.normal(kw, (1, 192), jnp.float32),
        "fc_b": 0.05 * jax.random.normal(kb, (1,), jnp.float32),
    }

    N, H, W = 2, 16, 16
    x = jax.random.normal(k_x, (N, 3, 2, H, W), jnp.float32)

    out = jax.block_until_ready(jax.jit(basic_resnet_forward)(x, params))
    ref = jax.block_until_ready(ref_forward(x, params))

    assert out.shape == ref.shape == (N, 1), (out.shape, ref.shape)
    err = float(jnp.max(jnp.abs(out - ref)))
    assert err < 1e-3, f"mismatch vs JAX reference: {err}"
    print("KERNEL_OK")
</pallas_src>

<mosaic_0001>
module attributes {stable_mosaic.version = 11 : i64} {
  func.func @_conv_stats_kernel(%arg0: i32, %arg1: memref<512x2xf32, #tpu.memory_space<vmem>>, %arg2: memref<2x128xf32, #tpu.memory_space<vmem>>, %arg3: memref<512x128xf32, #tpu.memory_space<vmem>>, %arg4: memref<1x128xf32, #tpu.memory_space<vmem>>, %arg5: memref<1x128xf32, #tpu.memory_space<vmem>>) attributes {dimension_semantics = [#tpu.dimension_semantics<arbitrary>], iteration_bounds = array<i64: 1>, scalar_prefetch = 0 : i64, scratch_operands = 0 : i64, tpu.core_type = #tpu.core_type<tc>, window_params = [{transform_indices = @transform_0, window_bounds = array<i64: 512, 2>}, {pipeline_mode = #tpu.pipeline_mode<synchronous>, transform_indices = @transform_1, window_bounds = array<i64: 2, 128>}, {transform_indices = @transform_2, window_bounds = array<i64: 512, 128>}, {pipeline_mode = #tpu.pipeline_mode<synchronous>, transform_indices = @transform_3, window_bounds = array<i64: 1, 128>}, {pipeline_mode = #tpu.pipeline_mode<synchronous>, transform_indices = @transform_4, window_bounds = array<i64: 1, 128>}]} {
    %c0_i32 = arith.constant 0 : i32
    %0 = arith.cmpi eq, %arg0, %c0_i32 : i32
    %1 = arith.extui %0 : i1 to i32
    %c0_i32_0 = arith.constant 0 : i32
    %2 = arith.cmpi ne, %1, %c0_i32_0 : i32
    scf.if %2 {
      %cst_16 = arith.constant 0.000000e+00 : f32
      %18 = vector.broadcast %cst_16 : f32 to vector<1x128xf32>
      %c0_17 = arith.constant 0 : index
      %c0_18 = arith.constant 0 : index
      %19 = vector.load %arg4[%c0_17, %c0_18] : memref<1x128xf32, #tpu.memory_space<vmem>>, vector<1x128xf32>
      tpu.vector_store %arg4[%c0_17, %c0_18], %18 {strides = array<i32>} : memref<1x128xf32, #tpu.memory_space<vmem>>, vector<1x128xf32>,
      %cst_19 = arith.constant 0.000000e+00 : f32
      %20 = vector.broadcast %cst_19 : f32 to vector<1x128xf32>
      %c0_20 = arith.constant 0 : index
      %c0_21 = arith.constant 0 : index
      %21 = vector.load %arg5[%c0_20, %c0_21] : memref<1x128xf32, #tpu.memory_space<vmem>>, vector<1x128xf32>
      tpu.vector_store %arg5[%c0_20, %c0_21], %20 {strides = array<i32>} : memref<1x128xf32, #tpu.memory_space<vmem>>, vector<1x128xf32>,
    } else {
    }
    %c0 = arith.constant 0 : index
    %c0_1 = arith.constant 0 : index
    %3 = vector.load %arg1[%c0, %c0_1] : memref<512x2xf32, #tpu.memory_space<vmem>>, vector<512x2xf32>
    %c0_2 = arith.constant 0 : index
    %c0_3 = arith.constant 0 : index
    %4 = vector.load %arg2[%c0_2, %c0_3] : memref<2x128xf32, #tpu.memory_space<vmem>>, vector<2x128xf32>
    %cst = arith.constant dense<0.000000e+00> : vector<512x128xf32>
    %5 = tpu.matmul %3, %4, %cst {dimension_numbers = #tpu.dot_dimension_numbers<[1], [0], [0], [1], [0, 0, 1, 1], [], []>} : vector<512x2xf32>, vector<2x128xf32>, vector<512x128xf32> -> vector<512x128xf32>
    %c0_4 = arith.constant 0 : index
    %c0_5 = arith.constant 0 : index
    %6 = vector.load %arg3[%c0_4, %c0_5] : memref<512x128xf32, #tpu.memory_space<vmem>>, vector<512x128xf32>
    tpu.vector_store %arg3[%c0_4, %c0_5], %5 {strides = array<i32>} : memref<512x128xf32, #tpu.memory_space<vmem>>, vector<512x128xf32>,
    %c0_6 = arith.constant 0 : index
    %c0_7 = arith.constant 0 : index
    %7 = vector.load %arg4[%c0_6, %c0_7] : memref<1x128xf32, #tpu.memory_space<vmem>>, vector<1x128xf32>
    %cst_8 = arith.constant dense<0.000000e+00> : vector<128xf32>
    %8 = vector.multi_reduction <add>, %5, %cst_8 [0] : vector<512x128xf32> to vector<128xf32>
    %9 = vector.shape_cast %8 : vector<128xf32> to vector<1x128xf32>
    %10 = arith.addf %7, %9 : vector<1x128xf32>
    %c0_9 = arith.constant 0 : index
    %c0_10 = arith.constant 0 : index
    %11 = vector.load %arg4[%c0_9, %c0_10] : memref<1x128xf32, #tpu.memory_space<vmem>>, vector<1x128xf32>
    tpu.vector_store %arg4[%c0_9, %c0_10], %10 {strides = array<i32>} : memref<1x128xf32, #tpu.memory_space<vmem>>, vector<1x128xf32>,
    %c0_11 = arith.constant 0 : index
    %c0_12 = arith.constant 0 : index
    %12 = vector.load %arg5[%c0_11, %c0_12] : memref<1x128xf32, #tpu.memory_space<vmem>>, vector<1x128xf32>
    %13 = arith.mulf %5, %5 : vector<512x128xf32>
    %cst_13 = arith.constant dense<0.000000e+00> : vector<128xf32>
    %14 = vector.multi_reduction <add>, %13, %cst_13 [0] : vector<512x128xf32> to vector<128xf32>
    %15 = vector.shape_cast %14 : vector<128xf32> to vector<1x128xf32>
    %16 = arith.addf %12, %15 : vector<1x128xf32>
    %c0_14 = arith.constant 0 : index
    %c0_15 = arith.constant 0 : index
    %17 = vector.load %arg5[%c0_14, %c0_15] : memref<1x128xf32, #tpu.memory_space<vmem>>, vector<1x128xf32>
    tpu.vector_store %arg5[%c0_14, %c0_15], %16 {strides = array<i32>} : memref<1x128xf32, #tpu.memory_space<vmem>>, vector<1x128xf32>,
    return
  }
  func.func @transform_0(%arg0: i32) -> (i32, i32) {
    %c0_i32 = arith.constant 0 : i32
    %c0_i32_0 = arith.constant 0 : i32
    return %arg0, %c0_i32 : i32, i32
  }
  func.func @transform_1(%arg0: i32) -> (i32, i32) {
    %c0_i32 = arith.constant 0 : i32
    %c0_i32_0 = arith.constant 0 : i32
    %c0_i32_1 = arith.constant 0 : i32
    return %c0_i32, %c0_i32_0 : i32, i32
  }
  func.func @transform_2(%arg0: i32) -> (i32, i32) {
    %c0_i32 = arith.constant 0 : i32
    %c0_i32_0 = arith.constant 0 : i32
    return %arg0, %c0_i32 : i32, i32
  }
  func.func @transform_3(%arg0: i32) -> (i32, i32) {
    %c0_i32 = arith.constant 0 : i32
    %c0_i32_0 = arith.constant 0 : i32
    %c0_i32_1 = arith.constant 0 : i32
    return %c0_i32, %c0_i32_0 : i32, i32
  }
  func.func @transform_4(%arg0: i32) -> (i32, i32) {
    %c0_i32 = arith.constant 0 : i32
    %c0_i32_0 = arith.constant 0 : i32
    %c0_i32_1 = arith.constant 0 : i32
    return %c0_i32, %c0_i32_0 : i32, i32
  }
}

module attributes {stable_mosaic.version = 11 : i64} {
  func.func @kernel(%arg0: i32, %arg1: memref<512x128xf32, #tpu.memory_space<vmem>>, %arg2: memref<1x128xf32, #tpu.memory_space<vmem>>, %arg3: memref<1x128xf32, #tpu.memory_space<vmem>>, %arg4: memref<1x128xf32, #tpu.memory_space<vmem>>, %arg5: memref<1x128xf32, #tpu.memory_space<vmem>>, %arg6: memref<512x128xf32, #tpu.memory_space<vmem>>) attributes {dimension_semantics = [#tpu.dimension_semantics<parallel>], iteration_bounds = array<i64: 1>, scalar_prefetch = 0 : i64, scratch_operands = 0 : i64, tpu.core_type = #tpu.core_type<tc>, window_params = [{transform_indices = @transform_0, window_bounds = array<i64: 512, 128>}, {pipeline_mode = #tpu.pipeline_mode<synchronous>, transform_indices = @transform_1, window_bounds = array<i64: 1, 128>}, {pipeline_mode = #tpu.pipeline_mode<synchronous>, transform_indices = @transform_2, window_bounds = array<i64: 1, 128>}, {pipeline_mode = #tpu.pipeline_mode<synchronous>, transform_indices = @transform_3, window_bounds = array<i64: 1, 128>}, {pipeline_mode = #tpu.pipeline_mode<synchronous>, transform_indices = @transform_4, window_bounds = array<i64: 1, 128>}, {transform_indices = @transform_5, window_bounds = array<i64: 512, 128>}]} {
    %c0 = arith.constant 0 : index
    %c0_0 = arith.constant 0 : index
    %0 = vector.load %arg1[%c0, %c0_0] : memref<512x128xf32, #tpu.memory_space<vmem>>, vector<512x128xf32>
    %c0_1 = arith.constant 0 : index
    %c0_2 = arith.constant 0 : index
    %1 = vector.load %arg2[%c0_1, %c0_2] : memref<1x128xf32, #tpu.memory_space<vmem>>, vector<1x128xf32>
    %c0_3 = arith.constant 0 : index
    %c0_4 = arith.constant 0 : index
    %2 = vector.load %arg3[%c0_3, %c0_4] : memref<1x128xf32, #tpu.memory_space<vmem>>, vector<1x128xf32>
    %c0_5 = arith.constant 0 : index
    %c0_6 = arith.constant 0 : index
    %3 = vector.load %arg4[%c0_5, %c0_6] : memref<1x128xf32, #tpu.memory_space<vmem>>, vector<1x128xf32>
    %c0_7 = arith.constant 0 : index
    %c0_8 = arith.constant 0 : index
    %4 = vector.load %arg5[%c0_7, %c0_8] : memref<1x128xf32, #tpu.memory_space<vmem>>, vector<1x128xf32>
    %cst = arith.constant 0.001953125 : f32
    %5 = vector.broadcast %cst : f32 to vector<1x128xf32>
    %6 = arith.mulf %1, %5 : vector<1x128xf32>
    %cst_9 = arith.constant 0.001953125 : f32
    %7 = vector.broadcast %cst_9 : f32 to vector<1x128xf32>
    %8 = arith.mulf %2, %7 : vector<1x128xf32>
    %9 = arith.mulf %6, %6 : vector<1x128xf32>
    %10 = arith.subf %8, %9 : vector<1x128xf32>
    %cst_10 = arith.constant 0.000000e+00 : f32
    %11 = vector.broadcast %cst_10 : f32 to vector<1x128xf32>
    %12 = arith.maximumf %10, %11 : vector<1x128xf32>
    %13 = vector.broadcast %6 : vector<1x128xf32> to vector<512x128xf32>
    %14 = arith.subf %0, %13 : vector<512x128xf32>
    %cst_11 = arith.constant 9.99999974E-6 : f32
    %15 = vector.broadcast %cst_11 : f32 to vector<1x128xf32>
    %16 = arith.addf %12, %15 : vector<1x128xf32>
    %17 = math.rsqrt %16 : vector<1x128xf32>
    %18 = arith.mulf %17, %3 : vector<1x128xf32>
    %19 = vector.broadcast %18 : vector<1x128xf32> to vector<512x128xf32>
    %20 = arith.mulf %14, %19 : vector<512x128xf32>
    %21 = vector.broadcast %4 : vector<1x128xf32> to vector<512x128xf32>
    %22 = arith.addf %20, %21 : vector<512x128xf32>
    %cst_12 = arith.constant 0.000000e+00 : f32
    %23 = vector.broadcast %cst_12 : f32 to vector<512x128xf32>
    %24 = arith.maximumf %22, %23 : vector<512x128xf32>
    %c0_13 = arith.constant 0 : index
    %c0_14 = arith.constant 0 : index
    %25 = vector.load %arg6[%c0_13, %c0_14] : memref<512x128xf32, #tpu.memory_space<vmem>>, vector<512x128xf32>
    tpu.vector_store %arg6[%c0_13, %c0_14], %24 {strides = array<i32>} : memref<512x128xf32, #tpu.memory_space<vmem>>, vector<512x128xf32>,
    return
  }
  func.func @transform_0(%arg0: i32) -> (i32, i32) {
    %c0_i32 = arith.constant 0 : i32
    %c0_i32_0 = arith.constant 0 : i32
    return %arg0, %c0_i32 : i32, i32
  }
  func.func @transform_1(%arg0: i32) -> (i32, i32) {
    %c0_i32 = arith.constant 0 : i32
    %c0_i32_0 = arith.constant 0 : i32
    %c0_i32_1 = arith.constant 0 : i32
    return %c0_i32, %c0_i32_0 : i32, i32
  }
  func.func @transform_2(%arg0: i32) -> (i32, i32) {
    %c0_i32 = arith.constant 0 : i32
    %c0_i32_0 = arith.constant 0 : i32
    %c0_i32_1 = arith.constant 0 : i32
    return %c0_i32, %c0_i32_0 : i32, i32
  }
  func.func @transform_3(%arg0: i32) -> (i32, i32) {
    %c0_i32 = arith.constant 0 : i32
    %c0_i32_0 = arith.constant 0 : i32
    %c0_i32_1 = arith.constant 0 : i32
    return %c0_i32, %c0_i32_0 : i32, i32
  }
  func.func @transform_4(%arg0: i32) -> (i32, i32) {
    %c0_i32 = arith.constant 0 : i32
    %c0_i32_0 = arith.constant 0 : i32
    %c0_i32_1 = arith.constant 0 : i32
    return %c0_i32, %c0_i32_0 : i32, i32
  }
  func.func @transform_5(%arg0: i32) -> (i32, i32) {
    %c0_i32 = arith.constant 0 : i32
    %c0_i32_0 = arith.constant 0 : i32
    return %arg0, %c0_i32 : i32, i32
  }
}

module attributes {stable_mosaic.version = 11 : i64} {
  func.func @_conv_stats_kernel(%arg0: i32, %arg1: memref<128x144xf32, #tpu.memory_space<vmem>>, %arg2: memref<144x128xf32, #tpu.memory_space<vmem>>, %arg3: memref<128x128xf32, #tpu.memory_space<vmem>>, %arg4: memref<1x128xf32, #tpu.memory_space<vmem>>, %arg5: memref<1x128xf32, #tpu.memory_space<vmem>>) attributes {dimension_semantics = [#tpu.dimension_semantics<arbitrary>], iteration_bounds = array<i64: 1>, scalar_prefetch = 0 : i64, scratch_operands = 0 : i64, tpu.core_type = #tpu.core_type<tc>, window_params = [{transform_indices = @transform_0, window_bounds = array<i64: 128, 144>}, {pipeline_mode = #tpu.pipeline_mode<synchronous>, transform_indices = @transform_1, window_bounds = array<i64: 144, 128>}, {transform_indices = @transform_2, window_bounds = array<i64: 128, 128>}, {pipeline_mode = #tpu.pipeline_mode<synchronous>, transform_indices = @transform_3, window_bounds = array<i64: 1, 128>}, {pipeline_mode = #tpu.pipeline_mode<synchronous>, transform_indices = @transform_4, window_bounds = array<i64: 1, 128>}]} {
    %c0_i32 = arith.constant 0 : i32
    %0 = arith.cmpi eq, %arg0, %c0_i32 : i32
    %1 = arith.extui %0 : i1 to i32
    %c0_i32_0 = arith.constant 0 : i32
    %2 = arith.cmpi ne, %1, %c0_i32_0 : i32
    scf.if %2 {
      %cst_16 = arith.constant 0.000000e+00 : f32
      %18 = vector.broadcast %cst_16 : f32 to vector<1x128xf32>
      %c0_17 = arith.constant 0 : index
      %c0_18 = arith.constant 0 : index
      %19 = vector.load %arg4[%c0_17, %c0_18] : memref<1x128xf32, #tpu.memory_space<vmem>>, vector<1x128xf32>
      tpu.vector_store %arg4[%c0_17, %c0_18], %18 {strides = array<i32>} : memref<1x128xf32, #tpu.memory_space<vmem>>, vector<1x128xf32>,
      %cst_19 = arith.constant 0.000000e+00 : f32
      %20 = vector.broadcast %cst_19 : f32 to vector<1x128xf32>
      %c0_20 = arith.constant 0 : index
      %c0_21 = arith.constant 0 : index
      %21 = vector.load %arg5[%c0_20, %c0_21] : memref<1x128xf32, #tpu.memory_space<vmem>>, vector<1x128xf32>
      tpu.vector_store %arg5[%c0_20, %c0_21], %20 {strides = array<i32>} : memref<1x128xf32, #tpu.memory_space<vmem>>, vector<1x128xf32>,
    } else {
    }
    %c0 = arith.constant 0 : index
    %c0_1 = arith.constant 0 : index
    %3 = vector.load %arg1[%c0, %c0_1] : memref<128x144xf32, #tpu.memory_space<vmem>>, vector<128x144xf32>
    %c0_2 = arith.constant 0 : index
    %c0_3 = arith.constant 0 : index
    %4 = vector.load %arg2[%c0_2, %c0_3] : memref<144x128xf32, #tpu.memory_space<vmem>>, vector<144x128xf32>
    %cst = arith.constant dense<0.000000e+00> : vector<128x128xf32>
    %5 = tpu.matmul %3, %4, %cst {dimension_numbers = #tpu.dot_dimension_numbers<[1], [0], [0], [1], [0, 0, 1, 1], [], []>} : vector<128x144xf32>, vector<144x128xf32>, vector<128x128xf32> -> vector<128x128xf32>
    %c0_4 = arith.constant 0 : index
    %c0_5 = arith.constant 0 : index
    %6 = vector.load %arg3[%c0_4, %c0_5] : memref<128x128xf32, #tpu.memory_space<vmem>>, vector<128x128xf32>
    tpu.vector_store %arg3[%c0_4, %c0_5], %5 {strides = array<i32>} : memref<128x128xf32, #tpu.memory_space<vmem>>, vector<128x128xf32>,
    %c0_6 = arith.constant 0 : index
    %c0_7 = arith.constant 0 : index
    %7 = vector.load %arg4[%c0_6, %c0_7] : memref<1x128xf32, #tpu.memory_space<vmem>>, vector<1x128xf32>
    %cst_8 = arith.constant dense<0.000000e+00> : vector<128xf32>
    %8 = vector.multi_reduction <add>, %5, %cst_8 [0] : vector<128x128xf32> to vector<128xf32>
    %9 = vector.shape_cast %8 : vector<128xf32> to vector<1x128xf32>
    %10 = arith.addf %7, %9 : vector<1x128xf32>
    %c0_9 = arith.constant 0 : index
    %c0_10 = arith.constant 0 : index
    %11 = vector.load %arg4[%c0_9, %c0_10] : memref<1x128xf32, #tpu.memory_space<vmem>>, vector<1x128xf32>
    tpu.vector_store %arg4[%c0_9, %c0_10], %10 {strides = array<i32>} : memref<1x128xf32, #tpu.memory_space<vmem>>, vector<1x128xf32>,
    %c0_11 = arith.constant 0 : index
    %c0_12 = arith.constant 0 : index
    %12 = vector.load %arg5[%c0_11, %c0_12] : memref<1x128xf32, #tpu.memory_space<vmem>>, vector<1x128xf32>
    %13 = arith.mulf %5, %5 : vector<128x128xf32>
    %cst_13 = arith.constant dense<0.000000e+00> : vector<128xf32>
    %14 = vector.multi_reduction <add>, %13, %cst_13 [0] : vector<128x128xf32> to vector<128xf32>
    %15 = vector.shape_cast %14 : vector<128xf32> to vector<1x128xf32>
    %16 = arith.addf %12, %15 : vector<1x128xf32>
    %c0_14 = arith.constant 0 : index
    %c0_15 = arith.constant 0 : index
    %17 = vector.load %arg5[%c0_14, %c0_15] : memref<1x128xf32, #tpu.memory_space<vmem>>, vector<1x128xf32>
    tpu.vector_store %arg5[%c0_14, %c0_15], %16 {strides = array<i32>} : memref<1x128xf32, #tpu.memory_space<vmem>>, vector<1x128xf32>,
    return
  }
  func.func @transform_0(%arg0: i32) -> (i32, i32) {
    %c0_i32 = arith.constant 0 : i32
    %c0_i32_0 = arith.constant 0 : i32
    return %arg0, %c0_i32 : i32, i32
  }
  func.func @transform_1(%arg0: i32) -> (i32, i32) {
    %c0_i32 = arith.constant 0 : i32
    %c0_i32_0 = arith.constant 0 : i32
    %c0_i32_1 = arith.constant 0 : i32
    return %c0_i32, %c0_i32_0 : i32, i32
  }
  func.func @transform_2(%arg0: i32) -> (i32, i32) {
    %c0_i32 = arith.constant 0 : i32
    %c0_i32_0 = arith.constant 0 : i32
    return %arg0, %c0_i32 : i32, i32
  }
  func.func @transform_3(%arg0: i32) -> (i32, i32) {
    %c0_i32 = arith.constant 0 : i32
    %c0_i32_0 = arith.constant 0 : i32
    %c0_i32_1 = arith.constant 0 : i32
    return %c0_i32, %c0_i32_0 : i32, i32
  }
  func.func @transform_4(%arg0: i32) -> (i32, i32) {
    %c0_i32 = arith.constant 0 : i32
    %c0_i32_0 = arith.constant 0 : i32
    %c0_i32_1 = arith.constant 0 : i32
    return %c0_i32, %c0_i32_0 : i32, i32
  }
}

module attributes {stable_mosaic.version = 11 : i64} {
  func.func @kernel(%arg0: i32, %arg1: memref<128x128xf32, #tpu.memory_space<vmem>>, %arg2: memref<1x128xf32, #tpu.memory_space<vmem>>, %arg3: memref<1x128xf32, #tpu.memory_space<vmem>>, %arg4: memref<1x128xf32, #tpu.memory_space<vmem>>, %arg5: memref<1x128xf32, #tpu.memory_space<vmem>>, %arg6: memref<128x128xf32, #tpu.memory_space<vmem>>) attributes {dimension_semantics = [#tpu.dimension_semantics<parallel>], iteration_bounds = array<i64: 1>, scalar_prefetch = 0 : i64, scratch_operands = 0 : i64, tpu.core_type = #tpu.core_type<tc>, window_params = [{transform_indices = @transform_0, window_bounds = array<i64: 128, 128>}, {pipeline_mode = #tpu.pipeline_mode<synchronous>, transform_indices = @transform_1, window_bounds = array<i64: 1, 128>}, {pipeline_mode = #tpu.pipeline_mode<synchronous>, transform_indices = @transform_2, window_bounds = array<i64: 1, 128>}, {pipeline_mode = #tpu.pipeline_mode<synchronous>, transform_indices = @transform_3, window_bounds = array<i64: 1, 128>}, {pipeline_mode = #tpu.pipeline_mode<synchronous>, transform_indices = @transform_4, window_bounds = array<i64: 1, 128>}, {transform_indices = @transform_5, window_bounds = array<i64: 128, 128>}]} {
    %c0 = arith.constant 0 : index
    %c0_0 = arith.constant 0 : index
    %0 = vector.load %arg1[%c0, %c0_0] : memref<128x128xf32, #tpu.memory_space<vmem>>, vector<128x128xf32>
    %c0_1 = arith.constant 0 : index
    %c0_2 = arith.constant 0 : index
    %1 = vector.load %arg2[%c0_1, %c0_2] : memref<1x128xf32, #tpu.memory_space<vmem>>, vector<1x128xf32>
    %c0_3 = arith.constant 0 : index
    %c0_4 = arith.constant 0 : index
    %2 = vector.load %arg3[%c0_3, %c0_4] : memref<1x128xf32, #tpu.memory_space<vmem>>, vector<1x128xf32>
    %c0_5 = arith.constant 0 : index
    %c0_6 = arith.constant 0 : index
    %3 = vector.load %arg4[%c0_5, %c0_6] : memref<1x128xf32, #tpu.memory_space<vmem>>, vector<1x128xf32>
    %c0_7 = arith.constant 0 : index
    %c0_8 = arith.constant 0 : index
    %4 = vector.load %arg5[%c0_7, %c0_8] : memref<1x128xf32, #tpu.memory_space<vmem>>, vector<1x128xf32>
    %cst = arith.constant 7.812500e-03 : f32
    %5 = vector.broadcast %cst : f32 to vector<1x128xf32>
    %6 = arith.mulf %1, %5 : vector<1x128xf32>
    %cst_9 = arith.constant 7.812500e-03 : f32
    %7 = vector.broadcast %cst_9 : f32 to vector<1x128xf32>
    %8 = arith.mulf %2, %7 : vector<1x128xf32>
    %9 = arith.mulf %6, %6 : vector<1x128xf32>
    %10 = arith.subf %8, %9 : vector<1x128xf32>
    %cst_10 = arith.constant 0.000000e+00 : f32
    %11 = vector.broadcast %cst_10 : f32 to vector<1x128xf32>
    %12 = arith.maximumf %10, %11 : vector<1x128xf32>
    %13 = vector.broadcast %6 : vector<1x128xf32> to vector<128x128xf32>
    %14 = arith.subf %0, %13 : vector<128x128xf32>
    %cst_11 = arith.constant 9.99999974E-6 : f32
    %15 = vector.broadcast %cst_11 : f32 to vector<1x128xf32>
    %16 = arith.addf %12, %15 : vector<1x128xf32>
    %17 = math.rsqrt %16 : vector<1x128xf32>
    %18 = arith.mulf %17, %3 : vector<1x128xf32>
    %19 = vector.broadcast %18 : vector<1x128xf32> to vector<128x128xf32>
    %20 = arith.mulf %14, %19 : vector<128x128xf32>
    %21 = vector.broadcast %4 : vector<1x128xf32> to vector<128x128xf32>
    %22 = arith.addf %20, %21 : vector<128x128xf32>
    %cst_12 = arith.constant 0.000000e+00 : f32
    %23 = vector.broadcast %cst_12 : f32 to vector<128x128xf32>
    %24 = arith.maximumf %22, %23 : vector<128x128xf32>
    %c0_13 = arith.constant 0 : index
    %c0_14 = arith.constant 0 : index
    %25 = vector.load %arg6[%c0_13, %c0_14] : memref<128x128xf32, #tpu.memory_space<vmem>>, vector<128x128xf32>
    tpu.vector_store %arg6[%c0_13, %c0_14], %24 {strides = array<i32>} : memref<128x128xf32, #tpu.memory_space<vmem>>, vector<128x128xf32>,
    return
  }
  func.func @transform_0(%arg0: i32) -> (i32, i32) {
    %c0_i32 = arith.constant 0 : i32
    %c0_i32_0 = arith.constant 0 : i32
    return %arg0, %c0_i32 : i32, i32
  }
  func.func @transform_1(%arg0: i32) -> (i32, i32) {
    %c0_i32 = arith.constant 0 : i32
    %c0_i32_0 = arith.constant 0 : i32
    %c0_i32_1 = arith.constant 0 : i32
    return %c0_i32, %c0_i32_0 : i32, i32
  }
  func.func @transform_2(%arg0: i32) -> (i32, i32) {
    %c0_i32 = arith.constant 0 : i32
    %c0_i32_0 = arith.constant 0 : i32
    %c0_i32_1 = arith.constant 0 : i32
    return %c0_i32, %c0_i32_0 : i32, i32
  }
  func.func @transform_3(%arg0: i32) -> (i32, i32) {
    %c0_i32 = arith.constant 0 : i32
    %c0_i32_0 = arith.constant 0 : i32
    %c0_i32_1 = arith.constant 0 : i32
    return %c0_i32, %c0_i32_0 : i32, i32
  }
  func.func @transform_4(%arg0: i32) -> (i32, i32) {
    %c0_i32 = arith.constant 0 : i32
    %c0_i32_0 = arith.constant 0 : i32
    %c0_i32_1 = arith.constant 0 : i32
    return %c0_i32, %c0_i32_0 : i32, i32
  }
  func.func @transform_5(%arg0: i32) -> (i32, i32) {
    %c0_i32 = arith.constant 0 : i32
    %c0_i32_0 = arith.constant 0 : i32
    return %arg0, %c0_i32 : i32, i32
  }
}

module attributes {stable_mosaic.version = 11 : i64} {
  func.func @_conv_stats_kernel(%arg0: i32, %arg1: memref<128x16xf32, #tpu.memory_space<vmem>>, %arg2: memref<16x128xf32, #tpu.memory_space<vmem>>, %arg3: memref<128x128xf32, #tpu.memory_space<vmem>>, %arg4: memref<1x128xf32, #tpu.memory_space<vmem>>, %arg5: memref<1x128xf32, #tpu.memory_space<vmem>>) attributes {dimension_semantics = [#tpu.dimension_semantics<arbitrary>], iteration_bounds = array<i64: 1>, scalar_prefetch = 0 : i64, scratch_operands = 0 : i64, tpu.core_type = #tpu.core_type<tc>, window_params = [{transform_indices = @transform_0, window_bounds = array<i64: 128, 16>}, {pipeline_mode = #tpu.pipeline_mode<synchronous>, transform_indices = @transform_1, window_bounds = array<i64: 16, 128>}, {transform_indices = @transform_2, window_bounds = array<i64: 128, 128>}, {pipeline_mode = #tpu.pipeline_mode<synchronous>, transform_indices = @transform_3, window_bounds = array<i64: 1, 128>}, {pipeline_mode = #tpu.pipeline_mode<synchronous>, transform_indices = @transform_4, window_bounds = array<i64: 1, 128>}]} {
    %c0_i32 = arith.constant 0 : i32
    %0 = arith.cmpi eq, %arg0, %c0_i32 : i32
    %1 = arith.extui %0 : i1 to i32
    %c0_i32_0 = arith.constant 0 : i32
    %2 = arith.cmpi ne, %1, %c0_i32_0 : i32
    scf.if %2 {
      %cst_16 = arith.constant 0.000000e+00 : f32
      %18 = vector.broadcast %cst_16 : f32 to vector<1x128xf32>
      %c0_17 = arith.constant 0 : index
      %c0_18 = arith.constant 0 : index
      %19 = vector.load %arg4[%c0_17, %c0_18] : memref<1x128xf32, #tpu.memory_space<vmem>>, vector<1x128xf32>
      tpu.vector_store %arg4[%c0_17, %c0_18], %18 {strides = array<i32>} : memref<1x128xf32, #tpu.memory_space<vmem>>, vector<1x128xf32>,
      %cst_19 = arith.constant 0.000000e+00 : f32
      %20 = vector.broadcast %cst_19 : f32 to vector<1x128xf32>
      %c0_20 = arith.constant 0 : index
      %c0_21 = arith.constant 0 : index
      %21 = vector.load %arg5[%c0_20, %c0_21] : memref<1x128xf32, #tpu.memory_space<vmem>>, vector<1x128xf32>
      tpu.vector_store %arg5[%c0_20, %c0_21], %20 {strides = array<i32>} : memref<1x128xf32, #tpu.memory_space<vmem>>, vector<1x128xf32>,
    } else {
    }
    %c0 = arith.constant 0 : index
    %c0_1 = arith.constant 0 : index
    %3 = vector.load %arg1[%c0, %c0_1] : memref<128x16xf32, #tpu.memory_space<vmem>>, vector<128x16xf32>
    %c0_2 = arith.constant 0 : index
    %c0_3 = arith.constant 0 : index
    %4 = vector.load %arg2[%c0_2, %c0_3] : memref<16x128xf32, #tpu.memory_space<vmem>>, vector<16x128xf32>
    %cst = arith.constant dense<0.000000e+00> : vector<128x128xf32>
    %5 = tpu.matmul %3, %4, %cst {dimension_numbers = #tpu.dot_dimension_numbers<[1], [0], [0], [1], [0, 0, 1, 1], [], []>} : vector<128x16xf32>, vector<16x128xf32>, vector<128x128xf32> -> vector<128x128xf32>
    %c0_4 = arith.constant 0 : index
    %c0_5 = arith.constant 0 : index
    %6 = vector.load %arg3[%c0_4, %c0_5] : memref<128x128xf32, #tpu.memory_space<vmem>>, vector<128x128xf32>
    tpu.vector_store %arg3[%c0_4, %c0_5], %5 {strides = array<i32>} : memref<128x128xf32, #tpu.memory_space<vmem>>, vector<128x128xf32>,
    %c0_6 = arith.constant 0 : index
    %c0_7 = arith.constant 0 : index
    %7 = vector.load %arg4[%c0_6, %c0_7] : memref<1x128xf32, #tpu.memory_space<vmem>>, vector<1x128xf32>
    %cst_8 = arith.constant dense<0.000000e+00> : vector<128xf32>
    %8 = vector.multi_reduction <add>, %5, %cst_8 [0] : vector<128x128xf32> to vector<128xf32>
    %9 = vector.shape_cast %8 : vector<128xf32> to vector<1x128xf32>
    %10 = arith.addf %7, %9 : vector<1x128xf32>
    %c0_9 = arith.constant 0 : index
    %c0_10 = arith.constant 0 : index
    %11 = vector.load %arg4[%c0_9, %c0_10] : memref<1x128xf32, #tpu.memory_space<vmem>>, vector<1x128xf32>
    tpu.vector_store %arg4[%c0_9, %c0_10], %10 {strides = array<i32>} : memref<1x128xf32, #tpu.memory_space<vmem>>, vector<1x128xf32>,
    %c0_11 = arith.constant 0 : index
    %c0_12 = arith.constant 0 : index
    %12 = vector.load %arg5[%c0_11, %c0_12] : memref<1x128xf32, #tpu.memory_space<vmem>>, vector<1x128xf32>
    %13 = arith.mulf %5, %5 : vector<128x128xf32>
    %cst_13 = arith.constant dense<0.000000e+00> : vector<128xf32>
    %14 = vector.multi_reduction <add>, %13, %cst_13 [0] : vector<128x128xf32> to vector<128xf32>
    %15 = vector.shape_cast %14 : vector<128xf32> to vector<1x128xf32>
    %16 = arith.addf %12, %15 : vector<1x128xf32>
    %c0_14 = arith.constant 0 : index
    %c0_15 = arith.constant 0 : index
    %17 = vector.load %arg5[%c0_14, %c0_15] : memref<1x128xf32, #tpu.memory_space<vmem>>, vector<1x128xf32>
    tpu.vector_store %arg5[%c0_14, %c0_15], %16 {strides = array<i32>} : memref<1x128xf32, #tpu.memory_space<vmem>>, vector<1x128xf32>,
    return
  }
  func.func @transform_0(%arg0: i32) -> (i32, i32) {
    %c0_i32 = arith.constant 0 : i32
    %c0_i32_0 = arith.constant 0 : i32
    return %arg0, %c0_i32 : i32, i32
  }
  func.func @transform_1(%arg0: i32) -> (i32, i32) {
    %c0_i32 = arith.constant 0 : i32
    %c0_i32_0 = arith.constant 0 : i32
    %c0_i32_1 = arith.constant 0 : i32
    return %c0_i32, %c0_i32_0 : i32, i32
  }
  func.func @transform_2(%arg0: i32) -> (i32, i32) {
    %c0_i32 = arith.constant 0 : i32
    %c0_i32_0 = arith.constant 0 : i32
    return %arg0, %c0_i32 : i32, i32
  }
  func.func @transform_3(%arg0: i32) -> (i32, i32) {
    %c0_i32 = arith.constant 0 : i32
    %c0_i32_0 = arith.constant 0 : i32
    %c0_i32_1 = arith.constant 0 : i32
    return %c0_i32, %c0_i32_0 : i32, i32
  }
  func.func @transform_4(%arg0: i32) -> (i32, i32) {
    %c0_i32 = arith.constant 0 : i32
    %c0_i32_0 = arith.constant 0 : i32
    %c0_i32_1 = arith.constant 0 : i32
    return %c0_i32, %c0_i32_0 : i32, i32
  }
}

module attributes {stable_mosaic.version = 11 : i64} {
  func.func @_conv_stats_kernel(%arg0: i32, %arg1: memref<128x2xf32, #tpu.memory_space<vmem>>, %arg2: memref<2x128xf32, #tpu.memory_space<vmem>>, %arg3: memref<128x128xf32, #tpu.memory_space<vmem>>, %arg4: memref<1x128xf32, #tpu.memory_space<vmem>>, %arg5: memref<1x128xf32, #tpu.memory_space<vmem>>) attributes {dimension_semantics = [#tpu.dimension_semantics<arbitrary>], iteration_bounds = array<i64: 1>, scalar_prefetch = 0 : i64, scratch_operands = 0 : i64, tpu.core_type = #tpu.core_type<tc>, window_params = [{transform_indices = @transform_0, window_bounds = array<i64: 128, 2>}, {pipeline_mode = #tpu.pipeline_mode<synchronous>, transform_indices = @transform_1, window_bounds = array<i64: 2, 128>}, {transform_indices = @transform_2, window_bounds = array<i64: 128, 128>}, {pipeline_mode = #tpu.pipeline_mode<synchronous>, transform_indices = @transform_3, window_bounds = array<i64: 1, 128>}, {pipeline_mode = #tpu.pipeline_mode<synchronous>, transform_indices = @transform_4, window_bounds = array<i64: 1, 128>}]} {
    %c0_i32 = arith.constant 0 : i32
    %0 = arith.cmpi eq, %arg0, %c0_i32 : i32
    %1 = arith.extui %0 : i1 to i32
    %c0_i32_0 = arith.constant 0 : i32
    %2 = arith.cmpi ne, %1, %c0_i32_0 : i32
    scf.if %2 {
      %cst_16 = arith.constant 0.000000e+00 : f32
      %18 = vector.broadcast %cst_16 : f32 to vector<1x128xf32>
      %c0_17 = arith.constant 0 : index
      %c0_18 = arith.constant 0 : index
      %19 = vector.load %arg4[%c0_17, %c0_18] : memref<1x128xf32, #tpu.memory_space<vmem>>, vector<1x128xf32>
      tpu.vector_store %arg4[%c0_17, %c0_18], %18 {strides = array<i32>} : memref<1x128xf32, #tpu.memory_space<vmem>>, vector<1x128xf32>,
      %cst_19 = arith.constant 0.000000e+00 : f32
      %20 = vector.broadcast %cst_19 : f32 to vector<1x128xf32>
      %c0_20 = arith.constant 0 : index
      %c0_21 = arith.constant 0 : index
      %21 = vector.load %arg5[%c0_20, %c0_21] : memref<1x128xf32, #tpu.memory_space<vmem>>, vector<1x128xf32>
      tpu.vector_store %arg5[%c0_20, %c0_21], %20 {strides = array<i32>} : memref<1x128xf32, #tpu.memory_space<vmem>>, vector<1x128xf32>,
    } else {
    }
    %c0 = arith.constant 0 : index
    %c0_1 = arith.constant 0 : index
    %3 = vector.load %arg1[%c0, %c0_1] : memref<128x2xf32, #tpu.memory_space<vmem>>, vector<128x2xf32>
    %c0_2 = arith.constant 0 : index
    %c0_3 = arith.constant 0 : index
    %4 = vector.load %arg2[%c0_2, %c0_3] : memref<2x128xf32, #tpu.memory_space<vmem>>, vector<2x128xf32>
    %cst = arith.constant dense<0.000000e+00> : vector<128x128xf32>
    %5 = tpu.matmul %3, %4, %cst {dimension_numbers = #tpu.dot_dimension_numbers<[1], [0], [0], [1], [0, 0, 1, 1], [], []>} : vector<128x2xf32>, vector<2x128xf32>, vector<128x128xf32> -> vector<128x128xf32>
    %c0_4 = arith.constant 0 : index
    %c0_5 = arith.constant 0 : index
    %6 = vector.load %arg3[%c0_4, %c0_5] : memref<128x128xf32, #tpu.memory_space<vmem>>, vector<128x128xf32>
    tpu.vector_store %arg3[%c0_4, %c0_5], %5 {strides = array<i32>} : memref<128x128xf32, #tpu.memory_space<vmem>>, vector<128x128xf32>,
    %c0_6 = arith.constant 0 : index
    %c0_7 = arith.constant 0 : index
    %7 = vector.load %arg4[%c0_6, %c0_7] : memref<1x128xf32, #tpu.memory_space<vmem>>, vector<1x128xf32>
    %cst_8 = arith.constant dense<0.000000e+00> : vector<128xf32>
    %8 = vector.multi_reduction <add>, %5, %cst_8 [0] : vector<128x128xf32> to vector<128xf32>
    %9 = vector.shape_cast %8 : vector<128xf32> to vector<1x128xf32>
    %10 = arith.addf %7, %9 : vector<1x128xf32>
    %c0_9 = arith.constant 0 : index
    %c0_10 = arith.constant 0 : index
    %11 = vector.load %arg4[%c0_9, %c0_10] : memref<1x128xf32, #tpu.memory_space<vmem>>, vector<1x128xf32>
    tpu.vector_store %arg4[%c0_9, %c0_10], %10 {strides = array<i32>} : memref<1x128xf32, #tpu.memory_space<vmem>>, vector<1x128xf32>,
    %c0_11 = arith.constant 0 : index
    %c0_12 = arith.constant 0 : index
    %12 = vector.load %arg5[%c0_11, %c0_12] : memref<1x128xf32, #tpu.memory_space<vmem>>, vector<1x128xf32>
    %13 = arith.mulf %5, %5 : vector<128x128xf32>
    %cst_13 = arith.constant dense<0.000000e+00> : vector<128xf32>
    %14 = vector.multi_reduction <add>, %13, %cst_13 [0] : vector<128x128xf32> to vector<128xf32>
    %15 = vector.shape_cast %14 : vector<128xf32> to vector<1x128xf32>
    %16 = arith.addf %12, %15 : vector<1x128xf32>
    %c0_14 = arith.constant 0 : index
    %c0_15 = arith.constant 0 : index
    %17 = vector.load %arg5[%c0_14, %c0_15] : memref<1x128xf32, #tpu.memory_space<vmem>>, vector<1x128xf32>
    tpu.vector_store %arg5[%c0_14, %c0_15], %16 {strides = array<i32>} : memref<1x128xf32, #tpu.memory_space<vmem>>, vector<1x128xf32>,
    return
  }
  func.func @transform_0(%arg0: i32) -> (i32, i32) {
    %c0_i32 = arith.constant 0 : i32
    %c0_i32_0 = arith.constant 0 : i32
    return %arg0, %c0_i32 : i32, i32
  }
  func.func @transform_1(%arg0: i32) -> (i32, i32) {
    %c0_i32 = arith.constant 0 : i32
    %c0_i32_0 = arith.constant 0 : i32
    %c0_i32_1 = arith.constant 0 : i32
    return %c0_i32, %c0_i32_0 : i32, i32
  }
  func.func @transform_2(%arg0: i32) -> (i32, i32) {
    %c0_i32 = arith.constant 0 : i32
    %c0_i32_0 = arith.constant 0 : i32
    return %arg0, %c0_i32 : i32, i32
  }
  func.func @transform_3(%arg0: i32) -> (i32, i32) {
    %c0_i32 = arith.constant 0 : i32
    %c0_i32_0 = arith.constant 0 : i32
    %c0_i32_1 = arith.constant 0 : i32
    return %c0_i32, %c0_i32_0 : i32, i32
  }
  func.func @transform_4(%arg0: i32) -> (i32, i32) {
    %c0_i32 = arith.constant 0 : i32
    %c0_i32_0 = arith.constant 0 : i32
    %c0_i32_1 = arith.constant 0 : i32
    return %c0_i32, %c0_i32_0 : i32, i32
  }
}

module attributes {stable_mosaic.version = 11 : i64} {
  func.func @kernel(%arg0: i32, %arg1: memref<128x128xf32, #tpu.memory_space<vmem>>, %arg2: memref<128x128xf32, #tpu.memory_space<vmem>>, %arg3: memref<1x128xf32, #tpu.memory_space<vmem>>, %arg4: memref<1x128xf32, #tpu.memory_space<vmem>>, %arg5: memref<1x128xf32, #tpu.memory_space<vmem>>, %arg6: memref<1x128xf32, #tpu.memory_space<vmem>>, %arg7: memref<1x128xf32, #tpu.memory_space<vmem>>, %arg8: memref<1x128xf32, #tpu.memory_space<vmem>>, %arg9: memref<1x128xf32, #tpu.memory_space<vmem>>, %arg10: memref<1x128xf32, #tpu.memory_space<vmem>>, %arg11: memref<128x128xf32, #tpu.memory_space<vmem>>) attributes {dimension_semantics = [#tpu.dimension_semantics<parallel>], iteration_bounds = array<i64: 1>, scalar_prefetch = 0 : i64, scratch_operands = 0 : i64, tpu.core_type = #tpu.core_type<tc>, window_params = [{transform_indices = @transform_0, window_bounds = array<i64: 128, 128>}, {transform_indices = @transform_1, window_bounds = array<i64: 128, 128>}, {pipeline_mode = #tpu.pipeline_mode<synchronous>, transform_indices = @transform_2, window_bounds = array<i64: 1, 128>}, {pipeline_mode = #tpu.pipeline_mode<synchronous>, transform_indices = @transform_3, window_bounds = array<i64: 1, 128>}, {pipeline_mode = #tpu.pipeline_mode<synchronous>, transform_indices = @transform_4, window_bounds = array<i64: 1, 128>}, {pipeline_mode = #tpu.pipeline_mode<synchronous>, transform_indices = @transform_5, window_bounds = array<i64: 1, 128>}, {pipeline_mode = #tpu.pipeline_mode<synchronous>, transform_indices = @transform_6, window_bounds = array<i64: 1, 128>}, {pipeline_mode = #tpu.pipeline_mode<synchronous>, transform_indices = @transform_7, window_bounds = array<i64: 1, 128>}, {pipeline_mode = #tpu.pipeline_mode<synchronous>, transform_indices = @transform_8, window_bounds = array<i64: 1, 128>}, {pipeline_mode = #tpu.pipeline_mode<synchronous>, transform_indices = @transform_9, window_bounds = array<i64: 1, 128>}, {transform_indices = @transform_10, window_bounds = array<i64: 128, 128>}]} {
    %c0 = arith.constant 0 : index
    %c0_0 = arith.constant 0 : index
    %0 = vector.load %arg1[%c0, %c0_0] : memref<128x128xf32, #tpu.memory_space<vmem>>, vector<128x128xf32>
    %c0_1 = arith.constant 0 : index
    %c0_2 = arith.constant 0 : index
    %1 = vector.load %arg3[%c0_1, %c0_2] : memref<1x128xf32, #tpu.memory_space<vmem>>, vector<1x128xf32>
    %c0_3 = arith.constant 0 : index
    %c0_4 = arith.constant 0 : index
    %2 = vector.load %arg4[%c0_3, %c0_4] : memref<1x128xf32, #tpu.memory_space<vmem>>, vector<1x128xf32>
    %c0_5 = arith.constant 0 : index
    %c0_6 = arith.constant 0 : index
    %3 = vector.load %arg5[%c0_5, %c0_6] : memref<1x128xf32, #tpu.memory_space<vmem>>, vector<1x128xf32>
    %c0_7 = arith.constant 0 : index
    %c0_8 = arith.constant 0 : index
    %4 = vector.load %arg6[%c0_7, %c0_8] : memref<1x128xf32, #tpu.memory_space<vmem>>, vector<1x128xf32>
    %cst = arith.constant 7.812500e-03 : f32
    %5 = vector.broadcast %cst : f32 to vector<1x128xf32>
    %6 = arith.mulf %1, %5 : vector<1x128xf32>
    %cst_9 = arith.constant 7.812500e-03 : f32
    %7 = vector.broadcast %cst_9 : f32 to vector<1x128xf32>
    %8 = arith.mulf %2, %7 : vector<1x128xf32>
    %9 = arith.mulf %6, %6 : vector<1x128xf32>
    %10 = arith.subf %8, %9 : vector<1x128xf32>
    %cst_10 = arith.constant 0.000000e+00 : f32
    %11 = vector.broadcast %cst_10 : f32 to vector<1x128xf32>
    %12 = arith.maximumf %10, %11 : vector<1x128xf32>
    %13 = vector.broadcast %6 : vector<1x128xf32> to vector<128x128xf32>
    %14 = arith.subf %0, %13 : vector<128x128xf32>
    %cst_11 = arith.constant 9.99999974E-6 : f32
    %15 = vector.broadcast %cst_11 : f32 to vector<1x128xf32>
    %16 = arith.addf %12, %15 : vector<1x128xf32>
    %17 = math.rsqrt %16 : vector<1x128xf32>
    %18 = arith.mulf %17, %3 : vector<1x128xf32>
    %19 = vector.broadcast %18 : vector<1x128xf32> to vector<128x128xf32>
    %20 = arith.mulf %14, %19 : vector<128x128xf32>
    %21 = vector.broadcast %4 : vector<1x128xf32> to vector<128x128xf32>
    %22 = arith.addf %20, %21 : vector<128x128xf32>
    %c0_12 = arith.constant 0 : index
    %c0_13 = arith.constant 0 : index
    %23 = vector.load %arg2[%c0_12, %c0_13] : memref<128x128xf32, #tpu.memory_space<vmem>>, vector<128x128xf32>
    %c0_14 = arith.constant 0 : index
    %c0_15 = arith.constant 0 : index
    %24 = vector.load %arg7[%c0_14, %c0_15] : memref<1x128xf32, #tpu.memory_space<vmem>>, vector<1x128xf32>
    %c0_16 = arith.constant 0 : index
    %c0_17 = arith.constant 0 : index
    %25 = vector.load %arg8[%c0_16, %c0_17] : memref<1x128xf32, #tpu.memory_space<vmem>>, vector<1x128xf32>
    %c0_18 = arith.constant 0 : index
    %c0_19 = arith.constant 0 : index
    %26 = vector.load %arg9[%c0_18, %c0_19] : memref<1x128xf32, #tpu.memory_space<vmem>>, vector<1x128xf32>
    %c0_20 = arith.constant 0 : index
    %c0_21 = arith.constant 0 : index
    %27 = vector.load %arg10[%c0_20, %c0_21] : memref<1x128xf32, #tpu.memory_space<vmem>>, vector<1x128xf32>
    %cst_22 = arith.constant 7.812500e-03 : f32
    %28 = vector.broadcast %cst_22 : f32 to vector<1x128xf32>
    %29 = arith.mulf %24, %28 : vector<1x128xf32>
    %cst_23 = arith.constant 7.812500e-03 : f32
    %30 = vector.broadcast %cst_23 : f32 to vector<1x128xf32>
    %31 = arith.mulf %25, %30 : vector<1x128xf32>
    %32 = arith.mulf %29, %29 : vector<1x128xf32>
    %33 = arith.subf %31, %32 : vector<1x128xf32>
    %cst_24 = arith.constant 0.000000e+00 : f32
    %34 = vector.broadcast %cst_24 : f32 to vector<1x128xf32>
    %35 = arith.maximumf %33, %34 : vector<1x128xf32>
    %36 = vector.broadcast %29 : vector<1x128xf32> to vector<128x128xf32>
    %37 = arith.subf %23, %36 : vector<128x128xf32>
    %cst_25 = arith.constant 9.99999974E-6 : f32
    %38 = vector.broadcast %cst_25 : f32 to vector<1x128xf32>
    %39 = arith.addf %35, %38 : vector<1x128xf32>
    %40 = math.rsqrt %39 : vector<1x128xf32>
    %41 = arith.mulf %40, %26 : vector<1x128xf32>
    %42 = vector.broadcast %41 : vector<1x128xf32> to vector<128x128xf32>
    %43 = arith.mulf %37, %42 : vector<128x128xf32>
    %44 = vector.broadcast %27 : vector<1x128xf32> to vector<128x128xf32>
    %45 = arith.addf %43, %44 : vector<128x128xf32>
    %46 = arith.addf %22, %45 : vector<128x128xf32>
    %cst_26 = arith.constant 0.000000e+00 : f32
    %47 = vector.broadcast %cst_26 : f32 to vector<128x128xf32>
    %48 = arith.maximumf %46, %47 : vector<128x128xf32>
    %c0_27 = arith.constant 0 : index
    %c0_28 = arith.constant 0 : index
    %49 = vector.load %arg11[%c0_27, %c0_28] : memref<128x128xf32, #tpu.memory_space<vmem>>, vector<128x128xf32>
    tpu.vector_store %arg11[%c0_27, %c0_28], %48 {strides = array<i32>} : memref<128x128xf32, #tpu.memory_space<vmem>>, vector<128x128xf32>,
    return
  }
  func.func @transform_0(%arg0: i32) -> (i32, i32) {
    %c0_i32 = arith.constant 0 : i32
    %c0_i32_0 = arith.constant 0 : i32
    return %arg0, %c0_i32 : i32, i32
  }
  func.func @transform_1(%arg0: i32) -> (i32, i32) {
    %c0_i32 = arith.constant 0 : i32
    %c0_i32_0 = arith.constant 0 : i32
    return %arg0, %c0_i32 : i32, i32
  }
  func.func @transform_2(%arg0: i32) -> (i32, i32) {
    %c0_i32 = arith.constant 0 : i32
    %c0_i32_0 = arith.constant 0 : i32
    %c0_i32_1 = arith.constant 0 : i32
    return %c0_i32, %c0_i32_0 : i32, i32
  }
  func.func @transform_3(%arg0: i32) -> (i32, i32) {
    %c0_i32 = arith.constant 0 : i32
    %c0_i32_0 = arith.constant 0 : i32
    %c0_i32_1 = arith.constant 0 : i32
    return %c0_i32, %c0_i32_0 : i32, i32
  }
  func.func @transform_4(%arg0: i32) -> (i32, i32) {
    %c0_i32 = arith.constant 0 : i32
    %c0_i32_0 = arith.constant 0 : i32
    %c0_i32_1 = arith.constant 0 : i32
    return %c0_i32, %c0_i32_0 : i32, i32
  }
  func.func @transform_5(%arg0: i32) -> (i32, i32) {
    %c0_i32 = arith.constant 0 : i32
    %c0_i32_0 = arith.constant 0 : i32
    %c0_i32_1 = arith.constant 0 : i32
    return %c0_i32, %c0_i32_0 : i32, i32
  }
  func.func @transform_6(%arg0: i32) -> (i32, i32) {
    %c0_i32 = arith.constant 0 : i32
    %c0_i32_0 = arith.constant 0 : i32
    %c0_i32_1 = arith.constant 0 : i32
    return %c0_i32, %c0_i32_0 : i32, i32
  }
  func.func @transform_7(%arg0: i32) -> (i32, i32) {
    %c0_i32 = arith.constant 0 : i32
    %c0_i32_0 = arith.constant 0 : i32
    %c0_i32_1 = arith.constant 0 : i32
    return %c0_i32, %c0_i32_0 : i32, i32
  }
  func.func @transform_8(%arg0: i32) -> (i32, i32) {
    %c0_i32 = arith.constant 0 : i32
    %c0_i32_0 = arith.constant 0 : i32
    %c0_i32_1 = arith.constant 0 : i32
    return %c0_i32, %c0_i32_0 : i32, i32
  }
  func.func @transform_9(%arg0: i32) -> (i32, i32) {
    %c0_i32 = arith.constant 0 : i32
    %c0_i32_0 = arith.constant 0 : i32
    %c0_i32_1 = arith.constant 0 : i32
    return %c0_i32, %c0_i32_0 : i32, i32
  }
  func.func @transform_10(%arg0: i32) -> (i32, i32) {
    %c0_i32 = arith.constant 0 : i32
    %c0_i32_0 = arith.constant 0 : i32
    return %arg0, %c0_i32 : i32, i32
  }
}

module attributes {stable_mosaic.version = 11 : i64} {
  func.func @_conv_stats_kernel(%arg0: i32, %arg1: memref<128x32xf32, #tpu.memory_space<vmem>>, %arg2: memref<32x128xf32, #tpu.memory_space<vmem>>, %arg3: memref<128x128xf32, #tpu.memory_space<vmem>>, %arg4: memref<1x128xf32, #tpu.memory_space<vmem>>, %arg5: memref<1x128xf32, #tpu.memory_space<vmem>>) attributes {dimension_semantics = [#tpu.dimension_semantics<arbitrary>], iteration_bounds = array<i64: 1>, scalar_prefetch = 0 : i64, scratch_operands = 0 : i64, tpu.core_type = #tpu.core_type<tc>, window_params = [{transform_indices = @transform_0, window_bounds = array<i64: 128, 32>}, {pipeline_mode = #tpu.pipeline_mode<synchronous>, transform_indices = @transform_1, window_bounds = array<i64: 32, 128>}, {transform_indices = @transform_2, window_bounds = array<i64: 128, 128>}, {pipeline_mode = #tpu.pipeline_mode<synchronous>, transform_indices = @transform_3, window_bounds = array<i64: 1, 128>}, {pipeline_mode = #tpu.pipeline_mode<synchronous>, transform_indices = @transform_4, window_bounds = array<i64: 1, 128>}]} {
    %c0_i32 = arith.constant 0 : i32
    %0 = arith.cmpi eq, %arg0, %c0_i32 : i32
    %1 = arith.extui %0 : i1 to i32
    %c0_i32_0 = arith.constant 0 : i32
    %2 = arith.cmpi ne, %1, %c0_i32_0 : i32
    scf.if %2 {
      %cst_16 = arith.constant 0.000000e+00 : f32
      %18 = vector.broadcast %cst_16 : f32 to vector<1x128xf32>
      %c0_17 = arith.constant 0 : index
      %c0_18 = arith.constant 0 : index
      %19 = vector.load %arg4[%c0_17, %c0_18] : memref<1x128xf32, #tpu.memory_space<vmem>>, vector<1x128xf32>
      tpu.vector_store %arg4[%c0_17, %c0_18], %18 {strides = array<i32>} : memref<1x128xf32, #tpu.memory_space<vmem>>, vector<1x128xf32>,
      %cst_19 = arith.constant 0.000000e+00 : f32
      %20 = vector.broadcast %cst_19 : f32 to vector<1x128xf32>
      %c0_20 = arith.constant 0 : index
      %c0_21 = arith.constant 0 : index
      %21 = vector.load %arg5[%c0_20, %c0_21] : memref<1x128xf32, #tpu.memory_space<vmem>>, vector<1x128xf32>
      tpu.vector_store %arg5[%c0_20, %c0_21], %20 {strides = array<i32>} : memref<1x128xf32, #tpu.memory_space<vmem>>, vector<1x128xf32>,
    } else {
    }
    %c0 = arith.constant 0 : index
    %c0_1 = arith.constant 0 : index
    %3 = vector.load %arg1[%c0, %c0_1] : memref<128x32xf32, #tpu.memory_space<vmem>>, vector<128x32xf32>
    %c0_2 = arith.constant 0 : index
    %c0_3 = arith.constant 0 : index
    %4 = vector.load %arg2[%c0_2, %c0_3] : memref<32x128xf32, #tpu.memory_space<vmem>>, vector<32x128xf32>
    %cst = arith.constant dense<0.000000e+00> : vector<128x128xf32>
    %5 = tpu.matmul %3, %4, %cst {dimension_numbers = #tpu.dot_dimension_numbers<[1], [0], [0], [1], [0, 0, 1, 1], [], []>} : vector<128x32xf32>, vector<32x128xf32>, vector<128x128xf32> -> vector<128x128xf32>
    %c0_4 = arith.constant 0 : index
    %c0_5 = arith.constant 0 : index
    %6 = vector.load %arg3[%c0_4, %c0_5] : memref<128x128xf32, #tpu.memory_space<vmem>>, vector<128x128xf32>
    tpu.vector_store %arg3[%c0_4, %c0_5], %5 {strides = array<i32>} : memref<128x128xf32, #tpu.memory_space<vmem>>, vector<128x128xf32>,
    %c0_6 = arith.constant 0 : index
    %c0_7 = arith.constant 0 : index
    %7 = vector.load %arg4[%c0_6, %c0_7] : memref<1x128xf32, #tpu.memory_space<vmem>>, vector<1x128xf32>
    %cst_8 = arith.constant dense<0.000000e+00> : vector<128xf32>
    %8 = vector.multi_reduction <add>, %5, %cst_8 [0] : vector<128x128xf32> to vector<128xf32>
    %9 = vector.shape_cast %8 : vector<128xf32> to vector<1x128xf32>
    %10 = arith.addf %7, %9 : vector<1x128xf32>
    %c0_9 = arith.constant 0 : index
    %c0_10 = arith.constant 0 : index
    %11 = vector.load %arg4[%c0_9, %c0_10] : memref<1x128xf32, #tpu.memory_space<vmem>>, vector<1x128xf32>
    tpu.vector_store %arg4[%c0_9, %c0_10], %10 {strides = array<i32>} : memref<1x128xf32, #tpu.memory_space<vmem>>, vector<1x128xf32>,
    %c0_11 = arith.constant 0 : index
    %c0_12 = arith.constant 0 : index
    %12 = vector.load %arg5[%c0_11, %c0_12] : memref<1x128xf32, #tpu.memory_space<vmem>>, vector<1x128xf32>
    %13 = arith.mulf %5, %5 : vector<128x128xf32>
    %cst_13 = arith.constant dense<0.000000e+00> : vector<128xf32>
    %14 = vector.multi_reduction <add>, %13, %cst_13 [0] : vector<128x128xf32> to vector<128xf32>
    %15 = vector.shape_cast %14 : vector<128xf32> to vector<1x128xf32>
    %16 = arith.addf %12, %15 : vector<1x128xf32>
    %c0_14 = arith.constant 0 : index
    %c0_15 = arith.constant 0 : index
    %17 = vector.load %arg5[%c0_14, %c0_15] : memref<1x128xf32, #tpu.memory_space<vmem>>, vector<1x128xf32>
    tpu.vector_store %arg5[%c0_14, %c0_15], %16 {strides = array<i32>} : memref<1x128xf32, #tpu.memory_space<vmem>>, vector<1x128xf32>,
    return
  }
  func.func @transform_0(%arg0: i32) -> (i32, i32) {
    %c0_i32 = arith.constant 0 : i32
    %c0_i32_0 = arith.constant 0 : i32
    return %arg0, %c0_i32 : i32, i32
  }
  func.func @transform_1(%arg0: i32) -> (i32, i32) {
    %c0_i32 = arith.constant 0 : i32
    %c0_i32_0 = arith.constant 0 : i32
    %c0_i32_1 = arith.constant 0 : i32
    return %c0_i32, %c0_i32_0 : i32, i32
  }
  func.func @transform_2(%arg0: i32) -> (i32, i32) {
    %c0_i32 = arith.constant 0 : i32
    %c0_i32_0 = arith.constant 0 : i32
    return %arg0, %c0_i32 : i32, i32
  }
  func.func @transform_3(%arg0: i32) -> (i32, i32) {
    %c0_i32 = arith.constant 0 : i32
    %c0_i32_0 = arith.constant 0 : i32
    %c0_i32_1 = arith.constant 0 : i32
    return %c0_i32, %c0_i32_0 : i32, i32
  }
  func.func @transform_4(%arg0: i32) -> (i32, i32) {
    %c0_i32 = arith.constant 0 : i32
    %c0_i32_0 = arith.constant 0 : i32
    %c0_i32_1 = arith.constant 0 : i32
    return %c0_i32, %c0_i32_0 : i32, i32
  }
}

module attributes {stable_mosaic.version = 11 : i64} {
  func.func @kernel(%arg0: i32, %arg1: memref<128x128xf32, #tpu.memory_space<vmem>>, %arg2: memref<128x128xf32, #tpu.memory_space<vmem>>, %arg3: memref<1x128xf32, #tpu.memory_space<vmem>>, %arg4: memref<1x128xf32, #tpu.memory_space<vmem>>, %arg5: memref<1x128xf32, #tpu.memory_space<vmem>>, %arg6: memref<1x128xf32, #tpu.memory_space<vmem>>, %arg7: memref<128x128xf32, #tpu.memory_space<vmem>>) attributes {dimension_semantics = [#tpu.dimension_semantics<parallel>], iteration_bounds = array<i64: 1>, scalar_prefetch = 0 : i64, scratch_operands = 0 : i64, tpu.core_type = #tpu.core_type<tc>, window_params = [{transform_indices = @transform_0, window_bounds = array<i64: 128, 128>}, {transform_indices = @transform_1, window_bounds = array<i64: 128, 128>}, {pipeline_mode = #tpu.pipeline_mode<synchronous>, transform_indices = @transform_2, window_bounds = array<i64: 1, 128>}, {pipeline_mode = #tpu.pipeline_mode<synchronous>, transform_indices = @transform_3, window_bounds = array<i64: 1, 128>}, {pipeline_mode = #tpu.pipeline_mode<synchronous>, transform_indices = @transform_4, window_bounds = array<i64: 1, 128>}, {pipeline_mode = #tpu.pipeline_mode<synchronous>, transform_indices = @transform_5, window_bounds = array<i64: 1, 128>}, {transform_indices = @transform_6, window_bounds = array<i64: 128, 128>}]} {
    %c0 = arith.constant 0 : index
    %c0_0 = arith.constant 0 : index
    %0 = vector.load %arg1[%c0, %c0_0] : memref<128x128xf32, #tpu.memory_space<vmem>>, vector<128x128xf32>
    %c0_1 = arith.constant 0 : index
    %c0_2 = arith.constant 0 : index
    %1 = vector.load %arg3[%c0_1, %c0_2] : memref<1x128xf32, #tpu.memory_space<vmem>>, vector<1x128xf32>
    %c0_3 = arith.constant 0 : index
    %c0_4 = arith.constant 0 : index
    %2 = vector.load %arg4[%c0_3, %c0_4] : memref<1x128xf32, #tpu.memory_space<vmem>>, vector<1x128xf32>
    %c0_5 = arith.constant 0 : index
    %c0_6 = arith.constant 0 : index
    %3 = vector.load %arg5[%c0_5, %c0_6] : memref<1x128xf32, #tpu.memory_space<vmem>>, vector<1x128xf32>
    %c0_7 = arith.constant 0 : index
    %c0_8 = arith.constant 0 : index
    %4 = vector.load %arg6[%c0_7, %c0_8] : memref<1x128xf32, #tpu.memory_space<vmem>>, vector<1x128xf32>
    %cst = arith.constant 7.812500e-03 : f32
    %5 = vector.broadcast %cst : f32 to vector<1x128xf32>
    %6 = arith.mulf %1, %5 : vector<1x128xf32>
    %cst_9 = arith.constant 7.812500e-03 : f32
    %7 = vector.broadcast %cst_9 : f32 to vector<1x128xf32>
    %8 = arith.mulf %2, %7 : vector<1x128xf32>
    %9 = arith.mulf %6, %6 : vector<1x128xf32>
    %10 = arith.subf %8, %9 : vector<1x128xf32>
    %cst_10 = arith.constant 0.000000e+00 : f32
    %11 = vector.broadcast %cst_10 : f32 to vector<1x128xf32>
    %12 = arith.maximumf %10, %11 : vector<1x128xf32>
    %13 = vector.broadcast %6 : vector<1x128xf32> to vector<128x128xf32>
    %14 = arith.subf %0, %13 : vector<128x128xf32>
    %cst_11 = arith.constant 9.99999974E-6 : f32
    %15 = vector.broadcast %cst_11 : f32 to vector<1x128xf32>
    %16 = arith.addf %12, %15 : vector<1x128xf32>
    %17 = math.rsqrt %16 : vector<1x128xf32>
    %18 = arith.mulf %17, %3 : vector<1x128xf32>
    %19 = vector.broadcast %18 : vector<1x128xf32> to vector<128x128xf32>
    %20 = arith.mulf %14, %19 : vector<128x128xf32>
    %21 = vector.broadcast %4 : vector<1x128xf32> to vector<128x128xf32>
    %22 = arith.addf %20, %21 : vector<128x128xf32>
    %c0_12 = arith.constant 0 : index
    %c0_13 = arith.constant 0 : index
    %23 = vector.load %arg2[%c0_12, %c0_13] : memref<128x128xf32, #tpu.memory_space<vmem>>, vector<128x128xf32>
    %24 = arith.addf %22, %23 : vector<128x128xf32>
    %cst_14 = arith.constant 0.000000e+00 : f32
    %25 = vector.broadcast %cst_14 : f32 to vector<128x128xf32>
    %26 = arith.maximumf %24, %25 : vector<128x128xf32>
    %c0_15 = arith.constant 0 : index
    %c0_16 = arith.constant 0 : index
    %27 = vector.load %arg7[%c0_15, %c0_16] : memref<128x128xf32, #tpu.memory_space<vmem>>, vector<128x128xf32>
    tpu.vector_store %arg7[%c0_15, %c0_16], %26 {strides = array<i32>} : memref<128x128xf32, #tpu.memory_space<vmem>>, vector<128x128xf32>,
    return
  }
  func.func @transform_0(%arg0: i32) -> (i32, i32) {
    %c0_i32 = arith.constant 0 : i32
    %c0_i32_0 = arith.constant 0 : i32
    return %arg0, %c0_i32 : i32, i32
  }
  func.func @transform_1(%arg0: i32) -> (i32, i32) {
    %c0_i32 = arith.constant 0 : i32
    %c0_i32_0 = arith.constant 0 : i32
    return %arg0, %c0_i32 : i32, i32
  }
  func.func @transform_2(%arg0: i32) -> (i32, i32) {
    %c0_i32 = arith.constant 0 : i32
    %c0_i32_0 = arith.constant 0 : i32
    %c0_i32_1 = arith.constant 0 : i32
    return %c0_i32, %c0_i32_0 : i32, i32
  }
  func.func @transform_3(%arg0: i32) -> (i32, i32) {
    %c0_i32 = arith.constant 0 : i32
    %c0_i32_0 = arith.constant 0 : i32
    %c0_i32_1 = arith.constant 0 : i32
    return %c0_i32, %c0_i32_0 : i32, i32
  }
  func.func @transform_4(%arg0: i32) -> (i32, i32) {
    %c0_i32 = arith.constant 0 : i32
    %c0_i32_0 = arith.constant 0 : i32
    %c0_i32_1 = arith.constant 0 : i32
    return %c0_i32, %c0_i32_0 : i32, i32
  }
  func.func @transform_5(%arg0: i32) -> (i32, i32) {
    %c0_i32 = arith.constant 0 : i32
    %c0_i32_0 = arith.constant 0 : i32
    %c0_i32_1 = arith.constant 0 : i32
    return %c0_i32, %c0_i32_0 : i32, i32
  }
  func.func @transform_6(%arg0: i32) -> (i32, i32) {
    %c0_i32 = arith.constant 0 : i32
    %c0_i32_0 = arith.constant 0 : i32
    return %arg0, %c0_i32 : i32, i32
  }
}

module attributes {stable_mosaic.version = 11 : i64} {
  func.func @kernel(%arg0: i32, %arg1: memref<32x128xf32, #tpu.memory_space<vmem>>, %arg2: memref<1x128xf32, #tpu.memory_space<vmem>>, %arg3: memref<1x128xf32, #tpu.memory_space<vmem>>, %arg4: memref<1x128xf32, #tpu.memory_space<vmem>>, %arg5: memref<1x128xf32, #tpu.memory_space<vmem>>, %arg6: memref<32x128xf32, #tpu.memory_space<vmem>>) attributes {dimension_semantics = [#tpu.dimension_semantics<parallel>], iteration_bounds = array<i64: 1>, scalar_prefetch = 0 : i64, scratch_operands = 0 : i64, tpu.core_type = #tpu.core_type<tc>, window_params = [{transform_indices = @transform_0, window_bounds = array<i64: 32, 128>}, {pipeline_mode = #tpu.pipeline_mode<synchronous>, transform_indices = @transform_1, window_bounds = array<i64: 1, 128>}, {pipeline_mode = #tpu.pipeline_mode<synchronous>, transform_indices = @transform_2, window_bounds = array<i64: 1, 128>}, {pipeline_mode = #tpu.pipeline_mode<synchronous>, transform_indices = @transform_3, window_bounds = array<i64: 1, 128>}, {pipeline_mode = #tpu.pipeline_mode<synchronous>, transform_indices = @transform_4, window_bounds = array<i64: 1, 128>}, {transform_indices = @transform_5, window_bounds = array<i64: 32, 128>}]} {
    %c0 = arith.constant 0 : index
    %c0_0 = arith.constant 0 : index
    %0 = vector.load %arg1[%c0, %c0_0] : memref<32x128xf32, #tpu.memory_space<vmem>>, vector<32x128xf32>
    %c0_1 = arith.constant 0 : index
    %c0_2 = arith.constant 0 : index
    %1 = vector.load %arg2[%c0_1, %c0_2] : memref<1x128xf32, #tpu.memory_space<vmem>>, vector<1x128xf32>
    %c0_3 = arith.constant 0 : index
    %c0_4 = arith.constant 0 : index
    %2 = vector.load %arg3[%c0_3, %c0_4] : memref<1x128xf32, #tpu.memory_space<vmem>>, vector<1x128xf32>
    %c0_5 = arith.constant 0 : index
    %c0_6 = arith.constant 0 : index
    %3 = vector.load %arg4[%c0_5, %c0_6] : memref<1x128xf32, #tpu.memory_space<vmem>>, vector<1x128xf32>
    %c0_7 = arith.constant 0 : index
    %c0_8 = arith.constant 0 : index
    %4 = vector.load %arg5[%c0_7, %c0_8] : memref<1x128xf32, #tpu.memory_space<vmem>>, vector<1x128xf32>
    %cst = arith.constant 3.125000e-02 : f32
    %5 = vector.broadcast %cst : f32 to vector<1x128xf32>
    %6 = arith.mulf %1, %5 : vector<1x128xf32>
    %cst_9 = arith.constant 3.125000e-02 : f32
    %7 = vector.broadcast %cst_9 : f32 to vector<1x128xf32>
    %8 = arith.mulf %2, %7 : vector<1x128xf32>
    %9 = arith.mulf %6, %6 : vector<1x128xf32>
    %10 = arith.subf %8, %9 : vector<1x128xf32>
    %cst_10 = arith.constant 0.000000e+00 : f32
    %11 = vector.broadcast %cst_10 : f32 to vector<1x128xf32>
    %12 = arith.maximumf %10, %11 : vector<1x128xf32>
    %13 = vector.broadcast %6 : vector<1x128xf32> to vector<32x128xf32>
    %14 = arith.subf %0, %13 : vector<32x128xf32>
    %cst_11 = arith.constant 9.99999974E-6 : f32
    %15 = vector.broadcast %cst_11 : f32 to vector<1x128xf32>
    %16 = arith.addf %12, %15 : vector<1x128xf32>
    %17 = math.rsqrt %16 : vector<1x128xf32>
    %18 = arith.mulf %17, %3 : vector<1x128xf32>
    %19 = vector.broadcast %18 : vector<1x128xf32> to vector<32x128xf32>
    %20 = arith.mulf %14, %19 : vector<32x128xf32>
    %21 = vector.broadcast %4 : vector<1x128xf32> to vector<32x128xf32>
    %22 = arith.addf %20, %21 : vector<32x128xf32>
    %cst_12 = arith.constant 0.000000e+00 : f32
    %23 = vector.broadcast %cst_12 : f32 to vector<32x128xf32>
    %24 = arith.maximumf %22, %23 : vector<32x128xf32>
    %c0_13 = arith.constant 0 : index
    %c0_14 = arith.constant 0 : index
    %25 = vector.load %arg6[%c0_13, %c0_14] : memref<32x128xf32, #tpu.memory_space<vmem>>, vector<32x128xf32>
    tpu.vector_store %arg6[%c0_13, %c0_14], %24 {strides = array<i32>} : memref<32x128xf32, #tpu.memory_space<vmem>>, vector<32x128xf32>,
    return
  }
  func.func @transform_0(%arg0: i32) -> (i32, i32) {
    %c0_i32 = arith.constant 0 : i32
    %c0_i32_0 = arith.constant 0 : i32
    return %arg0, %c0_i32 : i32, i32
  }
  func.func @transform_1(%arg0: i32) -> (i32, i32) {
    %c0_i32 = arith.constant 0 : i32
    %c0_i32_0 = arith.constant 0 : i32
    %c0_i32_1 = arith.constant 0 : i32
    return %c0_i32, %c0_i32_0 : i32, i32
  }
  func.func @transform_2(%arg0: i32) -> (i32, i32) {
    %c0_i32 = arith.constant 0 : i32
    %c0_i32_0 = arith.constant 0 : i32
    %c0_i32_1 = arith.constant 0 : i32
    return %c0_i32, %c0_i32_0 : i32, i32
  }
  func.func @transform_3(%arg0: i32) -> (i32, i32) {
    %c0_i32 = arith.constant 0 : i32
    %c0_i32_0 = arith.constant 0 : i32
    %c0_i32_1 = arith.constant 0 : i32
    return %c0_i32, %c0_i32_0 : i32, i32
  }
  func.func @transform_4(%arg0: i32) -> (i32, i32) {
    %c0_i32 = arith.constant 0 : i32
    %c0_i32_0 = arith.constant 0 : i32
    %c0_i32_1 = arith.constant 0 : i32
    return %c0_i32, %c0_i32_0 : i32, i32
  }
  func.func @transform_5(%arg0: i32) -> (i32, i32) {
    %c0_i32 = arith.constant 0 : i32
    %c0_i32_0 = arith.constant 0 : i32
    return %arg0, %c0_i32 : i32, i32
  }
}

module attributes {stable_mosaic.version = 11 : i64} {
  func.func @_conv_stats_kernel(%arg0: i32, %arg1: memref<32x288xf32, #tpu.memory_space<vmem>>, %arg2: memref<288x128xf32, #tpu.memory_space<vmem>>, %arg3: memref<32x128xf32, #tpu.memory_space<vmem>>, %arg4: memref<1x128xf32, #tpu.memory_space<vmem>>, %arg5: memref<1x128xf32, #tpu.memory_space<vmem>>) attributes {dimension_semantics = [#tpu.dimension_semantics<arbitrary>], iteration_bounds = array<i64: 1>, scalar_prefetch = 0 : i64, scratch_operands = 0 : i64, tpu.core_type = #tpu.core_type<tc>, window_params = [{transform_indices = @transform_0, window_bounds = array<i64: 32, 288>}, {pipeline_mode = #tpu.pipeline_mode<synchronous>, transform_indices = @transform_1, window_bounds = array<i64: 288, 128>}, {transform_indices = @transform_2, window_bounds = array<i64: 32, 128>}, {pipeline_mode = #tpu.pipeline_mode<synchronous>, transform_indices = @transform_3, window_bounds = array<i64: 1, 128>}, {pipeline_mode = #tpu.pipeline_mode<synchronous>, transform_indices = @transform_4, window_bounds = array<i64: 1, 128>}]} {
    %c0_i32 = arith.constant 0 : i32
    %0 = arith.cmpi eq, %arg0, %c0_i32 : i32
    %1 = arith.extui %0 : i1 to i32
    %c0_i32_0 = arith.constant 0 : i32
    %2 = arith.cmpi ne, %1, %c0_i32_0 : i32
    scf.if %2 {
      %cst_16 = arith.constant 0.000000e+00 : f32
      %18 = vector.broadcast %cst_16 : f32 to vector<1x128xf32>
      %c0_17 = arith.constant 0 : index
      %c0_18 = arith.constant 0 : index
      %19 = vector.load %arg4[%c0_17, %c0_18] : memref<1x128xf32, #tpu.memory_space<vmem>>, vector<1x128xf32>
      tpu.vector_store %arg4[%c0_17, %c0_18], %18 {strides = array<i32>} : memref<1x128xf32, #tpu.memory_space<vmem>>, vector<1x128xf32>,
      %cst_19 = arith.constant 0.000000e+00 : f32
      %20 = vector.broadcast %cst_19 : f32 to vector<1x128xf32>
      %c0_20 = arith.constant 0 : index
      %c0_21 = arith.constant 0 : index
      %21 = vector.load %arg5[%c0_20, %c0_21] : memref<1x128xf32, #tpu.memory_space<vmem>>, vector<1x128xf32>
      tpu.vector_store %arg5[%c0_20, %c0_21], %20 {strides = array<i32>} : memref<1x128xf32, #tpu.memory_space<vmem>>, vector<1x128xf32>,
    } else {
    }
    %c0 = arith.constant 0 : index
    %c0_1 = arith.constant 0 : index
    %3 = vector.load %arg1[%c0, %c0_1] : memref<32x288xf32, #tpu.memory_space<vmem>>, vector<32x288xf32>
    %c0_2 = arith.constant 0 : index
    %c0_3 = arith.constant 0 : index
    %4 = vector.load %arg2[%c0_2, %c0_3] : memref<288x128xf32, #tpu.memory_space<vmem>>, vector<288x128xf32>
    %cst = arith.constant dense<0.000000e+00> : vector<32x128xf32>
    %5 = tpu.matmul %3, %4, %cst {dimension_numbers = #tpu.dot_dimension_numbers<[1], [0], [0], [1], [0, 0, 1, 1], [], []>} : vector<32x288xf32>, vector<288x128xf32>, vector<32x128xf32> -> vector<32x128xf32>
    %c0_4 = arith.constant 0 : index
    %c0_5 = arith.constant 0 : index
    %6 = vector.load %arg3[%c0_4, %c0_5] : memref<32x128xf32, #tpu.memory_space<vmem>>, vector<32x128xf32>
    tpu.vector_store %arg3[%c0_4, %c0_5], %5 {strides = array<i32>} : memref<32x128xf32, #tpu.memory_space<vmem>>, vector<32x128xf32>,
    %c0_6 = arith.constant 0 : index
    %c0_7 = arith.constant 0 : index
    %7 = vector.load %arg4[%c0_6, %c0_7] : memref<1x128xf32, #tpu.memory_space<vmem>>, vector<1x128xf32>
    %cst_8 = arith.constant dense<0.000000e+00> : vector<128xf32>
    %8 = vector.multi_reduction <add>, %5, %cst_8 [0] : vector<32x128xf32> to vector<128xf32>
    %9 = vector.shape_cast %8 : vector<128xf32> to vector<1x128xf32>
    %10 = arith.addf %7, %9 : vector<1x128xf32>
    %c0_9 = arith.constant 0 : index
    %c0_10 = arith.constant 0 : index
    %11 = vector.load %arg4[%c0_9, %c0_10] : memref<1x128xf32, #tpu.memory_space<vmem>>, vector<1x128xf32>
    tpu.vector_store %arg4[%c0_9, %c0_10], %10 {strides = array<i32>} : memref<1x128xf32, #tpu.memory_space<vmem>>, vector<1x128xf32>,
    %c0_11 = arith.constant 0 : index
    %c0_12 = arith.constant 0 : index
    %12 = vector.load %arg5[%c0_11, %c0_12] : memref<1x128xf32, #tpu.memory_space<vmem>>, vector<1x128xf32>
    %13 = arith.mulf %5, %5 : vector<32x128xf32>
    %cst_13 = arith.constant dense<0.000000e+00> : vector<128xf32>
    %14 = vector.multi_reduction <add>, %13, %cst_13 [0] : vector<32x128xf32> to vector<128xf32>
    %15 = vector.shape_cast %14 : vector<128xf32> to vector<1x128xf32>
    %16 = arith.addf %12, %15 : vector<1x128xf32>
    %c0_14 = arith.constant 0 : index
    %c0_15 = arith.constant 0 : index
    %17 = vector.load %arg5[%c0_14, %c0_15] : memref<1x128xf32, #tpu.memory_space<vmem>>, vector<1x128xf32>
    tpu.vector_store %arg5[%c0_14, %c0_15], %16 {strides = array<i32>} : memref<1x128xf32, #tpu.memory_space<vmem>>, vector<1x128xf32>,
    return
  }
  func.func @transform_0(%arg0: i32) -> (i32, i32) {
    %c0_i32 = arith.constant 0 : i32
    %c0_i32_0 = arith.constant 0 : i32
    return %arg0, %c0_i32 : i32, i32
  }
  func.func @transform_1(%arg0: i32) -> (i32, i32) {
    %c0_i32 = arith.constant 0 : i32
    %c0_i32_0 = arith.constant 0 : i32
    %c0_i32_1 = arith.constant 0 : i32
    return %c0_i32, %c0_i32_0 : i32, i32
  }
  func.func @transform_2(%arg0: i32) -> (i32, i32) {
    %c0_i32 = arith.constant 0 : i32
    %c0_i32_0 = arith.constant 0 : i32
    return %arg0, %c0_i32 : i32, i32
  }
  func.func @transform_3(%arg0: i32) -> (i32, i32) {
    %c0_i32 = arith.constant 0 : i32
    %c0_i32_0 = arith.constant 0 : i32
    %c0_i32_1 = arith.constant 0 : i32
    return %c0_i32, %c0_i32_0 : i32, i32
  }
  func.func @transform_4(%arg0: i32) -> (i32, i32) {
    %c0_i32 = arith.constant 0 : i32
    %c0_i32_0 = arith.constant 0 : i32
    %c0_i32_1 = arith.constant 0 : i32
    return %c0_i32, %c0_i32_0 : i32, i32
  }
}

module attributes {stable_mosaic.version = 11 : i64} {
  func.func @_conv_stats_kernel(%arg0: i32, %arg1: memref<32x32xf32, #tpu.memory_space<vmem>>, %arg2: memref<32x128xf32, #tpu.memory_space<vmem>>, %arg3: memref<32x128xf32, #tpu.memory_space<vmem>>, %arg4: memref<1x128xf32, #tpu.memory_space<vmem>>, %arg5: memref<1x128xf32, #tpu.memory_space<vmem>>) attributes {dimension_semantics = [#tpu.dimension_semantics<arbitrary>], iteration_bounds = array<i64: 1>, scalar_prefetch = 0 : i64, scratch_operands = 0 : i64, tpu.core_type = #tpu.core_type<tc>, window_params = [{transform_indices = @transform_0, window_bounds = array<i64: 32, 32>}, {pipeline_mode = #tpu.pipeline_mode<synchronous>, transform_indices = @transform_1, window_bounds = array<i64: 32, 128>}, {transform_indices = @transform_2, window_bounds = array<i64: 32, 128>}, {pipeline_mode = #tpu.pipeline_mode<synchronous>, transform_indices = @transform_3, window_bounds = array<i64: 1, 128>}, {pipeline_mode = #tpu.pipeline_mode<synchronous>, transform_indices = @transform_4, window_bounds = array<i64: 1, 128>}]} {
    %c0_i32 = arith.constant 0 : i32
    %0 = arith.cmpi eq, %arg0, %c0_i32 : i32
    %1 = arith.extui %0 : i1 to i32
    %c0_i32_0 = arith.constant 0 : i32
    %2 = arith.cmpi ne, %1, %c0_i32_0 : i32
    scf.if %2 {
      %cst_16 = arith.constant 0.000000e+00 : f32
      %18 = vector.broadcast %cst_16 : f32 to vector<1x128xf32>
      %c0_17 = arith.constant 0 : index
      %c0_18 = arith.constant 0 : index
      %19 = vector.load %arg4[%c0_17, %c0_18] : memref<1x128xf32, #tpu.memory_space<vmem>>, vector<1x128xf32>
      tpu.vector_store %arg4[%c0_17, %c0_18], %18 {strides = array<i32>} : memref<1x128xf32, #tpu.memory_space<vmem>>, vector<1x128xf32>,
      %cst_19 = arith.constant 0.000000e+00 : f32
      %20 = vector.broadcast %cst_19 : f32 to vector<1x128xf32>
      %c0_20 = arith.constant 0 : index
      %c0_21 = arith.constant 0 : index
      %21 = vector.load %arg5[%c0_20, %c0_21] : memref<1x128xf32, #tpu.memory_space<vmem>>, vector<1x128xf32>
      tpu.vector_store %arg5[%c0_20, %c0_21], %20 {strides = array<i32>} : memref<1x128xf32, #tpu.memory_space<vmem>>, vector<1x128xf32>,
    } else {
    }
    %c0 = arith.constant 0 : index
    %c0_1 = arith.constant 0 : index
    %3 = vector.load %arg1[%c0, %c0_1] : memref<32x32xf32, #tpu.memory_space<vmem>>, vector<32x32xf32>
    %c0_2 = arith.constant 0 : index
    %c0_3 = arith.constant 0 : index
    %4 = vector.load %arg2[%c0_2, %c0_3] : memref<32x128xf32, #tpu.memory_space<vmem>>, vector<32x128xf32>
    %cst = arith.constant dense<0.000000e+00> : vector<32x128xf32>
    %5 = tpu.matmul %3, %4, %cst {dimension_numbers = #tpu.dot_dimension_numbers<[1], [0], [0], [1], [0, 0, 1, 1], [], []>} : vector<32x32xf32>, vector<32x128xf32>, vector<32x128xf32> -> vector<32x128xf32>
    %c0_4 = arith.constant 0 : index
    %c0_5 = arith.constant 0 : index
    %6 = vector.load %arg3[%c0_4, %c0_5] : memref<32x128xf32, #tpu.memory_space<vmem>>, vector<32x128xf32>
    tpu.vector_store %arg3[%c0_4, %c0_5], %5 {strides = array<i32>} : memref<32x128xf32, #tpu.memory_space<vmem>>, vector<32x128xf32>,
    %c0_6 = arith.constant 0 : index
    %c0_7 = arith.constant 0 : index
    %7 = vector.load %arg4[%c0_6, %c0_7] : memref<1x128xf32, #tpu.memory_space<vmem>>, vector<1x128xf32>
    %cst_8 = arith.constant dense<0.000000e+00> : vector<128xf32>
    %8 = vector.multi_reduction <add>, %5, %cst_8 [0] : vector<32x128xf32> to vector<128xf32>
    %9 = vector.shape_cast %8 : vector<128xf32> to vector<1x128xf32>
    %10 = arith.addf %7, %9 : vector<1x128xf32>
    %c0_9 = arith.constant 0 : index
    %c0_10 = arith.constant 0 : index
    %11 = vector.load %arg4[%c0_9, %c0_10] : memref<1x128xf32, #tpu.memory_space<vmem>>, vector<1x128xf32>
    tpu.vector_store %arg4[%c0_9, %c0_10], %10 {strides = array<i32>} : memref<1x128xf32, #tpu.memory_space<vmem>>, vector<1x128xf32>,
    %c0_11 = arith.constant 0 : index
    %c0_12 = arith.constant 0 : index
    %12 = vector.load %arg5[%c0_11, %c0_12] : memref<1x128xf32, #tpu.memory_space<vmem>>, vector<1x128xf32>
    %13 = arith.mulf %5, %5 : vector<32x128xf32>
    %cst_13 = arith.constant dense<0.000000e+00> : vector<128xf32>
    %14 = vector.multi_reduction <add>, %13, %cst_13 [0] : vector<32x128xf32> to vector<128xf32>
    %15 = vector.shape_cast %14 : vector<128xf32> to vector<1x128xf32>
    %16 = arith.addf %12, %15 : vector<1x128xf32>
    %c0_14 = arith.constant 0 : index
    %c0_15 = arith.constant 0 : index
    %17 = vector.load %arg5[%c0_14, %c0_15] : memref<1x128xf32, #tpu.memory_space<vmem>>, vector<1x128xf32>
    tpu.vector_store %arg5[%c0_14, %c0_15], %16 {strides = array<i32>} : memref<1x128xf32, #tpu.memory_space<vmem>>, vector<1x128xf32>,
    return
  }
  func.func @transform_0(%arg0: i32) -> (i32, i32) {
    %c0_i32 = arith.constant 0 : i32
    %c0_i32_0 = arith.constant 0 : i32
    return %arg0, %c0_i32 : i32, i32
  }
  func.func @transform_1(%arg0: i32) -> (i32, i32) {
    %c0_i32 = arith.constant 0 : i32
    %c0_i32_0 = arith.constant 0 : i32
    %c0_i32_1 = arith.constant 0 : i32
    return %c0_i32, %c0_i32_0 : i32, i32
  }
  func.func @transform_2(%arg0: i32) -> (i32, i32) {
    %c0_i32 = arith.constant 0 : i32
    %c0_i32_0 = arith.constant 0 : i32
    return %arg0, %c0_i32 : i32, i32
  }
  func.func @transform_3(%arg0: i32) -> (i32, i32) {
    %c0_i32 = arith.constant 0 : i32
    %c0_i32_0 = arith.constant 0 : i32
    %c0_i32_1 = arith.constant 0 : i32
    return %c0_i32, %c0_i32_0 : i32, i32
  }
  func.func @transform_4(%arg0: i32) -> (i32, i32) {
    %c0_i32 = arith.constant 0 : i32
    %c0_i32_0 = arith.constant 0 : i32
    %c0_i32_1 = arith.constant 0 : i32
    return %c0_i32, %c0_i32_0 : i32, i32
  }
}

module attributes {stable_mosaic.version = 11 : i64} {
  func.func @kernel(%arg0: i32, %arg1: memref<32x128xf32, #tpu.memory_space<vmem>>, %arg2: memref<32x128xf32, #tpu.memory_space<vmem>>, %arg3: memref<1x128xf32, #tpu.memory_space<vmem>>, %arg4: memref<1x128xf32, #tpu.memory_space<vmem>>, %arg5: memref<1x128xf32, #tpu.memory_space<vmem>>, %arg6: memref<1x128xf32, #tpu.memory_space<vmem>>, %arg7: memref<1x128xf32, #tpu.memory_space<vmem>>, %arg8: memref<1x128xf32, #tpu.memory_space<vmem>>, %arg9: memref<1x128xf32, #tpu.memory_space<vmem>>, %arg10: memref<1x128xf32, #tpu.memory_space<vmem>>, %arg11: memref<32x128xf32, #tpu.memory_space<vmem>>) attributes {dimension_semantics = [#tpu.dimension_semantics<parallel>], iteration_bounds = array<i64: 1>, scalar_prefetch = 0 : i64, scratch_operands = 0 : i64, tpu.core_type = #tpu.core_type<tc>, window_params = [{transform_indices = @transform_0, window_bounds = array<i64: 32, 128>}, {transform_indices = @transform_1, window_bounds = array<i64: 32, 128>}, {pipeline_mode = #tpu.pipeline_mode<synchronous>, transform_indices = @transform_2, window_bounds = array<i64: 1, 128>}, {pipeline_mode = #tpu.pipeline_mode<synchronous>, transform_indices = @transform_3, window_bounds = array<i64: 1, 128>}, {pipeline_mode = #tpu.pipeline_mode<synchronous>, transform_indices = @transform_4, window_bounds = array<i64: 1, 128>}, {pipeline_mode = #tpu.pipeline_mode<synchronous>, transform_indices = @transform_5, window_bounds = array<i64: 1, 128>}, {pipeline_mode = #tpu.pipeline_mode<synchronous>, transform_indices = @transform_6, window_bounds = array<i64: 1, 128>}, {pipeline_mode = #tpu.pipeline_mode<synchronous>, transform_indices = @transform_7, window_bounds = array<i64: 1, 128>}, {pipeline_mode = #tpu.pipeline_mode<synchronous>, transform_indices = @transform_8, window_bounds = array<i64: 1, 128>}, {pipeline_mode = #tpu.pipeline_mode<synchronous>, transform_indices = @transform_9, window_bounds = array<i64: 1, 128>}, {transform_indices = @transform_10, window_bounds = array<i64: 32, 128>}]} {
    %c0 = arith.constant 0 : index
    %c0_0 = arith.constant 0 : index
    %0 = vector.load %arg1[%c0, %c0_0] : memref<32x128xf32, #tpu.memory_space<vmem>>, vector<32x128xf32>
    %c0_1 = arith.constant 0 : index
    %c0_2 = arith.constant 0 : index
    %1 = vector.load %arg3[%c0_1, %c0_2] : memref<1x128xf32, #tpu.memory_space<vmem>>, vector<1x128xf32>
    %c0_3 = arith.constant 0 : index
    %c0_4 = arith.constant 0 : index
    %2 = vector.load %arg4[%c0_3, %c0_4] : memref<1x128xf32, #tpu.memory_space<vmem>>, vector<1x128xf32>
    %c0_5 = arith.constant 0 : index
    %c0_6 = arith.constant 0 : index
    %3 = vector.load %arg5[%c0_5, %c0_6] : memref<1x128xf32, #tpu.memory_space<vmem>>, vector<1x128xf32>
    %c0_7 = arith.constant 0 : index
    %c0_8 = arith.constant 0 : index
    %4 = vector.load %arg6[%c0_7, %c0_8] : memref<1x128xf32, #tpu.memory_space<vmem>>, vector<1x128xf32>
    %cst = arith.constant 3.125000e-02 : f32
    %5 = vector.broadcast %cst : f32 to vector<1x128xf32>
    %6 = arith.mulf %1, %5 : vector<1x128xf32>
    %cst_9 = arith.constant 3.125000e-02 : f32
    %7 = vector.broadcast %cst_9 : f32 to vector<1x128xf32>
    %8 = arith.mulf %2, %7 : vector<1x128xf32>
    %9 = arith.mulf %6, %6 : vector<1x128xf32>
    %10 = arith.subf %8, %9 : vector<1x128xf32>
    %cst_10 = arith.constant 0.000000e+00 : f32
    %11 = vector.broadcast %cst_10 : f32 to vector<1x128xf32>
    %12 = arith.maximumf %10, %11 : vector<1x128xf32>
    %13 = vector.broadcast %6 : vector<1x128xf32> to vector<32x128xf32>
    %14 = arith.subf %0, %13 : vector<32x128xf32>
    %cst_11 = arith.constant 9.99999974E-6 : f32
    %15 = vector.broadcast %cst_11 : f32 to vector<1x128xf32>
    %16 = arith.addf %12, %15 : vector<1x128xf32>
    %17 = math.rsqrt %16 : vector<1x128xf32>
    %18 = arith.mulf %17, %3 : vector<1x128xf32>
    %19 = vector.broadcast %18 : vector<1x128xf32> to vector<32x128xf32>
    %20 = arith.mulf %14, %19 : vector<32x128xf32>
    %21 = vector.broadcast %4 : vector<1x128xf32> to vector<32x128xf32>
    %22 = arith.addf %20, %21 : vector<32x128xf32>
    %c0_12 = arith.constant 0 : index
    %c0_13 = arith.constant 0 : index
    %23 = vector.load %arg2[%c0_12, %c0_13] : memref<32x128xf32, #tpu.memory_space<vmem>>, vector<32x128xf32>
    %c0_14 = arith.constant 0 : index
    %c0_15 = arith.constant 0 : index
    %24 = vector.load %arg7[%c0_14, %c0_15] : memref<1x128xf32, #tpu.memory_space<vmem>>, vector<1x128xf32>
    %c0_16 = arith.constant 0 : index
    %c0_17 = arith.constant 0 : index
    %25 = vector.load %arg8[%c0_16, %c0_17] : memref<1x128xf32, #tpu.memory_space<vmem>>, vector<1x128xf32>
    %c0_18 = arith.constant 0 : index
    %c0_19 = arith.constant 0 : index
    %26 = vector.load %arg9[%c0_18, %c0_19] : memref<1x128xf32, #tpu.memory_space<vmem>>, vector<1x128xf32>
    %c0_20 = arith.constant 0 : index
    %c0_21 = arith.constant 0 : index
    %27 = vector.load %arg10[%c0_20, %c0_21] : memref<1x128xf32, #tpu.memory_space<vmem>>, vector<1x128xf32>
    %cst_22 = arith.constant 3.125000e-02 : f32
    %28 = vector.broadcast %cst_22 : f32 to vector<1x128xf32>
    %29 = arith.mulf %24, %28 : vector<1x128xf32>
    %cst_23 = arith.constant 3.125000e-02 : f32
    %30 = vector.broadcast %cst_23 : f32 to vector<1x128xf32>
    %31 = arith.mulf %25, %30 : vector<1x128xf32>
    %32 = arith.mulf %29, %29 : vector<1x128xf32>
    %33 = arith.subf %31, %32 : vector<1x128xf32>
    %cst_24 = arith.constant 0.000000e+00 : f32
    %34 = vector.broadcast %cst_24 : f32 to vector<1x128xf32>
    %35 = arith.maximumf %33, %34 : vector<1x128xf32>
    %36 = vector.broadcast %29 : vector<1x128xf32> to vector<32x128xf32>
    %37 = arith.subf %23, %36 : vector<32x128xf32>
    %cst_25 = arith.constant 9.99999974E-6 : f32
    %38 = vector.broadcast %cst_25 : f32 to vector<1x128xf32>
    %39 = arith.addf %35, %38 : vector<1x128xf32>
    %40 = math.rsqrt %39 : vector<1x128xf32>
    %41 = arith.mulf %40, %26 : vector<1x128xf32>
    %42 = vector.broadcast %41 : vector<1x128xf32> to vector<32x128xf32>
    %43 = arith.mulf %37, %42 : vector<32x128xf32>
    %44 = vector.broadcast %27 : vector<1x128xf32> to vector<32x128xf32>
    %45 = arith.addf %43, %44 : vector<32x128xf32>
    %46 = arith.addf %22, %45 : vector<32x128xf32>
    %cst_26 = arith.constant 0.000000e+00 : f32
    %47 = vector.broadcast %cst_26 : f32 to vector<32x128xf32>
    %48 = arith.maximumf %46, %47 : vector<32x128xf32>
    %c0_27 = arith.constant 0 : index
    %c0_28 = arith.constant 0 : index
    %49 = vector.load %arg11[%c0_27, %c0_28] : memref<32x128xf32, #tpu.memory_space<vmem>>, vector<32x128xf32>
    tpu.vector_store %arg11[%c0_27, %c0_28], %48 {strides = array<i32>} : memref<32x128xf32, #tpu.memory_space<vmem>>, vector<32x128xf32>,
    return
  }
  func.func @transform_0(%arg0: i32) -> (i32, i32) {
    %c0_i32 = arith.constant 0 : i32
    %c0_i32_0 = arith.constant 0 : i32
    return %arg0, %c0_i32 : i32, i32
  }
  func.func @transform_1(%arg0: i32) -> (i32, i32) {
    %c0_i32 = arith.constant 0 : i32
    %c0_i32_0 = arith.constant 0 : i32
    return %arg0, %c0_i32 : i32, i32
  }
  func.func @transform_2(%arg0: i32) -> (i32, i32) {
    %c0_i32 = arith.constant 0 : i32
    %c0_i32_0 = arith.constant 0 : i32
    %c0_i32_1 = arith.constant 0 : i32
    return %c0_i32, %c0_i32_0 : i32, i32
  }
  func.func @transform_3(%arg0: i32) -> (i32, i32) {
    %c0_i32 = arith.constant 0 : i32
    %c0_i32_0 = arith.constant 0 : i32
    %c0_i32_1 = arith.constant 0 : i32
    return %c0_i32, %c0_i32_0 : i32, i32
  }
  func.func @transform_4(%arg0: i32) -> (i32, i32) {
    %c0_i32 = arith.constant 0 : i32
    %c0_i32_0 = arith.constant 0 : i32
    %c0_i32_1 = arith.constant 0 : i32
    return %c0_i32, %c0_i32_0 : i32, i32
  }
  func.func @transform_5(%arg0: i32) -> (i32, i32) {
    %c0_i32 = arith.constant 0 : i32
    %c0_i32_0 = arith.constant 0 : i32
    %c0_i32_1 = arith.constant 0 : i32
    return %c0_i32, %c0_i32_0 : i32, i32
  }
  func.func @transform_6(%arg0: i32) -> (i32, i32) {
    %c0_i32 = arith.constant 0 : i32
    %c0_i32_0 = arith.constant 0 : i32
    %c0_i32_1 = arith.constant 0 : i32
    return %c0_i32, %c0_i32_0 : i32, i32
  }
  func.func @transform_7(%arg0: i32) -> (i32, i32) {
    %c0_i32 = arith.constant 0 : i32
    %c0_i32_0 = arith.constant 0 : i32
    %c0_i32_1 = arith.constant 0 : i32
    return %c0_i32, %c0_i32_0 : i32, i32
  }
  func.func @transform_8(%arg0: i32) -> (i32, i32) {
    %c0_i32 = arith.constant 0 : i32
    %c0_i32_0 = arith.constant 0 : i32
    %c0_i32_1 = arith.constant 0 : i32
    return %c0_i32, %c0_i32_0 : i32, i32
  }
  func.func @transform_9(%arg0: i32) -> (i32, i32) {
    %c0_i32 = arith.constant 0 : i32
    %c0_i32_0 = arith.constant 0 : i32
    %c0_i32_1 = arith.constant 0 : i32
    return %c0_i32, %c0_i32_0 : i32, i32
  }
  func.func @transform_10(%arg0: i32) -> (i32, i32) {
    %c0_i32 = arith.constant 0 : i32
    %c0_i32_0 = arith.constant 0 : i32
    return %arg0, %c0_i32 : i32, i32
  }
}

module attributes {stable_mosaic.version = 11 : i64} {
  func.func @_conv_stats_kernel(%arg0: i32, %arg1: memref<32x64xf32, #tpu.memory_space<vmem>>, %arg2: memref<64x128xf32, #tpu.memory_space<vmem>>, %arg3: memref<32x128xf32, #tpu.memory_space<vmem>>, %arg4: memref<1x128xf32, #tpu.memory_space<vmem>>, %arg5: memref<1x128xf32, #tpu.memory_space<vmem>>) attributes {dimension_semantics = [#tpu.dimension_semantics<arbitrary>], iteration_bounds = array<i64: 1>, scalar_prefetch = 0 : i64, scratch_operands = 0 : i64, tpu.core_type = #tpu.core_type<tc>, window_params = [{transform_indices = @transform_0, window_bounds = array<i64: 32, 64>}, {pipeline_mode = #tpu.pipeline_mode<synchronous>, transform_indices = @transform_1, window_bounds = array<i64: 64, 128>}, {transform_indices = @transform_2, window_bounds = array<i64: 32, 128>}, {pipeline_mode = #tpu.pipeline_mode<synchronous>, transform_indices = @transform_3, window_bounds = array<i64: 1, 128>}, {pipeline_mode = #tpu.pipeline_mode<synchronous>, transform_indices = @transform_4, window_bounds = array<i64: 1, 128>}]} {
    %c0_i32 = arith.constant 0 : i32
    %0 = arith.cmpi eq, %arg0, %c0_i32 : i32
    %1 = arith.extui %0 : i1 to i32
    %c0_i32_0 = arith.constant 0 : i32
    %2 = arith.cmpi ne, %1, %c0_i32_0 : i32
    scf.if %2 {
      %cst_16 = arith.constant 0.000000e+00 : f32
      %18 = vector.broadcast %cst_16 : f32 to vector<1x128xf32>
      %c0_17 = arith.constant 0 : index
      %c0_18 = arith.constant 0 : index
      %19 = vector.load %arg4[%c0_17, %c0_18] : memref<1x128xf32, #tpu.memory_space<vmem>>, vector<1x128xf32>
      tpu.vector_store %arg4[%c0_17, %c0_18], %18 {strides = array<i32>} : memref<1x128xf32, #tpu.memory_space<vmem>>, vector<1x128xf32>,
      %cst_19 = arith.constant 0.000000e+00 : f32
      %20 = vector.broadcast %cst_19 : f32 to vector<1x128xf32>
      %c0_20 = arith.constant 0 : index
      %c0_21 = arith.constant 0 : index
      %21 = vector.load %arg5[%c0_20, %c0_21] : memref<1x128xf32, #tpu.memory_space<vmem>>, vector<1x128xf32>
      tpu.vector_store %arg5[%c0_20, %c0_21], %20 {strides = array<i32>} : memref<1x128xf32, #tpu.memory_space<vmem>>, vector<1x128xf32>,
    } else {
    }
    %c0 = arith.constant 0 : index
    %c0_1 = arith.constant 0 : index
    %3 = vector.load %arg1[%c0, %c0_1] : memref<32x64xf32, #tpu.memory_space<vmem>>, vector<32x64xf32>
    %c0_2 = arith.constant 0 : index
    %c0_3 = arith.constant 0 : index
    %4 = vector.load %arg2[%c0_2, %c0_3] : memref<64x128xf32, #tpu.memory_space<vmem>>, vector<64x128xf32>
    %cst = arith.constant dense<0.000000e+00> : vector<32x128xf32>
    %5 = tpu.matmul %3, %4, %cst {dimension_numbers = #tpu.dot_dimension_numbers<[1], [0], [0], [1], [0, 0, 1, 1], [], []>} : vector<32x64xf32>, vector<64x128xf32>, vector<32x128xf32> -> vector<32x128xf32>
    %c0_4 = arith.constant 0 : index
    %c0_5 = arith.constant 0 : index
    %6 = vector.load %arg3[%c0_4, %c0_5] : memref<32x128xf32, #tpu.memory_space<vmem>>, vector<32x128xf32>
    tpu.vector_store %arg3[%c0_4, %c0_5], %5 {strides = array<i32>} : memref<32x128xf32, #tpu.memory_space<vmem>>, vector<32x128xf32>,
    %c0_6 = arith.constant 0 : index
    %c0_7 = arith.constant 0 : index
    %7 = vector.load %arg4[%c0_6, %c0_7] : memref<1x128xf32, #tpu.memory_space<vmem>>, vector<1x128xf32>
    %cst_8 = arith.constant dense<0.000000e+00> : vector<128xf32>
    %8 = vector.multi_reduction <add>, %5, %cst_8 [0] : vector<32x128xf32> to vector<128xf32>
    %9 = vector.shape_cast %8 : vector<128xf32> to vector<1x128xf32>
    %10 = arith.addf %7, %9 : vector<1x128xf32>
    %c0_9 = arith.constant 0 : index
    %c0_10 = arith.constant 0 : index
    %11 = vector.load %arg4[%c0_9, %c0_10] : memref<1x128xf32, #tpu.memory_space<vmem>>, vector<1x128xf32>
    tpu.vector_store %arg4[%c0_9, %c0_10], %10 {strides = array<i32>} : memref<1x128xf32, #tpu.memory_space<vmem>>, vector<1x128xf32>,
    %c0_11 = arith.constant 0 : index
    %c0_12 = arith.constant 0 : index
    %12 = vector.load %arg5[%c0_11, %c0_12] : memref<1x128xf32, #tpu.memory_space<vmem>>, vector<1x128xf32>
    %13 = arith.mulf %5, %5 : vector<32x128xf32>
    %cst_13 = arith.constant dense<0.000000e+00> : vector<128xf32>
    %14 = vector.multi_reduction <add>, %13, %cst_13 [0] : vector<32x128xf32> to vector<128xf32>
    %15 = vector.shape_cast %14 : vector<128xf32> to vector<1x128xf32>
    %16 = arith.addf %12, %15 : vector<1x128xf32>
    %c0_14 = arith.constant 0 : index
    %c0_15 = arith.constant 0 : index
    %17 = vector.load %arg5[%c0_14, %c0_15] : memref<1x128xf32, #tpu.memory_space<vmem>>, vector<1x128xf32>
    tpu.vector_store %arg5[%c0_14, %c0_15], %16 {strides = array<i32>} : memref<1x128xf32, #tpu.memory_space<vmem>>, vector<1x128xf32>,
    return
  }
  func.func @transform_0(%arg0: i32) -> (i32, i32) {
    %c0_i32 = arith.constant 0 : i32
    %c0_i32_0 = arith.constant 0 : i32
    return %arg0, %c0_i32 : i32, i32
  }
  func.func @transform_1(%arg0: i32) -> (i32, i32) {
    %c0_i32 = arith.constant 0 : i32
    %c0_i32_0 = arith.constant 0 : i32
    %c0_i32_1 = arith.constant 0 : i32
    return %c0_i32, %c0_i32_0 : i32, i32
  }
  func.func @transform_2(%arg0: i32) -> (i32, i32) {
    %c0_i32 = arith.constant 0 : i32
    %c0_i32_0 = arith.constant 0 : i32
    return %arg0, %c0_i32 : i32, i32
  }
  func.func @transform_3(%arg0: i32) -> (i32, i32) {
    %c0_i32 = arith.constant 0 : i32
    %c0_i32_0 = arith.constant 0 : i32
    %c0_i32_1 = arith.constant 0 : i32
    return %c0_i32, %c0_i32_0 : i32, i32
  }
  func.func @transform_4(%arg0: i32) -> (i32, i32) {
    %c0_i32 = arith.constant 0 : i32
    %c0_i32_0 = arith.constant 0 : i32
    %c0_i32_1 = arith.constant 0 : i32
    return %c0_i32, %c0_i32_0 : i32, i32
  }
}

module attributes {stable_mosaic.version = 11 : i64} {
  func.func @kernel(%arg0: i32, %arg1: memref<32x128xf32, #tpu.memory_space<vmem>>, %arg2: memref<32x128xf32, #tpu.memory_space<vmem>>, %arg3: memref<1x128xf32, #tpu.memory_space<vmem>>, %arg4: memref<1x128xf32, #tpu.memory_space<vmem>>, %arg5: memref<1x128xf32, #tpu.memory_space<vmem>>, %arg6: memref<1x128xf32, #tpu.memory_space<vmem>>, %arg7: memref<32x128xf32, #tpu.memory_space<vmem>>) attributes {dimension_semantics = [#tpu.dimension_semantics<parallel>], iteration_bounds = array<i64: 1>, scalar_prefetch = 0 : i64, scratch_operands = 0 : i64, tpu.core_type = #tpu.core_type<tc>, window_params = [{transform_indices = @transform_0, window_bounds = array<i64: 32, 128>}, {transform_indices = @transform_1, window_bounds = array<i64: 32, 128>}, {pipeline_mode = #tpu.pipeline_mode<synchronous>, transform_indices = @transform_2, window_bounds = array<i64: 1, 128>}, {pipeline_mode = #tpu.pipeline_mode<synchronous>, transform_indices = @transform_3, window_bounds = array<i64: 1, 128>}, {pipeline_mode = #tpu.pipeline_mode<synchronous>, transform_indices = @transform_4, window_bounds = array<i64: 1, 128>}, {pipeline_mode = #tpu.pipeline_mode<synchronous>, transform_indices = @transform_5, window_bounds = array<i64: 1, 128>}, {transform_indices = @transform_6, window_bounds = array<i64: 32, 128>}]} {
    %c0 = arith.constant 0 : index
    %c0_0 = arith.constant 0 : index
    %0 = vector.load %arg1[%c0, %c0_0] : memref<32x128xf32, #tpu.memory_space<vmem>>, vector<32x128xf32>
    %c0_1 = arith.constant 0 : index
    %c0_2 = arith.constant 0 : index
    %1 = vector.load %arg3[%c0_1, %c0_2] : memref<1x128xf32, #tpu.memory_space<vmem>>, vector<1x128xf32>
    %c0_3 = arith.constant 0 : index
    %c0_4 = arith.constant 0 : index
    %2 = vector.load %arg4[%c0_3, %c0_4] : memref<1x128xf32, #tpu.memory_space<vmem>>, vector<1x128xf32>
    %c0_5 = arith.constant 0 : index
    %c0_6 = arith.constant 0 : index
    %3 = vector.load %arg5[%c0_5, %c0_6] : memref<1x128xf32, #tpu.memory_space<vmem>>, vector<1x128xf32>
    %c0_7 = arith.constant 0 : index
    %c0_8 = arith.constant 0 : index
    %4 = vector.load %arg6[%c0_7, %c0_8] : memref<1x128xf32, #tpu.memory_space<vmem>>, vector<1x128xf32>
    %cst = arith.constant 3.125000e-02 : f32
    %5 = vector.broadcast %cst : f32 to vector<1x128xf32>
    %6 = arith.mulf %1, %5 : vector<1x128xf32>
    %cst_9 = arith.constant 3.125000e-02 : f32
    %7 = vector.broadcast %cst_9 : f32 to vector<1x128xf32>
    %8 = arith.mulf %2, %7 : vector<1x128xf32>
    %9 = arith.mulf %6, %6 : vector<1x128xf32>
    %10 = arith.subf %8, %9 : vector<1x128xf32>
    %cst_10 = arith.constant 0.000000e+00 : f32
    %11 = vector.broadcast %cst_10 : f32 to vector<1x128xf32>
    %12 = arith.maximumf %10, %11 : vector<1x128xf32>
    %13 = vector.broadcast %6 : vector<1x128xf32> to vector<32x128xf32>
    %14 = arith.subf %0, %13 : vector<32x128xf32>
    %cst_11 = arith.constant 9.99999974E-6 : f32
    %15 = vector.broadcast %cst_11 : f32 to vector<1x128xf32>
    %16 = arith.addf %12, %15 : vector<1x128xf32>
    %17 = math.rsqrt %16 : vector<1x128xf32>
    %18 = arith.mulf %17, %3 : vector<1x128xf32>
    %19 = vector.broadcast %18 : vector<1x128xf32> to vector<32x128xf32>
    %20 = arith.mulf %14, %19 : vector<32x128xf32>
    %21 = vector.broadcast %4 : vector<1x128xf32> to vector<32x128xf32>
    %22 = arith.addf %20, %21 : vector<32x128xf32>
    %c0_12 = arith.constant 0 : index
    %c0_13 = arith.constant 0 : index
    %23 = vector.load %arg2[%c0_12, %c0_13] : memref<32x128xf32, #tpu.memory_space<vmem>>, vector<32x128xf32>
    %24 = arith.addf %22, %23 : vector<32x128xf32>
    %cst_14 = arith.constant 0.000000e+00 : f32
    %25 = vector.broadcast %cst_14 : f32 to vector<32x128xf32>
    %26 = arith.maximumf %24, %25 : vector<32x128xf32>
    %c0_15 = arith.constant 0 : index
    %c0_16 = arith.constant 0 : index
    %27 = vector.load %arg7[%c0_15, %c0_16] : memref<32x128xf32, #tpu.memory_space<vmem>>, vector<32x128xf32>
    tpu.vector_store %arg7[%c0_15, %c0_16], %26 {strides = array<i32>} : memref<32x128xf32, #tpu.memory_space<vmem>>, vector<32x128xf32>,
    return
  }
  func.func @transform_0(%arg0: i32) -> (i32, i32) {
    %c0_i32 = arith.constant 0 : i32
    %c0_i32_0 = arith.constant 0 : i32
    return %arg0, %c0_i32 : i32, i32
  }
  func.func @transform_1(%arg0: i32) -> (i32, i32) {
    %c0_i32 = arith.constant 0 : i32
    %c0_i32_0 = arith.constant 0 : i32
    return %arg0, %c0_i32 : i32, i32
  }
  func.func @transform_2(%arg0: i32) -> (i32, i32) {
    %c0_i32 = arith.constant 0 : i32
    %c0_i32_0 = arith.constant 0 : i32
    %c0_i32_1 = arith.constant 0 : i32
    return %c0_i32, %c0_i32_0 : i32, i32
  }
  func.func @transform_3(%arg0: i32) -> (i32, i32) {
    %c0_i32 = arith.constant 0 : i32
    %c0_i32_0 = arith.constant 0 : i32
    %c0_i32_1 = arith.constant 0 : i32
    return %c0_i32, %c0_i32_0 : i32, i32
  }
  func.func @transform_4(%arg0: i32) -> (i32, i32) {
    %c0_i32 = arith.constant 0 : i32
    %c0_i32_0 = arith.constant 0 : i32
    %c0_i32_1 = arith.constant 0 : i32
    return %c0_i32, %c0_i32_0 : i32, i32
  }
  func.func @transform_5(%arg0: i32) -> (i32, i32) {
    %c0_i32 = arith.constant 0 : i32
    %c0_i32_0 = arith.constant 0 : i32
    %c0_i32_1 = arith.constant 0 : i32
    return %c0_i32, %c0_i32_0 : i32, i32
  }
  func.func @transform_6(%arg0: i32) -> (i32, i32) {
    %c0_i32 = arith.constant 0 : i32
    %c0_i32_0 = arith.constant 0 : i32
    return %arg0, %c0_i32 : i32, i32
  }
}

module attributes {stable_mosaic.version = 11 : i64} {
  func.func @_global_maxpool_kernel(%arg0: memref<16x128xf32, #tpu.memory_space<vmem>>, %arg1: memref<1x128xf32, #tpu.memory_space<vmem>>) attributes {dimension_semantics = [], scalar_prefetch = 0 : i64, scratch_operands = 0 : i64, tpu.core_type = #tpu.core_type<tc>} {
    %c0 = arith.constant 0 : index
    %c0_0 = arith.constant 0 : index
    %0 = vector.load %arg0[%c0, %c0_0] : memref<16x128xf32, #tpu.memory_space<vmem>>, vector<16x128xf32>
    %cst = arith.constant dense<0xFF800000> : vector<128xf32>
    %1 = vector.multi_reduction <maximumf>, %0, %cst [0] : vector<16x128xf32> to vector<128xf32>
    %2 = vector.shape_cast %1 : vector<128xf32> to vector<1x128xf32>
    %c0_1 = arith.constant 0 : index
    %c0_2 = arith.constant 0 : index
    %3 = vector.load %arg1[%c0_1, %c0_2] : memref<1x128xf32, #tpu.memory_space<vmem>>, vector<1x128xf32>
    tpu.vector_store %arg1[%c0_1, %c0_2], %2 {strides = array<i32>} : memref<1x128xf32, #tpu.memory_space<vmem>>, vector<1x128xf32>,
    return
  }
}

module attributes {stable_mosaic.version = 11 : i64} {
  func.func @_fc_sigmoid_kernel(%arg0: memref<2x192xf32, #tpu.memory_space<vmem>>, %arg1: memref<192x128xf32, #tpu.memory_space<vmem>>, %arg2: memref<1x128xf32, #tpu.memory_space<vmem>>, %arg3: memref<2x128xf32, #tpu.memory_space<vmem>>) attributes {dimension_semantics = [], scalar_prefetch = 0 : i64, scratch_operands = 0 : i64, tpu.core_type = #tpu.core_type<tc>} {
    %c0 = arith.constant 0 : index
    %c0_0 = arith.constant 0 : index
    %0 = vector.load %arg0[%c0, %c0_0] : memref<2x192xf32, #tpu.memory_space<vmem>>, vector<2x192xf32>
    %c0_1 = arith.constant 0 : index
    %c0_2 = arith.constant 0 : index
    %1 = vector.load %arg1[%c0_1, %c0_2] : memref<192x128xf32, #tpu.memory_space<vmem>>, vector<192x128xf32>
    %cst = arith.constant dense<0.000000e+00> : vector<2x128xf32>
    %2 = tpu.matmul %0, %1, %cst {dimension_numbers = #tpu.dot_dimension_numbers<[1], [0], [0], [1], [0, 0, 1, 1], [], []>} : vector<2x192xf32>, vector<192x128xf32>, vector<2x128xf32> -> vector<2x128xf32>
    %c0_3 = arith.constant 0 : index
    %c0_4 = arith.constant 0 : index
    %3 = vector.load %arg2[%c0_3, %c0_4] : memref<1x128xf32, #tpu.memory_space<vmem>>, vector<1x128xf32>
    %4 = vector.broadcast %3 : vector<1x128xf32> to vector<2x128xf32>
    %5 = arith.addf %2, %4 : vector<2x128xf32>
    %6 = arith.negf %5 : vector<2x128xf32>
    %7 = math.exp %6 : vector<2x128xf32>
    %cst_5 = arith.constant 1.000000e+00 : f32
    %8 = vector.broadcast %cst_5 : f32 to vector<2x128xf32>
    %9 = arith.addf %8, %7 : vector<2x128xf32>
    %10 = arith.divf %8, %9 : vector<2x128xf32>
    %c0_6 = arith.constant 0 : index
    %c0_7 = arith.constant 0 : index
    %11 = vector.load %arg3[%c0_6, %c0_7] : memref<2x128xf32, #tpu.memory_space<vmem>>, vector<2x128xf32>
    tpu.vector_store %arg3[%c0_6, %c0_7], %10 {strides = array<i32>} : memref<2x128xf32, #tpu.memory_space<vmem>>, vector<2x128xf32>,
    return
  }
}

</mosaic_0001>

<bundles_post_ra>
// kernel: basic_resnet_forward.83
= control target key start
LH: loop header
LB: loop body
LE: loop exit
PB: predicated region body
PF: predicated region fallthrough
CT: control target
= control target key end

     0   :  { %v94_v0 = vlaneseq  ;;  %s1456_s1 = inlined_call_operand.vmem [shape: f32[1,128], index: 1, kind: input, shape index: {}]   ;;  %s1457_s2 = inlined_call_operand.vmem [shape: f32[1,128], index: 2, kind: input, shape index: {}]   ;;  %s1458_s0 = inlined_call_operand.vmem [shape: f32[512,128], index: 0, kind: input, shape index: {}]   ;;  %s1459_s3 = inlined_call_operand.vmem [shape: f32[1,128], index: 3, kind: input, shape index: {}]   ;;  %s1460_s4 = inlined_call_operand.vmem [shape: f32[1,128], index: 4, kind: input, shape index: {}]   ;;  %s1461_s5 = inlined_call_operand.vmem [shape: f32[512,128], index: 5, kind: output, shape index: {}]  }
   0x1   :  { %v84_v1 = vld [vmem:[%s1456_s1] sm:$0x1]  ;;  %v488_v9 = vld [vmem:[%s1458_s0 + $0x8] sm:$0xff]  ;;  %v493_v10 = vld [vmem:[%s1458_s0 + $0x10] sm:$0xff] }
   0x2   :  { %v85_v2 = vld [vmem:[%s1457_s2] sm:$0x1]  ;;  %v88_v3 = vmul.f32 0.001953125, %v84_v1  ;;  %v477_v5 = vshrl.u32 %v94_v0, 7  ;;  %v498_v12 = vld [vmem:[%s1458_s0 + $0x18] sm:$0xff]  ;;  %v508_v14 = vld [vmem:[%s1458_s0 + $0x28] sm:$0xff] }
   0x3   :  { %v89_v4 = vmul.f32 0.001953125, %v85_v2  ;;  %v482_v7 = vld [vmem:[%s1458_s0] sm:$0xff]  ;;  %v513_v15 = vld [vmem:[%s1458_s0 + $0x30] sm:$0xff]  ;;  %v522_v17 = vld [vmem:[%s1458_s0 + $0x38] sm:$0xff] }
   0x4   :  { %v90_v6 = vmul.f32 %v88_v3, %v88_v3  ;;  %v1462_v8 = vsub.s32 0, %v477_v5  ;;  %v503_v13 = vld [vmem:[%s1458_s0 + $0x20] sm:$0xff]  ;;  %v532_v19 = vld [vmem:[%s1458_s0 + $0x48] sm:$0xff]  ;;  %v537_v21 = vld [vmem:[%s1458_s0 + $0x50] sm:$0xff] }
   0x5   :  { %v527_v18 = vld [vmem:[%s1458_s0 + $0x40] sm:$0xff]  ;;  %v542_v22 = vld [vmem:[%s1458_s0 + $0x58] sm:$0xff]  ;;  %v552_v24 = vld [vmem:[%s1458_s0 + $0x68] sm:$0xff] }
   0x6   :  { %v91_v11 = vsub.f32 %v89_v4, %v90_v6  ;;  %v517_v16 = vrot.slane %v88_v3, %v1462_v8  ;;  %v547_v23 = vld [vmem:[%s1458_s0 + $0x60] sm:$0xff]  ;;  %v557_v25 = vld [vmem:[%s1458_s0 + $0x70] sm:$0xff]  ;;  %v562_v26 = vld [vmem:[%s1458_s0 + $0x78] sm:$0xff] }
   0x7   :  { %v567_v27 = vld [vmem:[%s1458_s0 + $0x80] sm:$0xff]  ;;  %v572_v28 = vld [vmem:[%s1458_s0 + $0x88] sm:$0xff]  ;;  %v583_v33 = vld [vmem:[%s1458_s0 + $0x90] sm:$0xff] }
   0x8   :  { %v92_v20 = vmax.f32 %v91_v11, 0.0  ;;  %v588_v34 = vld [vmem:[%s1458_s0 + $0x98] sm:$0xff]  ;;  %v593_v35 = vld [vmem:[%s1458_s0 + $0xa0] sm:$0xff]  ;;  %v598_v36 = vld [vmem:[%s1458_s0 + $0xa8] sm:$0xff] }
   0x9   :  { %v611_v41 = vld [vmem:[%s1458_s0 + $0xb0] sm:$0xff]  ;;  %v616_v42 = vld [vmem:[%s1458_s0 + $0xb8] sm:$0xff]  ;;  %v621_v43 = vld [vmem:[%s1458_s0 + $0xc0] sm:$0xff] }
   0xa   :  { %v163_v30 = vadd.f32 1e-05, %v92_v20  ;;  %v626_v44 = vld [vmem:[%s1458_s0 + $0xc8] sm:$0xff]  ;;  %v637_v48 = vld [vmem:[%s1458_s0 + $0xd0] sm:$0xff]  ;;  %v642_v49 = vld [vmem:[%s1458_s0 + $0xd8] sm:$0xff] }
   0xb   :  { %v647_v50 = vld [vmem:[%s1458_s0 + $0xe0] sm:$0xff]  ;;  %v652_v51 = vld [vmem:[%s1458_s0 + $0xe8] sm:$0xff]  ;;  %v665_v56 = vld [vmem:[%s1458_s0 + $0xf0] sm:$0xff] }
   0xc   :  { %439 = vrsqrt.f32 %v163_v30  ;;  %v670_v57 = vld [vmem:[%s1458_s0 + $0xf8] sm:$0xff]  ;;  %v675_v58 = vld [vmem:[%s1458_s0 + $0x100] sm:$0xff]  ;;  %v680_v59 = vld [vmem:[%s1458_s0 + $0x108] sm:$0xff] }
   0xd   :  { %v693_v0 = vld [vmem:[%s1458_s0 + $0x110] sm:$0xff]  ;;  %v698_v1 = vld [vmem:[%s1458_s0 + $0x118] sm:$0xff]  ;;  %v703_v2 = vld [vmem:[%s1458_s0 + $0x120] sm:$0xff] }
   0xe   :  { %v716_v20 = vld [vmem:[%s1458_s0 + $0x128] sm:$0xff]  ;;  %v721_v30 = vld [vmem:[%s1458_s0 + $0x130] sm:$0xff]  ;;  %v726_v4 = vld [vmem:[%s1458_s0 + $0x138] sm:$0xff] }
   0xf   :  { %v739_v62 = vld [vmem:[%s1458_s0 + $0x140] sm:$0xff]  ;;  %v744_v61 = vld [vmem:[%s1458_s0 + $0x148] sm:$0xff]  ;;  %v749_v11 = vld [vmem:[%s1458_s0 + $0x150] sm:$0xff] }
  0x10   :  { %1480 = vst [vmem:[#allocation2_spill] sm:$0xff] %v749_v11  ;;  %v762_v55 = vld [vmem:[%s1458_s0 + $0x158] sm:$0xff]  ;;  %v767_v54 = vld [vmem:[%s1458_s0 + $0x160] sm:$0xff]  ;;  %v772_v63 = vld [vmem:[%s1458_s0 + $0x168] sm:$0xff] }
  0x11   :  { %1481 = vst [vmem:[#allocation3_spill] sm:$0xff] %v762_v55  ;;  %1482 = vst [vmem:[#allocation4_spill] sm:$0xff] %v767_v54  ;;  %v86_v6 = vld [vmem:[%s1459_s3] sm:$0x1]  ;;  %v788_v47 = vld [vmem:[%s1458_s0 + $0x170] sm:$0xff] }
  0x12   :  { %1483 = vst [vmem:[#allocation5_spill] sm:$0xff] %v772_v63  ;;  %1484 = vst [vmem:[#allocation6_spill] sm:$0xff] %v788_v47  ;;  %v793_v46 = vld [vmem:[%s1458_s0 + $0x178] sm:$0xff]  ;;  %v798_v3 = vld [vmem:[%s1458_s0 + $0x180] sm:$0xff]  ;;  %v1500_v63 = vsub.f32 %v493_v10, %v517_v16  ;;  %v1504_v10 = vsub.f32 %v513_v15, %v517_v16 }
  0x13   :  { %1485 = vst [vmem:[#allocation7_spill] sm:$0xff] %v793_v46  ;;  %1486 = vst [vmem:[#allocation8_spill] sm:$0xff] %v798_v3  ;;  %v811_v40 = vld [vmem:[%s1458_s0 + $0x188] sm:$0xff]  ;;  %v816_v39 = vld [vmem:[%s1458_s0 + $0x190] sm:$0xff] }
  0x14   :  { %1487 = vst [vmem:[#allocation9_spill] sm:$0xff] %v811_v40  ;;  %1488 = vst [vmem:[#allocation10_spill] sm:$0xff] %v816_v39  ;;  %v821_v52 = vld [vmem:[%s1458_s0 + $0x198] sm:$0xff]  ;;  %v834_v37 = vld [vmem:[%s1458_s0 + $0x1a0] sm:$0xff]  ;;  %v1499_v39 = vsub.f32 %v488_v9, %v517_v16  ;;  %v1503_v9 = vsub.f32 %v508_v14, %v517_v16 }
  0x15   :  { %1489 = vst [vmem:[#allocation11_spill] sm:$0xff] %v821_v52  ;;  %1490 = vst [vmem:[#allocation12_spill] sm:$0xff] %v834_v37  ;;  %v839_v32 = vld [vmem:[%s1458_s0 + $0x1a8] sm:$0xff]  ;;  %v844_v45 = vld [vmem:[%s1458_s0 + $0x1b0] sm:$0xff]  ;;  %v1497_v37 = vsub.s32 0, %v477_v5 }
  0x16   :  { %v857_v29 = vld [vmem:[%s1458_s0 + $0x1b8] sm:$0xff]  ;;  %v862_v8 = vld [vmem:[%s1458_s0 + $0x1c0] sm:$0xff]  ;;  %v867_v38 = vld [vmem:[%s1458_s0 + $0x1c8] sm:$0xff]  ;;  %v440_v53 = vpop.eup %439 }
  0x17   :  { %v880_v55 = vld [vmem:[%s1458_s0 + $0x1d0] sm:$0xff]  ;;  %v885_v11 = vld [vmem:[%s1458_s0 + $0x1d8] sm:$0xff]  ;;  %v890_v31 = vld [vmem:[%s1458_s0 + $0x1e0] sm:$0xff]  ;;  %v165_v60 = vmul.f32 %v440_v53, %v86_v6  ;;  %v1498_v6 = vsub.f32 %v482_v7, %v517_v16  ;;  %v1502_v7 = vsub.f32 %v503_v13, %v517_v16 }
  0x18   :  { %1491 = vst [vmem:[#allocation13_spill] sm:$0xff] %v880_v55  ;;  %1492 = vst [vmem:[#allocation14_spill] sm:$0xff] %v885_v11  ;;  %v901_v3 = vld [vmem:[%s1458_s0 + $0x1e8] sm:$0xff]  ;;  %v906_v46 = vld [vmem:[%s1458_s0 + $0x1f0] sm:$0xff] }
  0x19   :  { %1493 = vst [vmem:[#allocation15_spill] sm:$0xff] %v890_v31  ;;  %1494 = vst [vmem:[#allocation16_spill] sm:$0xff] %v901_v3  ;;  %v911_v53 = vld [vmem:[%s1458_s0 + $0x1f8] sm:$0xff]  ;;  %v923_v52 = vrot.slane %v165_v60, %v1497_v37  ;;  %v934_v54 = vld [vmem:[%s1460_s4] ss:$0 sm:$0xff]  ;;  %v1501_v37 = vsub.f32 %v498_v12, %v517_v16  ;;  %v1505_v12 = vsub.f32 %v522_v17, %v517_v16 }
  0x1a   :  { %1495 = vst [vmem:[#allocation17_spill] sm:$0xff] %v906_v46  ;;  %1496 = vst [vmem:[#allocation18_spill] sm:$0xff] %v911_v53 }
  0x1b   :  { %v172_v47 = vmul.f32 %v923_v52, %v1498_v6  ;;  %v173_v40 = vmul.f32 %v923_v52, %v1499_v39  ;;  %v174_v5 = vmul.f32 %v923_v52, %v1500_v63  ;;  %v175_v60 = vmul.f32 %v923_v52, %v1501_v37 }
  0x1c   :  { %v176_v6 = vmul.f32 %v923_v52, %v1502_v7  ;;  %v177_v39 = vmul.f32 %v923_v52, %v1503_v9  ;;  %v178_v63 = vmul.f32 %v923_v52, %v1504_v10  ;;  %v179_v37 = vmul.f32 %v923_v52, %v1505_v12 }
  0x1d   :  { %v242_v53 = vadd.f32 %v934_v54, %v172_v47  ;;  %v243_v13 = vadd.f32 %v934_v54, %v173_v40  ;;  %v244_v7 = vadd.f32 %v934_v54, %v174_v5  ;;  %v245_v14 = vadd.f32 %v934_v54, %v175_v60 }
  0x1e   :  { %v246_v9 = vadd.f32 %v934_v54, %v176_v6  ;;  %v247_v46 = vadd.f32 %v934_v54, %v177_v39  ;;  %v248_v15 = vadd.f32 %v934_v54, %v178_v63  ;;  %v249_v10 = vadd.f32 %v934_v54, %v179_v37 }
  0x1f   :  { %v306_v3 = vmax.f32 %v242_v53, 0.0  ;;  %v307_v17 = vmax.f32 %v243_v13, 0.0  ;;  %v308_v31 = vmax.f32 %v244_v7, 0.0  ;;  %v309_v12 = vmax.f32 %v245_v14, 0.0 }
  0x20   :  { %v310_v11 = vmax.f32 %v246_v9, 0.0  ;;  %v311_v47 = vmax.f32 %v247_v46, 0.0  ;;  %v312_v55 = vmax.f32 %v248_v15, 0.0  ;;  %v313_v40 = vmax.f32 %v249_v10, 0.0 }
  0x21   :  { %370 = vst [vmem:[%s1461_s5] sm:$0xff] %v306_v3  ;;  %371 = vst [vmem:[%s1461_s5 + $0x8] sm:$0xff] %v307_v17  ;;  %v1506_v46 = vsub.f32 %v527_v18, %v517_v16  ;;  %v1507_v3 = vsub.f32 %v532_v19, %v517_v16  ;;  %v1508_v60 = vsub.f32 %v537_v21, %v517_v16 }
  0x22   :  { %372 = vst [vmem:[%s1461_s5 + $0x10] sm:$0xff] %v308_v31  ;;  %373 = vst [vmem:[%s1461_s5 + $0x18] sm:$0xff] %v309_v12  ;;  %v1509_v31 = vsub.f32 %v542_v22, %v517_v16  ;;  %v1510_v18 = vsub.f32 %v547_v23, %v517_v16  ;;  %v1511_v21 = vsub.f32 %v552_v24, %v517_v16 }
  0x23   :  { %v180_v53 = vmul.f32 %v923_v52, %v1506_v46  ;;  %v181_v5 = vmul.f32 %v923_v52, %v1507_v3  ;;  %v182_v6 = vmul.f32 %v923_v52, %v1508_v60  ;;  %374 = vst [vmem:[%s1461_s5 + $0x20] sm:$0xff] %v310_v11  ;;  %375 = vst [vmem:[%s1461_s5 + $0x28] sm:$0xff] %v311_v47 }
  0x24   :  { %v183_v39 = vmul.f32 %v923_v52, %v1509_v31  ;;  %376 = vst [vmem:[%s1461_s5 + $0x30] sm:$0xff] %v312_v55  ;;  %377 = vst [vmem:[%s1461_s5 + $0x38] sm:$0xff] %v313_v40  ;;  %v184_v19 = vmul.f32 %v923_v52, %v1510_v18  ;;  %v185_v22 = vmul.f32 %v923_v52, %v1511_v21 }
  0x25   :  { %v1512_v11 = vsub.f32 %v557_v25, %v517_v16  ;;  %v1513_v55 = vsub.f32 %v562_v26, %v517_v16  ;;  %v250_v13 = vadd.f32 %v934_v54, %v180_v53  ;;  %v251_v23 = vadd.f32 %v934_v54, %v181_v5 }
  0x26   :  { %v252_v7 = vadd.f32 %v934_v54, %v182_v6  ;;  %v253_v24 = vadd.f32 %v934_v54, %v183_v39  ;;  %v254_v14 = vadd.f32 %v934_v54, %v184_v19  ;;  %v255_v9 = vadd.f32 %v934_v54, %v185_v22 }
  0x27   :  { %v186_v63 = vmul.f32 %v923_v52, %v1512_v11  ;;  %v187_v37 = vmul.f32 %v923_v52, %v1513_v55  ;;  %v314_v10 = vmax.f32 %v250_v13, 0.0  ;;  %v315_v26 = vmax.f32 %v251_v23, 0.0 }
  0x28   :  { %v316_v17 = vmax.f32 %v252_v7, 0.0  ;;  %v317_v12 = vmax.f32 %v253_v24, 0.0  ;;  %v318_v47 = vmax.f32 %v254_v14, 0.0  ;;  %v319_v40 = vmax.f32 %v255_v9, 0.0 }
  0x29   :  { %v256_v25 = vadd.f32 %v934_v54, %v186_v63  ;;  %v257_v15 = vadd.f32 %v934_v54, %v187_v37  ;;  %378 = vst [vmem:[%s1461_s5 + $0x40] sm:$0xff] %v314_v10  ;;  %379 = vst [vmem:[%s1461_s5 + $0x48] sm:$0xff] %v315_v26  ;;  %v1514_v3 = vsub.f32 %v567_v27, %v517_v16 }
  0x2a   :  { %380 = vst [vmem:[%s1461_s5 + $0x50] sm:$0xff] %v316_v17  ;;  %381 = vst [vmem:[%s1461_s5 + $0x58] sm:$0xff] %v317_v12  ;;  %v1515_v60 = vsub.f32 %v572_v28, %v517_v16  ;;  %v1516_v31 = vsub.f32 %v583_v33, %v517_v16  ;;  %v1517_v18 = vsub.f32 %v588_v34, %v517_v16 }
  0x2b   :  { %v320_v46 = vmax.f32 %v256_v25, 0.0  ;;  %v321_v53 = vmax.f32 %v257_v15, 0.0  ;;  %v188_v5 = vmul.f32 %v923_v52, %v1514_v3  ;;  %382 = vst [vmem:[%s1461_s5 + $0x60] sm:$0xff] %v318_v47  ;;  %383 = vst [vmem:[%s1461_s5 + $0x68] sm:$0xff] %v319_v40  ;;  %v1518_v27 = vsub.f32 %v593_v35, %v517_v16 }
  0x2c   :  { %v189_v6 = vmul.f32 %v923_v52, %v1515_v60  ;;  %v190_v39 = vmul.f32 %v923_v52, %v1516_v31  ;;  %v191_v19 = vmul.f32 %v923_v52, %v1517_v18  ;;  %v1519_v33 = vsub.f32 %v598_v36, %v517_v16 }
  0x2d   :  { %384 = vst [vmem:[%s1461_s5 + $0x70] sm:$0xff] %v320_v46  ;;  %385 = vst [vmem:[%s1461_s5 + $0x78] sm:$0xff] %v321_v53  ;;  %v192_v28 = vmul.f32 %v923_v52, %v1518_v27  ;;  %v1520_v21 = vsub.f32 %v611_v41, %v517_v16  ;;  %v1521_v11 = vsub.f32 %v616_v42, %v517_v16 }
  0x2e   :  { %v193_v34 = vmul.f32 %v923_v52, %v1519_v33  ;;  %v258_v55 = vadd.f32 %v934_v54, %v188_v5  ;;  %v259_v35 = vadd.f32 %v934_v54, %v189_v6  ;;  %v260_v37 = vadd.f32 %v934_v54, %v190_v39 }
  0x2f   :  { %v194_v22 = vmul.f32 %v923_v52, %v1520_v21  ;;  %v195_v63 = vmul.f32 %v923_v52, %v1521_v11  ;;  %v261_v36 = vadd.f32 %v934_v54, %v191_v19  ;;  %v262_v13 = vadd.f32 %v934_v54, %v192_v28 }
  0x30   :  { %v263_v23 = vadd.f32 %v934_v54, %v193_v34  ;;  %v322_v24 = vmax.f32 %v258_v55, 0.0  ;;  %v323_v42 = vmax.f32 %v259_v35, 0.0  ;;  %v324_v14 = vmax.f32 %v260_v37, 0.0 }
  0x31   :  { %v264_v41 = vadd.f32 %v934_v54, %v194_v22  ;;  %v265_v7 = vadd.f32 %v934_v54, %v195_v63  ;;  %v325_v9 = vmax.f32 %v261_v36, 0.0  ;;  %v326_v25 = vmax.f32 %v262_v13, 0.0 }
  0x32   :  { %v327_v15 = vmax.f32 %v263_v23, 0.0  ;;  %386 = vst [vmem:[%s1461_s5 + $0x80] sm:$0xff] %v322_v24  ;;  %387 = vst [vmem:[%s1461_s5 + $0x88] sm:$0xff] %v323_v42  ;;  %v1522_v17 = vsub.f32 %v621_v43, %v517_v16  ;;  %v1523_v47 = vsub.f32 %v626_v44, %v517_v16  ;;  %v1524_v46 = vsub.f32 %v637_v48, %v517_v16 }
  0x33   :  { %v328_v10 = vmax.f32 %v264_v41, 0.0  ;;  %v329_v26 = vmax.f32 %v265_v7, 0.0  ;;  %388 = vst [vmem:[%s1461_s5 + $0x90] sm:$0xff] %v324_v14  ;;  %389 = vst [vmem:[%s1461_s5 + $0x98] sm:$0xff] %v325_v9  ;;  %v1525_v3 = vsub.f32 %v642_v49, %v517_v16  ;;  %v1526_v43 = vsub.f32 %v647_v50, %v517_v16 }
  0x34   :  { %v196_v12 = vmul.f32 %v923_v52, %v1522_v17  ;;  %v197_v40 = vmul.f32 %v923_v52, %v1523_v47  ;;  %v198_v53 = vmul.f32 %v923_v52, %v1524_v46  ;;  %390 = vst [vmem:[%s1461_s5 + $0xa0] sm:$0xff] %v326_v25  ;;  %391 = vst [vmem:[%s1461_s5 + $0xa8] sm:$0xff] %v327_v15 }
  0x35   :  { %v199_v5 = vmul.f32 %v923_v52, %v1525_v3  ;;  %392 = vst [vmem:[%s1461_s5 + $0xb0] sm:$0xff] %v328_v10  ;;  %393 = vst [vmem:[%s1461_s5 + $0xb8] sm:$0xff] %v329_v26  ;;  %v200_v44 = vmul.f32 %v923_v52, %v1526_v43  ;;  %v1527_v48 = vsub.f32 %v652_v51, %v517_v16 }
  0x36   :  { %v1528_v60 = vsub.f32 %v665_v56, %v517_v16  ;;  %v1529_v31 = vsub.f32 %v670_v57, %v517_v16  ;;  %v266_v18 = vadd.f32 %v934_v54, %v196_v12  ;;  %v267_v50 = vadd.f32 %v934_v54, %v197_v40 }
  0x37   :  { %v201_v49 = vmul.f32 %v923_v52, %v1527_v48  ;;  %v268_v19 = vadd.f32 %v934_v54, %v198_v53  ;;  %v269_v51 = vadd.f32 %v934_v54, %v199_v5  ;;  %v270_v27 = vadd.f32 %v934_v54, %v200_v44 }
  0x38   :  { %v202_v6 = vmul.f32 %v923_v52, %v1528_v60  ;;  %v203_v39 = vmul.f32 %v923_v52, %v1529_v31  ;;  %v330_v34 = vmax.f32 %v266_v18, 0.0  ;;  %v331_v57 = vmax.f32 %v267_v50, 0.0  ;;  %v1540_v31 = vld [vmem:[#allocation2_spill] sm:$0xff]  ;;  %v1542_v50 = vld [vmem:[#allocation3_spill] sm:$0xff] }
  0x39   :  { %v271_v28 = vadd.f32 %v934_v54, %v201_v49  ;;  %v332_v21 = vmax.f32 %v268_v19, 0.0  ;;  %v333_v22 = vmax.f32 %v269_v51, 0.0  ;;  %v334_v11 = vmax.f32 %v270_v27, 0.0 }
  0x3a   :  { %v272_v56 = vadd.f32 %v934_v54, %v202_v6  ;;  %v273_v33 = vadd.f32 %v934_v54, %v203_v39  ;;  %394 = vst [vmem:[%s1461_s5 + $0xc0] sm:$0xff] %v330_v34  ;;  %395 = vst [vmem:[%s1461_s5 + $0xc8] sm:$0xff] %v331_v57  ;;  %v1530_v37 = vsub.f32 %v675_v58, %v517_v16  ;;  %v1548_v34 = vld [vmem:[#allocation6_spill] sm:$0xff] }
  0x3b   :  { %v335_v63 = vmax.f32 %v271_v28, 0.0  ;;  %396 = vst [vmem:[%s1461_s5 + $0xd0] sm:$0xff] %v332_v21  ;;  %397 = vst [vmem:[%s1461_s5 + $0xd8] sm:$0xff] %v333_v22  ;;  %v1531_v13 = vsub.f32 %v680_v59, %v517_v16  ;;  %v1532_v41 = vsub.f32 %v693_v0, %v517_v16  ;;  %v1533_v24 = vsub.f32 %v698_v1, %v517_v16  ;;  %v1546_v28 = vld [vmem:[#allocation5_spill] sm:$0xff]  ;;  %v1550_v22 = vld [vmem:[#allocation7_spill] sm:$0xff] }
  0x3c   :  { %v336_v55 = vmax.f32 %v272_v56, 0.0  ;;  %v337_v35 = vmax.f32 %v273_v33, 0.0  ;;  %v204_v36 = vmul.f32 %v923_v52, %v1530_v37  ;;  %398 = vst [vmem:[%s1461_s5 + $0xe0] sm:$0xff] %v334_v11  ;;  %v1534_v58 = vsub.f32 %v703_v2, %v517_v16 }
  0x3d   :  { %v205_v23 = vmul.f32 %v923_v52, %v1531_v13  ;;  %v206_v7 = vmul.f32 %v923_v52, %v1532_v41  ;;  %v207_v42 = vmul.f32 %v923_v52, %v1533_v24  ;;  %399 = vst [vmem:[%s1461_s5 + $0xe8] sm:$0xff] %v335_v63  ;;  %v1535_v0 = vsub.f32 %v716_v20, %v517_v16 }
  0x3e   :  { %400 = vst [vmem:[%s1461_s5 + $0xf0] sm:$0xff] %v336_v55  ;;  %401 = vst [vmem:[%s1461_s5 + $0xf8] sm:$0xff] %v337_v35  ;;  %v208_v59 = vmul.f32 %v923_v52, %v1534_v58  ;;  %v1536_v14 = vsub.f32 %v721_v30, %v517_v16  ;;  %v1537_v25 = vsub.f32 %v726_v4, %v517_v16 }
  0x3f   :  { %v209_v1 = vmul.f32 %v923_v52, %v1535_v0  ;;  %v274_v10 = vadd.f32 %v934_v54, %v204_v36  ;;  %v275_v2 = vadd.f32 %v934_v54, %v205_v23  ;;  %v276_v26 = vadd.f32 %v934_v54, %v206_v7 }
  0x40   :  { %v210_v9 = vmul.f32 %v923_v52, %v1536_v14  ;;  %v211_v15 = vmul.f32 %v923_v52, %v1537_v25  ;;  %v277_v20 = vadd.f32 %v934_v54, %v207_v42  ;;  %v278_v17 = vadd.f32 %v934_v54, %v208_v59  ;;  %v1552_v25 = vld [vmem:[#allocation8_spill] sm:$0xff] }
  0x41   :  { %v279_v12 = vadd.f32 %v934_v54, %v209_v1  ;;  %v338_v40 = vmax.f32 %v274_v10, 0.0  ;;  %v339_v4 = vmax.f32 %v275_v2, 0.0  ;;  %v340_v46 = vmax.f32 %v276_v26, 0.0  ;;  %v1554_v2 = vld [vmem:[#allocation9_spill] sm:$0xff] }
  0x42   :  { %v280_v30 = vadd.f32 %v934_v54, %v210_v9  ;;  %v281_v47 = vadd.f32 %v934_v54, %v211_v15  ;;  %v341_v53 = vmax.f32 %v277_v20, 0.0  ;;  %v342_v3 = vmax.f32 %v278_v17, 0.0  ;;  %v1556_v17 = vld [vmem:[#allocation10_spill] sm:$0xff] }
  0x43   :  { %v343_v5 = vmax.f32 %v279_v12, 0.0  ;;  %402 = vst [vmem:[%s1461_s5 + $0x100] sm:$0xff] %v338_v40  ;;  %403 = vst [vmem:[%s1461_s5 + $0x108] sm:$0xff] %v339_v4  ;;  %v1538_v48 = vsub.f32 %v739_v62, %v517_v16  ;;  %v1539_v60 = vsub.f32 %v744_v61, %v517_v16  ;;  %v1541_v39 = vsub.f32 %v1540_v31, %v517_v16  ;;  %v1544_v61 = vld [vmem:[#allocation4_spill] sm:$0xff] }
  0x44   :  { %v344_v43 = vmax.f32 %v280_v30, 0.0  ;;  %v345_v44 = vmax.f32 %v281_v47, 0.0  ;;  %404 = vst [vmem:[%s1461_s5 + $0x110] sm:$0xff] %v340_v46  ;;  %405 = vst [vmem:[%s1461_s5 + $0x118] sm:$0xff] %v341_v53  ;;  %v1543_v19 = vsub.f32 %v1542_v50, %v517_v16  ;;  %v1545_v62 = vsub.f32 %v1544_v61, %v517_v16  ;;  %v1558_v47 = vld [vmem:[#allocation11_spill] sm:$0xff]  ;;  %v1560_v46 = vld [vmem:[#allocation12_spill] sm:$0xff] }
  0x45   :  { %v212_v49 = vmul.f32 %v923_v52, %v1538_v48  ;;  %v213_v6 = vmul.f32 %v923_v52, %v1539_v60  ;;  %v214_v18 = vmul.f32 %v923_v52, %v1541_v39  ;;  %406 = vst [vmem:[%s1461_s5 + $0x120] sm:$0xff] %v342_v3  ;;  %407 = vst [vmem:[%s1461_s5 + $0x128] sm:$0xff] %v343_v5 }
  0x46   :  { %v215_v51 = vmul.f32 %v923_v52, %v1543_v19  ;;  %408 = vst [vmem:[%s1461_s5 + $0x130] sm:$0xff] %v344_v43  ;;  %409 = vst [vmem:[%s1461_s5 + $0x138] sm:$0xff] %v345_v44  ;;  %v216_v27 = vmul.f32 %v923_v52, %v1545_v62  ;;  %v1547_v56 = vsub.f32 %v1546_v28, %v517_v16 }
  0x47   :  { %v1549_v57 = vsub.f32 %v1548_v34, %v517_v16  ;;  %v1551_v11 = vsub.f32 %v1550_v22, %v517_v16  ;;  %v282_v55 = vadd.f32 %v934_v54, %v212_v49  ;;  %v283_v35 = vadd.f32 %v934_v54, %v213_v6 }
  0x48   :  { %v217_v33 = vmul.f32 %v923_v52, %v1547_v56  ;;  %v284_v37 = vadd.f32 %v934_v54, %v214_v18  ;;  %v285_v36 = vadd.f32 %v934_v54, %v215_v51  ;;  %v286_v13 = vadd.f32 %v934_v54, %v216_v27 }
  0x49   :  { %v218_v21 = vmul.f32 %v923_v52, %v1549_v57  ;;  %v219_v63 = vmul.f32 %v923_v52, %v1551_v11  ;;  %v346_v24 = vmax.f32 %v282_v55, 0.0  ;;  %v347_v42 = vmax.f32 %v283_v35, 0.0  ;;  %v1567_v11 = vld [vmem:[#allocation13_spill] sm:$0xff]  ;;  %v1569_v35 = vld [vmem:[#allocation14_spill] sm:$0xff] }
  0x4a   :  { %v287_v23 = vadd.f32 %v934_v54, %v217_v33  ;;  %v348_v58 = vmax.f32 %v284_v37, 0.0  ;;  %v349_v59 = vmax.f32 %v285_v36, 0.0  ;;  %v350_v0 = vmax.f32 %v286_v13, 0.0 }
  0x4b   :  { %v288_v41 = vadd.f32 %v934_v54, %v218_v21  ;;  %v289_v7 = vadd.f32 %v934_v54, %v219_v63  ;;  %410 = vst [vmem:[%s1461_s5 + $0x140] sm:$0xff] %v346_v24  ;;  %411 = vst [vmem:[%s1461_s5 + $0x148] sm:$0xff] %v347_v42  ;;  %v1553_v15 = vsub.f32 %v1552_v25, %v517_v16  ;;  %v1575_v24 = vld [vmem:[#allocation17_spill] sm:$0xff] }
  0x4c   :  { %v351_v1 = vmax.f32 %v287_v23, 0.0  ;;  %412 = vst [vmem:[%s1461_s5 + $0x150] sm:$0xff] %v348_v58  ;;  %413 = vst [vmem:[%s1461_s5 + $0x158] sm:$0xff] %v349_v59  ;;  %v1555_v26 = vsub.f32 %v1554_v2, %v517_v16  ;;  %v1557_v12 = vsub.f32 %v1556_v17, %v517_v16  ;;  %v1559_v40 = vsub.f32 %v1558_v47, %v517_v16  ;;  %v1573_v23 = vld [vmem:[#allocation16_spill] sm:$0xff]  ;;  %v1577_v59 = vld [vmem:[#allocation18_spill] sm:$0xff] }
  0x4d   :  { %v352_v14 = vmax.f32 %v288_v41, 0.0  ;;  %v353_v9 = vmax.f32 %v289_v7, 0.0  ;;  %v220_v10 = vmul.f32 %v923_v52, %v1553_v15  ;;  %414 = vst [vmem:[%s1461_s5 + $0x160] sm:$0xff] %v350_v0  ;;  %v1561_v53 = vsub.f32 %v1560_v46, %v517_v16 }
  0x4e   :  { %v221_v20 = vmul.f32 %v923_v52, %v1555_v26  ;;  %v222_v30 = vmul.f32 %v923_v52, %v1557_v12  ;;  %v223_v4 = vmul.f32 %v923_v52, %v1559_v40  ;;  %415 = vst [vmem:[%s1461_s5 + $0x168] sm:$0xff] %v351_v1  ;;  %v1562_v5 = vsub.f32 %v839_v32, %v517_v16 }
  0x4f   :  { %416 = vst [vmem:[%s1461_s5 + $0x170] sm:$0xff] %v352_v14  ;;  %417 = vst [vmem:[%s1461_s5 + $0x178] sm:$0xff] %v353_v9  ;;  %v224_v3 = vmul.f32 %v923_v52, %v1561_v53  ;;  %v1563_v44 = vsub.f32 %v844_v45, %v517_v16  ;;  %v1564_v49 = vsub.f32 %v857_v29, %v517_v16 }
  0x50   :  { %v225_v43 = vmul.f32 %v923_v52, %v1562_v5  ;;  %v290_v6 = vadd.f32 %v934_v54, %v220_v10  ;;  %v291_v31 = vadd.f32 %v934_v54, %v221_v20  ;;  %v292_v39 = vadd.f32 %v934_v54, %v222_v30 }
  0x51   :  { %v226_v48 = vmul.f32 %v923_v52, %v1563_v44  ;;  %v227_v60 = vmul.f32 %v923_v52, %v1564_v49  ;;  %v293_v32 = vadd.f32 %v934_v54, %v223_v4  ;;  %v294_v18 = vadd.f32 %v934_v54, %v224_v3 }
  0x52   :  { %v295_v50 = vadd.f32 %v934_v54, %v225_v43  ;;  %v354_v51 = vmax.f32 %v290_v6, 0.0  ;;  %v355_v29 = vmax.f32 %v291_v31, 0.0  ;;  %v356_v61 = vmax.f32 %v292_v39, 0.0 }
  0x53   :  { %v296_v45 = vadd.f32 %v934_v54, %v226_v48  ;;  %v297_v19 = vadd.f32 %v934_v54, %v227_v60  ;;  %v357_v62 = vmax.f32 %v293_v32, 0.0  ;;  %v358_v27 = vmax.f32 %v294_v18, 0.0 }
  0x54   :  { %v359_v28 = vmax.f32 %v295_v50, 0.0  ;;  %418 = vst [vmem:[%s1461_s5 + $0x180] sm:$0xff] %v354_v51  ;;  %419 = vst [vmem:[%s1461_s5 + $0x188] sm:$0xff] %v355_v29  ;;  %v1565_v34 = vsub.f32 %v862_v8, %v517_v16  ;;  %v1566_v21 = vsub.f32 %v867_v38, %v517_v16  ;;  %v1568_v63 = vsub.f32 %v1567_v11, %v517_v16  ;;  %v1571_v8 = vld [vmem:[#allocation15_spill] sm:$0xff] }
  0x55   :  { %v360_v56 = vmax.f32 %v296_v45, 0.0  ;;  %v361_v33 = vmax.f32 %v297_v19, 0.0  ;;  %420 = vst [vmem:[%s1461_s5 + $0x190] sm:$0xff] %v356_v61  ;;  %421 = vst [vmem:[%s1461_s5 + $0x198] sm:$0xff] %v357_v62  ;;  %v1570_v37 = vsub.f32 %v1569_v35, %v517_v16  ;;  %v1572_v38 = vsub.f32 %v1571_v8, %v517_v16 }
  0x56   :  { %v228_v57 = vmul.f32 %v923_v52, %v1565_v34  ;;  %v229_v22 = vmul.f32 %v923_v52, %v1566_v21  ;;  %v230_v55 = vmul.f32 %v923_v52, %v1568_v63  ;;  %422 = vst [vmem:[%s1461_s5 + $0x1a0] sm:$0xff] %v358_v27  ;;  %423 = vst [vmem:[%s1461_s5 + $0x1a8] sm:$0xff] %v359_v28 }
  0x57   :  { %v231_v36 = vmul.f32 %v923_v52, %v1570_v37  ;;  %424 = vst [vmem:[%s1461_s5 + $0x1b0] sm:$0xff] %v360_v56  ;;  %425 = vst [vmem:[%s1461_s5 + $0x1b8] sm:$0xff] %v361_v33  ;;  %v232_v13 = vmul.f32 %v923_v52, %v1572_v38  ;;  %v1574_v41 = vsub.f32 %v1573_v23, %v517_v16 }
  0x58   :  { %v1576_v42 = vsub.f32 %v1575_v24, %v517_v16  ;;  %v1578_v0 = vsub.f32 %v1577_v59, %v517_v16  ;;  %v298_v14 = vadd.f32 %v934_v54, %v228_v57  ;;  %v299_v9 = vadd.f32 %v934_v54, %v229_v22 }
  0x59   :  { %v233_v7 = vmul.f32 %v923_v52, %v1574_v41  ;;  %v300_v25 = vadd.f32 %v934_v54, %v230_v55  ;;  %v301_v15 = vadd.f32 %v934_v54, %v231_v36  ;;  %v302_v10 = vadd.f32 %v934_v54, %v232_v13 }
  0x5a   :  { %v234_v58 = vmul.f32 %v923_v52, %v1576_v42  ;;  %v235_v1 = vmul.f32 %v923_v52, %v1578_v0  ;;  %v362_v17 = vmax.f32 %v298_v14, 0.0  ;;  %v363_v16 = vmax.f32 %v299_v9, 0.0 }
  0x5b   :  { %v303_v2 = vadd.f32 %v934_v54, %v233_v7  ;;  %v364_v12 = vmax.f32 %v300_v25, 0.0  ;;  %v365_v52 = vmax.f32 %v301_v15, 0.0  ;;  %v366_v30 = vmax.f32 %v302_v10, 0.0 }
  0x5c   :  { %v304_v26 = vadd.f32 %v934_v54, %v234_v58  ;;  %v305_v20 = vadd.f32 %v934_v54, %v235_v1  ;;  %426 = vst [vmem:[%s1461_s5 + $0x1c0] sm:$0xff] %v362_v17  ;;  %427 = vst [vmem:[%s1461_s5 + $0x1c8] sm:$0xff] %v363_v16 }
  0x5d   :  { %v367_v47 = vmax.f32 %v303_v2, 0.0  ;;  %428 = vst [vmem:[%s1461_s5 + $0x1d0] sm:$0xff] %v364_v12  ;;  %429 = vst [vmem:[%s1461_s5 + $0x1d8] sm:$0xff] %v365_v52 }
  0x5e   :  { %v368_v40 = vmax.f32 %v304_v26, 0.0  ;;  %v369_v4 = vmax.f32 %v305_v20, 0.0  ;;  %430 = vst [vmem:[%s1461_s5 + $0x1e0] sm:$0xff] %v366_v30 }
  0x5f   :  { %431 = vst [vmem:[%s1461_s5 + $0x1e8] sm:$0xff] %v367_v47 }
  0x60   :  { %432 = vst [vmem:[%s1461_s5 + $0x1f0] sm:$0xff] %v368_v40  ;;  %433 = vst [vmem:[%s1461_s5 + $0x1f8] sm:$0xff] %v369_v4 }

// kernel: basic_resnet_forward.82
= control target key start
LH: loop header
LB: loop body
LE: loop exit
PB: predicated region body
PF: predicated region fallthrough
CT: control target
= control target key end

     0   :  { %vm278_vm0 = vcmask 1041408   ;;  %vm85_vm1 = vcmask 15360   ;;  %s1869_s1 = inlined_call_operand.vmem [shape: f32[2,128], index: 1, kind: input, shape index: {}]   ;;  %s1870_s0 = inlined_call_operand.vmem [shape: f32[512,2], index: 0, kind: input, shape index: {}]   ;;  %s1871_s3 = inlined_call_operand.vmem [shape: f32[1,128], index: 3, kind: output, shape index: {1}]   ;;  %s1872_s4 = inlined_call_operand.vmem [shape: f32[1,128], index: 4, kind: output, shape index: {2}]   ;;  %s1873_s2 = inlined_call_operand.vmem [shape: f32[512,128], index: 2, kind: output, shape index: {0}]  }
   0x1   :  { %v84_v0 = vld [vmem:[%s1869_s1] sm:$0x3]  ;;  %v21_v2 = vld [vmem:[%s1870_s0 + $0x8] sm:$0xff]  ;;  %v22_v3 = vld [vmem:[%s1870_s0 + $0x10] sm:$0xff] }
   0x2   :  { %v20_v1 = vld [vmem:[%s1870_s0] sm:$0xff]  ;;  %1081 = vmatprep.subr.msk.mxu0 %vm278_vm0, %v84_v0  ;;  %1179 = vmatprep.subr.msk.mxu1 %vm278_vm0, %v84_v0  ;;  %v23_v4 = vld [vmem:[%s1870_s0 + $0x18] sm:$0xff]  ;;  %v25_v6 = vld [vmem:[%s1870_s0 + $0x28] sm:$0xff] }
   0x3   :  { %1083 = vmatprep.mubr.msk.f32.mxu0 %vm85_vm1, %v20_v1  ;;  %1082 = vmatpush3.msk.msra.mxu0 %vm278_vm0, %v84_v0  ;;  %v24_v5 = vld [vmem:[%s1870_s0 + $0x20] sm:$0xff]  ;;  %v26_v7 = vld [vmem:[%s1870_s0 + $0x30] sm:$0xff]  ;;  %v53_v9 = vld [vmem:[%s1870_s0 + $0x108] sm:$0xff]  ;;  %v1182_v1 = vmov 0.0  }
   0x4   :  { %1084 = vmatmul.mubr.msk.f32.vlgmr.msra.gmra.mrb[0].mxu0 %vm85_vm1, %v21_v2  ;;  %1180 = vmatpush3.msk.msra.mxu1 %vm278_vm0, %v84_v0  ;;  %v52_v8 = vld [vmem:[%s1870_s0 + $0x100] sm:$0xff]  ;;  %v54_v10 = vld [vmem:[%s1870_s0 + $0x110] sm:$0xff]  ;;  %v27_v11 = vld [vmem:[%s1870_s0 + $0x38] sm:$0xff]  ;;  %18 = vst [vmem:[%s1871_s3] sm:$0x1] %v1182_v1 }
   0x5   :  { %1086 = vmatprep.mubr.msk.f32.mxu0 %vm85_vm1, %v22_v3  ;;  %1131 = vmatprep.mubr.msk.f32.mxu1 %vm85_vm1, %v52_v8  ;;  %v28_v12 = vld [vmem:[%s1870_s0 + $0x40] sm:$0xff]  ;;  %v55_v13 = vld [vmem:[%s1870_s0 + $0x118] sm:$0xff]  ;;  %v29_v15 = vld [vmem:[%s1870_s0 + $0x48] sm:$0xff]  ;;  %19 = vst [vmem:[%s1872_s4] sm:$0x1] %v1182_v1 }
   0x6   :  { %1132 = vmatmul.mubr.msk.f32.vlgmr.msra.gmra.mrb[0].mxu1 %vm85_vm1, %v53_v9  ;;  %v56_v14 = vld [vmem:[%s1870_s0 + $0x120] sm:$0xff]  ;;  %v30_v16 = vld [vmem:[%s1870_s0 + $0x50] sm:$0xff]  ;;  %v57_v17 = vld [vmem:[%s1870_s0 + $0x128] sm:$0xff] }
   0x7   :  { %1134 = vmatprep.mubr.msk.f32.mxu1 %vm85_vm1, %v54_v10  ;;  %v58_v18 = vld [vmem:[%s1870_s0 + $0x130] sm:$0xff]  ;;  %v31_v19 = vld [vmem:[%s1870_s0 + $0x58] sm:$0xff]  ;;  %v32_v20 = vld [vmem:[%s1870_s0 + $0x60] sm:$0xff] }
   0x8   :  { %1087 = vmatmul.mubr.msk.f32.gmra.mrb[2].mxu0 %vm85_vm1, %v23_v4  ;;  %v59_v21 = vld [vmem:[%s1870_s0 + $0x138] sm:$0xff]  ;;  %v60_v22 = vld [vmem:[%s1870_s0 + $0x140] sm:$0xff]  ;;  %v33_v23 = vld [vmem:[%s1870_s0 + $0x68] sm:$0xff] }
   0x9   :  { %1089 = vmatprep.mubr.msk.f32.mxu0 %vm85_vm1, %v24_v5  ;;  %v34_v24 = vld [vmem:[%s1870_s0 + $0x70] sm:$0xff]  ;;  %v61_v25 = vld [vmem:[%s1870_s0 + $0x148] sm:$0xff]  ;;  %v35_v27 = vld [vmem:[%s1870_s0 + $0x78] sm:$0xff] }
   0xa   :  { %1135 = vmatmul.mubr.msk.f32.gmra.mrb[2].mxu1 %vm85_vm1, %v55_v13  ;;  %v62_v26 = vld [vmem:[%s1870_s0 + $0x150] sm:$0xff]  ;;  %v36_v28 = vld [vmem:[%s1870_s0 + $0x80] sm:$0xff]  ;;  %v63_v29 = vld [vmem:[%s1870_s0 + $0x158] sm:$0xff] }
   0xb   :  { %1137 = vmatprep.mubr.msk.f32.mxu1 %vm85_vm1, %v56_v14  ;;  %v64_v30 = vld [vmem:[%s1870_s0 + $0x160] sm:$0xff]  ;;  %v37_v31 = vld [vmem:[%s1870_s0 + $0x88] sm:$0xff]  ;;  %v38_v32 = vld [vmem:[%s1870_s0 + $0x90] sm:$0xff] }
   0xc   :  { %1090 = vmatmul.mubr.msk.f32.gmra.mrb[4].mxu0 %vm85_vm1, %v25_v6  ;;  %v65_v33 = vld [vmem:[%s1870_s0 + $0x168] sm:$0xff]  ;;  %v66_v34 = vld [vmem:[%s1870_s0 + $0x170] sm:$0xff]  ;;  %v39_v35 = vld [vmem:[%s1870_s0 + $0x98] sm:$0xff] }
   0xd   :  { %1092 = vmatprep.mubr.msk.f32.mxu0 %vm85_vm1, %v26_v7  ;;  %v40_v36 = vld [vmem:[%s1870_s0 + $0xa0] sm:$0xff]  ;;  %v67_v37 = vld [vmem:[%s1870_s0 + $0x178] sm:$0xff]  ;;  %v41_v39 = vld [vmem:[%s1870_s0 + $0xa8] sm:$0xff] }
   0xe   :  { %1138 = vmatmul.mubr.msk.f32.gmra.mrb[4].mxu1 %vm85_vm1, %v57_v17  ;;  %v68_v38 = vld [vmem:[%s1870_s0 + $0x180] sm:$0xff]  ;;  %v42_v40 = vld [vmem:[%s1870_s0 + $0xb0] sm:$0xff]  ;;  %v69_v41 = vld [vmem:[%s1870_s0 + $0x188] sm:$0xff] }
   0xf   :  { %1140 = vmatprep.mubr.msk.f32.mxu1 %vm85_vm1, %v58_v18  ;;  %v70_v42 = vld [vmem:[%s1870_s0 + $0x190] sm:$0xff]  ;;  %v43_v43 = vld [vmem:[%s1870_s0 + $0xb8] sm:$0xff]  ;;  %v44_v44 = vld [vmem:[%s1870_s0 + $0xc0] sm:$0xff] }
  0x10   :  { %1093 = vmatmul.mubr.msk.f32.gmra.mrb[6].mxu0 %vm85_vm1, %v27_v11  ;;  %v71_v45 = vld [vmem:[%s1870_s0 + $0x198] sm:$0xff]  ;;  %v72_v46 = vld [vmem:[%s1870_s0 + $0x1a0] sm:$0xff]  ;;  %v45_v47 = vld [vmem:[%s1870_s0 + $0xc8] sm:$0xff] }
  0x11   :  { %1095 = vmatprep.mubr.msk.f32.mxu0 %vm85_vm1, %v28_v12  ;;  %v46_v48 = vld [vmem:[%s1870_s0 + $0xd0] sm:$0xff]  ;;  %v73_v49 = vld [vmem:[%s1870_s0 + $0x1a8] sm:$0xff]  ;;  %v47_v51 = vld [vmem:[%s1870_s0 + $0xd8] sm:$0xff] }
  0x12   :  { %1141 = vmatmul.mubr.msk.f32.gmra.mrb[6].mxu1 %vm85_vm1, %v59_v21  ;;  %v74_v50 = vld [vmem:[%s1870_s0 + $0x1b0] sm:$0xff]  ;;  %v48_v52 = vld [vmem:[%s1870_s0 + $0xe0] sm:$0xff]  ;;  %v75_v53 = vld [vmem:[%s1870_s0 + $0x1b8] sm:$0xff] }
  0x13   :  { %1143 = vmatprep.mubr.msk.f32.mxu1 %vm85_vm1, %v60_v22  ;;  %v76_v54 = vld [vmem:[%s1870_s0 + $0x1c0] sm:$0xff]  ;;  %v49_v55 = vld [vmem:[%s1870_s0 + $0xe8] sm:$0xff]  ;;  %v50_v56 = vld [vmem:[%s1870_s0 + $0xf0] sm:$0xff] }
  0x14   :  { %1096 = vmatmul.mubr.msk.f32.gmra.mrb[8].mxu0 %vm85_vm1, %v29_v15  ;;  %v77_v57 = vld [vmem:[%s1870_s0 + $0x1c8] sm:$0xff]  ;;  %v78_v58 = vld [vmem:[%s1870_s0 + $0x1d0] sm:$0xff]  ;;  %v51_v59 = vld [vmem:[%s1870_s0 + $0xf8] sm:$0xff] }
  0x15   :  { %1098 = vmatprep.mubr.msk.f32.mxu0 %vm85_vm1, %v30_v16  ;;  %v79_v60 = vld [vmem:[%s1870_s0 + $0x1d8] sm:$0xff]  ;;  %v80_v61 = vld [vmem:[%s1870_s0 + $0x1e0] sm:$0xff]  ;;  %v81_v62 = vld [vmem:[%s1870_s0 + $0x1e8] sm:$0xff] }
  0x16   :  { %1144 = vmatmul.mubr.msk.f32.gmra.mrb[8].mxu1 %vm85_vm1, %v61_v25  ;;  %v82_v63 = vld [vmem:[%s1870_s0 + $0x1f0] sm:$0xff]  ;;  %v83_v0 = vld [vmem:[%s1870_s0 + $0x1f8] sm:$0xff] }
  0x17   :  { %1146 = vmatprep.mubr.msk.f32.mxu1 %vm85_vm1, %v62_v26 }
  0x18   :  { %1099 = vmatmul.mubr.msk.f32.gmra.mrb[10].mxu0 %vm85_vm1, %v31_v19 }
  0x19   :  { %1101 = vmatprep.mubr.msk.f32.mxu0 %vm85_vm1, %v32_v20 }
  0x1a   :  { %1147 = vmatmul.mubr.msk.f32.gmra.mrb[10].mxu1 %vm85_vm1, %v63_v29 }
  0x1b   :  { %1149 = vmatprep.mubr.msk.f32.mxu1 %vm85_vm1, %v64_v30 }
  0x1c   :  { %1102 = vmatmul.mubr.msk.f32.gmra.mrb[12].mxu0 %vm85_vm1, %v33_v23 }
  0x1d   :  { %1104 = vmatprep.mubr.msk.f32.mxu0 %vm85_vm1, %v34_v24 }
  0x1e   :  { %1150 = vmatmul.mubr.msk.f32.gmra.mrb[12].mxu1 %vm85_vm1, %v65_v33 }
  0x1f   :  { %1152 = vmatprep.mubr.msk.f32.mxu1 %vm85_vm1, %v66_v34 }
  0x20   :  { %1105 = vmatmul.mubr.msk.f32.gmra.mrb[14].mxu0 %vm85_vm1, %v35_v27 }
  0x21   :  { %1107 = vmatprep.mubr.msk.f32.mxu0 %vm85_vm1, %v36_v28 }
  0x22   :  { %1153 = vmatmul.mubr.msk.f32.gmra.mrb[14].mxu1 %vm85_vm1, %v67_v37 }
  0x23   :  { %1155 = vmatprep.mubr.msk.f32.mxu1 %vm85_vm1, %v68_v38 }
  0x24   :  { %1108 = vmatmul.mubr.msk.f32.gmra.mrb[16].mxu0 %vm85_vm1, %v37_v31 }
  0x25   :  { %1110 = vmatprep.mubr.msk.f32.mxu0 %vm85_vm1, %v38_v32 }
  0x26   :  { %1156 = vmatmul.mubr.msk.f32.gmra.mrb[16].mxu1 %vm85_vm1, %v69_v41 }
  0x27   :  { %1158 = vmatprep.mubr.msk.f32.mxu1 %vm85_vm1, %v70_v42 }
  0x28   :  { %1111 = vmatmul.mubr.msk.f32.gmra.mrb[18].mxu0 %vm85_vm1, %v39_v35 }
  0x29   :  { %1113 = vmatprep.mubr.msk.f32.mxu0 %vm85_vm1, %v40_v36 }
  0x2a   :  { %1159 = vmatmul.mubr.msk.f32.gmra.mrb[18].mxu1 %vm85_vm1, %v71_v45 }
  0x2b   :  { %1161 = vmatprep.mubr.msk.f32.mxu1 %vm85_vm1, %v72_v46 }
  0x2c   :  { %1114 = vmatmul.mubr.msk.f32.gmra.mrb[20].mxu0 %vm85_vm1, %v41_v39 }
  0x2d   :  { %1116 = vmatprep.mubr.msk.f32.mxu0 %vm85_vm1, %v42_v40 }
  0x2e   :  { %1162 = vmatmul.mubr.msk.f32.gmra.mrb[20].mxu1 %vm85_vm1, %v73_v49 }
  0x2f   :  { %1164 = vmatprep.mubr.msk.f32.mxu1 %vm85_vm1, %v74_v50 }
  0x30   :  { %1117 = vmatmul.mubr.msk.f32.gmra.mrb[22].mxu0 %vm85_vm1, %v43_v43 }
  0x31   :  { %1119 = vmatprep.mubr.msk.f32.mxu0 %vm85_vm1, %v44_v44 }
  0x32   :  { %1165 = vmatmul.mubr.msk.f32.gmra.mrb[22].mxu1 %vm85_vm1, %v75_v53 }
  0x33   :  { %1167 = vmatprep.mubr.msk.f32.mxu1 %vm85_vm1, %v76_v54 }
  0x34   :  { %1120 = vmatmul.mubr.msk.f32.gmra.mrb[24].mxu0 %vm85_vm1, %v45_v47 }
  0x35   :  { %1122 = vmatprep.mubr.msk.f32.mxu0 %vm85_vm1, %v46_v48 }
  0x36   :  { %1168 = vmatmul.mubr.msk.f32.gmra.mrb[24].mxu1 %vm85_vm1, %v77_v57 }
  0x37   :  { %1170 = vmatprep.mubr.msk.f32.mxu1 %vm85_vm1, %v78_v58 }
  0x38   :  { %1123 = vmatmul.mubr.msk.f32.gmra.mrb[26].mxu0 %vm85_vm1, %v47_v51 }
  0x39   :  { %1125 = vmatprep.mubr.msk.f32.mxu0 %vm85_vm1, %v48_v52 }
  0x3a   :  { %1171 = vmatmul.mubr.msk.f32.gmra.mrb[26].mxu1 %vm85_vm1, %v79_v60 }
  0x3b   :  { %1173 = vmatprep.mubr.msk.f32.mxu1 %vm85_vm1, %v80_v61 }
  0x3c   :  { %1126 = vmatmul.mubr.msk.f32.gmra.mrb[28].mxu0 %vm85_vm1, %v49_v55 }
  0x3d   :  { %1128 = vmatprep.mubr.msk.f32.mxu0 %vm85_vm1, %v50_v56 }
  0x3e   :  { %1174 = vmatmul.mubr.msk.f32.gmra.mrb[28].mxu1 %vm85_vm1, %v81_v62 }
  0x3f   :  { %1176 = vmatprep.mubr.msk.f32.mxu1 %vm85_vm1, %v82_v63 }
  0x40   :  { %1129 = vmatmul.mubr.msk.f32.gmra.mrb[30].mxu0 %vm85_vm1, %v51_v59 }
  0x42   :  { %1177 = vmatmul.mubr.msk.f32.gmra.mrb[30].mxu1 %vm85_vm1, %v83_v0 }
  0xd7   :  { %v1085_v2 = vpop.f32.mrb[0].mxu0 }
  0xd8   :  { %668 = vst [vmem:[%s1873_s2 + $0x8] sm:$0xff] %v1085_v2  ;;  %v805_v3 = vmul.f32 %v1085_v2, %v1085_v2  ;;  %v348_v4 = vpop.f32.mrb[1].mxu0 }
  0xd9   :  { %667 = vst [vmem:[%s1873_s2] sm:$0xff] %v348_v4  ;;  %v732_v5 = vadd.f32 %v1085_v2, %v348_v4  ;;  %v804_v6 = vmul.f32 %v348_v4, %v348_v4  ;;  %v1491_v20 = vpop.f32.mrb[0].mxu1 }
  0xda   :  { %700 = vst [vmem:[%s1873_s2 + $0x108] sm:$0xff] %v1491_v20  ;;  %v1497_v21 = vpop.f32.mrb[1].mxu1 }
  0xdb   :  { %v868_v7 = vadd.f32 %v805_v3, %v804_v6  ;;  %v1088_v8 = vpop.f32.mrb[2].mxu0  ;;  %699 = vst [vmem:[%s1873_s2 + $0x100] sm:$0xff] %v1497_v21 }
  0xdc   :  { %670 = vst [vmem:[%s1873_s2 + $0x18] sm:$0xff] %v1088_v8  ;;  %v358_v9 = vpop.f32.mrb[3].mxu0  ;;  %v807_v12 = vmul.f32 %v1088_v8, %v1088_v8 }
  0xdd   :  { %669 = vst [vmem:[%s1873_s2 + $0x10] sm:$0xff] %v358_v9  ;;  %v733_v10 = vadd.f32 %v732_v5, %v358_v9  ;;  %v806_v11 = vmul.f32 %v358_v9, %v358_v9  ;;  %v1509_v30 = vpop.f32.mrb[2].mxu1 }
  0xde   :  { %702 = vst [vmem:[%s1873_s2 + $0x118] sm:$0xff] %v1509_v30  ;;  %v1515_v31 = vpop.f32.mrb[3].mxu1 }
  0xdf   :  { %v869_v13 = vadd.f32 %v868_v7, %v806_v11  ;;  %v1091_v14 = vpop.f32.mrb[4].mxu0  ;;  %v734_v15 = vadd.f32 %v1088_v8, %v733_v10  ;;  %701 = vst [vmem:[%s1873_s2 + $0x110] sm:$0xff] %v1515_v31 }
  0xe0   :  { %672 = vst [vmem:[%s1873_s2 + $0x28] sm:$0xff] %v1091_v14  ;;  %v368_v16 = vpop.f32.mrb[5].mxu0  ;;  %v809_v22 = vmul.f32 %v1091_v14, %v1091_v14 }
  0xe1   :  { %671 = vst [vmem:[%s1873_s2 + $0x20] sm:$0xff] %v368_v16  ;;  %v735_v17 = vadd.f32 %v734_v15, %v368_v16  ;;  %v808_v18 = vmul.f32 %v368_v16, %v368_v16  ;;  %v870_v19 = vadd.f32 %v869_v13, %v807_v12  ;;  %v1527_v40 = vpop.f32.mrb[4].mxu1 }
  0xe2   :  { %704 = vst [vmem:[%s1873_s2 + $0x128] sm:$0xff] %v1527_v40  ;;  %v1533_v41 = vpop.f32.mrb[5].mxu1 }
  0xe3   :  { %v871_v23 = vadd.f32 %v870_v19, %v808_v18  ;;  %v1094_v24 = vpop.f32.mrb[6].mxu0  ;;  %v736_v25 = vadd.f32 %v1091_v14, %v735_v17  ;;  %703 = vst [vmem:[%s1873_s2 + $0x120] sm:$0xff] %v1533_v41 }
  0xe4   :  { %674 = vst [vmem:[%s1873_s2 + $0x38] sm:$0xff] %v1094_v24  ;;  %v378_v26 = vpop.f32.mrb[7].mxu0  ;;  %v811_v32 = vmul.f32 %v1094_v24, %v1094_v24 }
  0xe5   :  { %673 = vst [vmem:[%s1873_s2 + $0x30] sm:$0xff] %v378_v26  ;;  %v737_v27 = vadd.f32 %v736_v25, %v378_v26  ;;  %v810_v28 = vmul.f32 %v378_v26, %v378_v26  ;;  %v872_v29 = vadd.f32 %v871_v23, %v809_v22  ;;  %v1545_v50 = vpop.f32.mrb[6].mxu1 }
  0xe6   :  { %706 = vst [vmem:[%s1873_s2 + $0x138] sm:$0xff] %v1545_v50  ;;  %v1551_v51 = vpop.f32.mrb[7].mxu1 }
  0xe7   :  { %v873_v33 = vadd.f32 %v872_v29, %v810_v28  ;;  %v1097_v34 = vpop.f32.mrb[8].mxu0  ;;  %v738_v35 = vadd.f32 %v1094_v24, %v737_v27  ;;  %705 = vst [vmem:[%s1873_s2 + $0x130] sm:$0xff] %v1551_v51 }
  0xe8   :  { %676 = vst [vmem:[%s1873_s2 + $0x48] sm:$0xff] %v1097_v34  ;;  %v388_v36 = vpop.f32.mrb[9].mxu0  ;;  %v813_v42 = vmul.f32 %v1097_v34, %v1097_v34 }
  0xe9   :  { %675 = vst [vmem:[%s1873_s2 + $0x40] sm:$0xff] %v388_v36  ;;  %v739_v37 = vadd.f32 %v738_v35, %v388_v36  ;;  %v812_v38 = vmul.f32 %v388_v36, %v388_v36  ;;  %v874_v39 = vadd.f32 %v873_v33, %v811_v32  ;;  %v1563_v60 = vpop.f32.mrb[8].mxu1 }
  0xea   :  { %708 = vst [vmem:[%s1873_s2 + $0x148] sm:$0xff] %v1563_v60  ;;  %v1569_v61 = vpop.f32.mrb[9].mxu1 }
  0xeb   :  { %v875_v43 = vadd.f32 %v874_v39, %v812_v38  ;;  %v1100_v44 = vpop.f32.mrb[10].mxu0  ;;  %v740_v45 = vadd.f32 %v1097_v34, %v739_v37  ;;  %707 = vst [vmem:[%s1873_s2 + $0x140] sm:$0xff] %v1569_v61 }
  0xec   :  { %678 = vst [vmem:[%s1873_s2 + $0x58] sm:$0xff] %v1100_v44  ;;  %v398_v46 = vpop.f32.mrb[11].mxu0  ;;  %v815_v52 = vmul.f32 %v1100_v44, %v1100_v44 }
  0xed   :  { %677 = vst [vmem:[%s1873_s2 + $0x50] sm:$0xff] %v398_v46  ;;  %v741_v47 = vadd.f32 %v740_v45, %v398_v46  ;;  %v814_v48 = vmul.f32 %v398_v46, %v398_v46  ;;  %v876_v49 = vadd.f32 %v875_v43, %v813_v42  ;;  %v1581_v6 = vpop.f32.mrb[10].mxu1 }
  0xee   :  { %710 = vst [vmem:[%s1873_s2 + $0x158] sm:$0xff] %v1581_v6  ;;  %v1587_v7 = vpop.f32.mrb[11].mxu1 }
  0xef   :  { %v877_v53 = vadd.f32 %v876_v49, %v814_v48  ;;  %v1103_v54 = vpop.f32.mrb[12].mxu0  ;;  %v742_v55 = vadd.f32 %v1100_v44, %v741_v47  ;;  %709 = vst [vmem:[%s1873_s2 + $0x150] sm:$0xff] %v1587_v7 }
  0xf0   :  { %680 = vst [vmem:[%s1873_s2 + $0x68] sm:$0xff] %v1103_v54  ;;  %v408_v56 = vpop.f32.mrb[13].mxu0  ;;  %v817_v62 = vmul.f32 %v1103_v54, %v1103_v54 }
  0xf1   :  { %679 = vst [vmem:[%s1873_s2 + $0x60] sm:$0xff] %v408_v56  ;;  %v743_v57 = vadd.f32 %v742_v55, %v408_v56  ;;  %v816_v58 = vmul.f32 %v408_v56, %v408_v56  ;;  %v878_v59 = vadd.f32 %v877_v53, %v815_v52  ;;  %v1599_v16 = vpop.f32.mrb[12].mxu1 }
  0xf2   :  { %712 = vst [vmem:[%s1873_s2 + $0x168] sm:$0xff] %v1599_v16  ;;  %v1605_v17 = vpop.f32.mrb[13].mxu1 }
  0xf3   :  { %v879_v63 = vadd.f32 %v878_v59, %v816_v58  ;;  %v1106_v0 = vpop.f32.mrb[14].mxu0  ;;  %v744_v1 = vadd.f32 %v1103_v54, %v743_v57  ;;  %711 = vst [vmem:[%s1873_s2 + $0x160] sm:$0xff] %v1605_v17 }
  0xf4   :  { %682 = vst [vmem:[%s1873_s2 + $0x78] sm:$0xff] %v1106_v0  ;;  %v418_v2 = vpop.f32.mrb[15].mxu0  ;;  %v819_v8 = vmul.f32 %v1106_v0, %v1106_v0 }
  0xf5   :  { %681 = vst [vmem:[%s1873_s2 + $0x70] sm:$0xff] %v418_v2  ;;  %v745_v3 = vadd.f32 %v744_v1, %v418_v2  ;;  %v818_v4 = vmul.f32 %v418_v2, %v418_v2  ;;  %v880_v5 = vadd.f32 %v879_v63, %v817_v62  ;;  %v1617_v28 = vpop.f32.mrb[14].mxu1 }
  0xf6   :  { %714 = vst [vmem:[%s1873_s2 + $0x178] sm:$0xff] %v1617_v28  ;;  %v1623_v29 = vpop.f32.mrb[15].mxu1 }
  0xf7   :  { %v881_v9 = vadd.f32 %v880_v5, %v818_v4  ;;  %v1109_v10 = vpop.f32.mrb[16].mxu0  ;;  %v746_v11 = vadd.f32 %v1106_v0, %v745_v3  ;;  %713 = vst [vmem:[%s1873_s2 + $0x170] sm:$0xff] %v1623_v29 }
  0xf8   :  { %684 = vst [vmem:[%s1873_s2 + $0x88] sm:$0xff] %v1109_v10  ;;  %v428_v12 = vpop.f32.mrb[17].mxu0  ;;  %v821_v18 = vmul.f32 %v1109_v10, %v1109_v10 }
  0xf9   :  { %683 = vst [vmem:[%s1873_s2 + $0x80] sm:$0xff] %v428_v12  ;;  %v747_v13 = vadd.f32 %v746_v11, %v428_v12  ;;  %v820_v14 = vmul.f32 %v428_v12, %v428_v12  ;;  %v882_v15 = vadd.f32 %v881_v9, %v819_v8  ;;  %v1635_v42 = vpop.f32.mrb[16].mxu1 }
  0xfa   :  { %716 = vst [vmem:[%s1873_s2 + $0x188] sm:$0xff] %v1635_v42  ;;  %v1641_v43 = vpop.f32.mrb[17].mxu1 }
  0xfb   :  { %v883_v19 = vadd.f32 %v882_v15, %v820_v14  ;;  %v1112_v22 = vpop.f32.mrb[18].mxu0  ;;  %v748_v23 = vadd.f32 %v1109_v10, %v747_v13  ;;  %715 = vst [vmem:[%s1873_s2 + $0x180] sm:$0xff] %v1641_v43 }
  0xfc   :  { %686 = vst [vmem:[%s1873_s2 + $0x98] sm:$0xff] %v1112_v22  ;;  %v438_v24 = vpop.f32.mrb[19].mxu0  ;;  %v823_v32 = vmul.f32 %v1112_v22, %v1112_v22 }
  0xfd   :  { %685 = vst [vmem:[%s1873_s2 + $0x90] sm:$0xff] %v438_v24  ;;  %v749_v25 = vadd.f32 %v748_v23, %v438_v24  ;;  %v822_v26 = vmul.f32 %v438_v24, %v438_v24  ;;  %v884_v27 = vadd.f32 %v883_v19, %v821_v18  ;;  %v1653_v54 = vpop.f32.mrb[18].mxu1 }
  0xfe   :  { %718 = vst [vmem:[%s1873_s2 + $0x198] sm:$0xff] %v1653_v54  ;;  %v1659_v55 = vpop.f32.mrb[19].mxu1 }
  0xff   :  { %v885_v33 = vadd.f32 %v884_v27, %v822_v26  ;;  %v1115_v34 = vpop.f32.mrb[20].mxu0  ;;  %v750_v35 = vadd.f32 %v1112_v22, %v749_v25  ;;  %717 = vst [vmem:[%s1873_s2 + $0x190] sm:$0xff] %v1659_v55 }
 0x100   :  { %688 = vst [vmem:[%s1873_s2 + $0xa8] sm:$0xff] %v1115_v34  ;;  %v448_v36 = vpop.f32.mrb[21].mxu0  ;;  %v825_v44 = vmul.f32 %v1115_v34, %v1115_v34 }
 0x101   :  { %687 = vst [vmem:[%s1873_s2 + $0xa0] sm:$0xff] %v448_v36  ;;  %v751_v37 = vadd.f32 %v750_v35, %v448_v36  ;;  %v824_v38 = vmul.f32 %v448_v36, %v448_v36  ;;  %v886_v39 = vadd.f32 %v885_v33, %v823_v32  ;;  %v1671_v2 = vpop.f32.mrb[20].mxu1 }
 0x102   :  { %720 = vst [vmem:[%s1873_s2 + $0x1a8] sm:$0xff] %v1671_v2  ;;  %v1677_v3 = vpop.f32.mrb[21].mxu1 }
 0x103   :  { %v887_v45 = vadd.f32 %v886_v39, %v824_v38  ;;  %v1118_v46 = vpop.f32.mrb[22].mxu0  ;;  %v752_v47 = vadd.f32 %v1115_v34, %v751_v37  ;;  %719 = vst [vmem:[%s1873_s2 + $0x1a0] sm:$0xff] %v1677_v3 }
 0x104   :  { %690 = vst [vmem:[%s1873_s2 + $0xb8] sm:$0xff] %v1118_v46  ;;  %v458_v48 = vpop.f32.mrb[23].mxu0  ;;  %v827_v56 = vmul.f32 %v1118_v46, %v1118_v46 }
 0x105   :  { %689 = vst [vmem:[%s1873_s2 + $0xb0] sm:$0xff] %v458_v48  ;;  %v753_v49 = vadd.f32 %v752_v47, %v458_v48  ;;  %v826_v52 = vmul.f32 %v458_v48, %v458_v48  ;;  %v888_v53 = vadd.f32 %v887_v45, %v825_v44  ;;  %v1689_v14 = vpop.f32.mrb[22].mxu1 }
 0x106   :  { %722 = vst [vmem:[%s1873_s2 + $0x1b8] sm:$0xff] %v1689_v14  ;;  %v1695_v15 = vpop.f32.mrb[23].mxu1 }
 0x107   :  { %v889_v57 = vadd.f32 %v888_v53, %v826_v52  ;;  %v1121_v58 = vpop.f32.mrb[24].mxu0  ;;  %v754_v59 = vadd.f32 %v1118_v46, %v753_v49  ;;  %721 = vst [vmem:[%s1873_s2 + $0x1b0] sm:$0xff] %v1695_v15  ;;  %v836_v53 = vmul.f32 %v1497_v21, %v1497_v21 }
 0x108   :  { %692 = vst [vmem:[%s1873_s2 + $0xc8] sm:$0xff] %v1121_v58  ;;  %v468_v62 = vpop.f32.mrb[25].mxu0  ;;  %v829_v4 = vmul.f32 %v1121_v58, %v1121_v58 }
 0x109   :  { %691 = vst [vmem:[%s1873_s2 + $0xc0] sm:$0xff] %v468_v62  ;;  %v755_v63 = vadd.f32 %v754_v59, %v468_v62  ;;  %v828_v0 = vmul.f32 %v468_v62, %v468_v62  ;;  %v890_v1 = vadd.f32 %v889_v57, %v827_v56  ;;  %v1707_v32 = vpop.f32.mrb[24].mxu1  ;;  %v837_v62 = vmul.f32 %v1491_v20, %v1491_v20 }
 0x10a   :  { %724 = vst [vmem:[%s1873_s2 + $0x1c8] sm:$0xff] %v1707_v32  ;;  %v1713_v33 = vpop.f32.mrb[25].mxu1 }
 0x10b   :  { %v891_v5 = vadd.f32 %v890_v1, %v828_v0  ;;  %v1124_v8 = vpop.f32.mrb[26].mxu0  ;;  %v756_v9 = vadd.f32 %v1121_v58, %v755_v63  ;;  %723 = vst [vmem:[%s1873_s2 + $0x1c0] sm:$0xff] %v1713_v33  ;;  %v838_v1 = vmul.f32 %v1515_v31, %v1515_v31 }
 0x10c   :  { %694 = vst [vmem:[%s1873_s2 + $0xd8] sm:$0xff] %v1124_v8  ;;  %v478_v10 = vpop.f32.mrb[27].mxu0  ;;  %v831_v18 = vmul.f32 %v1124_v8, %v1124_v8 }
 0x10d   :  { %693 = vst [vmem:[%s1873_s2 + $0xd0] sm:$0xff] %v478_v10  ;;  %v757_v11 = vadd.f32 %v756_v9, %v478_v10  ;;  %v830_v12 = vmul.f32 %v478_v10, %v478_v10  ;;  %v892_v13 = vadd.f32 %v891_v5, %v829_v4  ;;  %v1725_v46 = vpop.f32.mrb[26].mxu1 }
 0x10e   :  { %726 = vst [vmem:[%s1873_s2 + $0x1d8] sm:$0xff] %v1725_v46  ;;  %v1731_v47 = vpop.f32.mrb[27].mxu1 }
 0x10f   :  { %v893_v19 = vadd.f32 %v892_v13, %v830_v12  ;;  %v1127_v22 = vpop.f32.mrb[28].mxu0  ;;  %v758_v23 = vadd.f32 %v1124_v8, %v757_v11  ;;  %725 = vst [vmem:[%s1873_s2 + $0x1d0] sm:$0xff] %v1731_v47  ;;  %v840_v11 = vmul.f32 %v1533_v41, %v1533_v41  ;;  %v841_v13 = vmul.f32 %v1527_v40, %v1527_v40 }
 0x110   :  { %696 = vst [vmem:[%s1873_s2 + $0xe8] sm:$0xff] %v1127_v22  ;;  %v488_v24 = vpop.f32.mrb[29].mxu0  ;;  %v833_v34 = vmul.f32 %v1127_v22, %v1127_v22 }
 0x111   :  { %695 = vst [vmem:[%s1873_s2 + $0xe0] sm:$0xff] %v488_v24  ;;  %v759_v25 = vadd.f32 %v758_v23, %v488_v24  ;;  %v832_v26 = vmul.f32 %v488_v24, %v488_v24  ;;  %v894_v27 = vadd.f32 %v893_v19, %v831_v18  ;;  %v1740_v58 = vpop.f32.mrb[28].mxu1  ;;  %v843_v24 = vmul.f32 %v1545_v50, %v1545_v50 }
 0x112   :  { %728 = vst [vmem:[%s1873_s2 + $0x1e8] sm:$0xff] %v1740_v58  ;;  %v1746_v59 = vpop.f32.mrb[29].mxu1 }
 0x113   :  { %v895_v35 = vadd.f32 %v894_v27, %v832_v26  ;;  %v1130_v36 = vpop.f32.mrb[30].mxu0  ;;  %v760_v37 = vadd.f32 %v1127_v22, %v759_v25  ;;  %727 = vst [vmem:[%s1873_s2 + $0x1e0] sm:$0xff] %v1746_v59 }
 0x114   :  { %698 = vst [vmem:[%s1873_s2 + $0xf8] sm:$0xff] %v1130_v36  ;;  %v498_v38 = vpop.f32.mrb[31].mxu0  ;;  %v835_v48 = vmul.f32 %v1130_v36, %v1130_v36 }
 0x115   :  { %697 = vst [vmem:[%s1873_s2 + $0xf0] sm:$0xff] %v498_v38  ;;  %v761_v39 = vadd.f32 %v760_v37, %v498_v38  ;;  %v834_v44 = vmul.f32 %v498_v38, %v498_v38  ;;  %v896_v45 = vadd.f32 %v895_v35, %v833_v34  ;;  %v1758_v5 = vpop.f32.mrb[30].mxu1 }
 0x116   :  { %730 = vst [vmem:[%s1873_s2 + $0x1f8] sm:$0xff] %v1758_v5  ;;  %v1764_v8 = vpop.f32.mrb[31].mxu1 }
 0x117   :  { %v762_v49 = vadd.f32 %v1130_v36, %v761_v39  ;;  %v897_v52 = vadd.f32 %v896_v45, %v834_v44  ;;  %729 = vst [vmem:[%s1873_s2 + $0x1f0] sm:$0xff] %v1764_v8 }
 0x119   :  { %v898_v56 = vadd.f32 %v897_v52, %v835_v48  ;;  %v763_v57 = vadd.f32 %v762_v49, %v1497_v21 }
 0x11b   :  { %v899_v63 = vadd.f32 %v898_v56, %v836_v53  ;;  %v764_v0 = vadd.f32 %v1491_v20, %v763_v57  ;;  %v839_v20 = vmul.f32 %v1509_v30, %v1509_v30 }
 0x11d   :  { %v765_v21 = vadd.f32 %v764_v0, %v1515_v31  ;;  %v900_v4 = vadd.f32 %v899_v63, %v837_v62 }
 0x11f   :  { %v901_v9 = vadd.f32 %v900_v4, %v838_v1  ;;  %v766_v10 = vadd.f32 %v1509_v30, %v765_v21  ;;  %v842_v30 = vmul.f32 %v1551_v51, %v1551_v51 }
 0x121   :  { %v767_v31 = vadd.f32 %v766_v10, %v1533_v41  ;;  %v902_v12 = vadd.f32 %v901_v9, %v839_v20  ;;  %v844_v41 = vmul.f32 %v1569_v61, %v1569_v61 }
 0x123   :  { %v903_v18 = vadd.f32 %v902_v12, %v840_v11  ;;  %v768_v19 = vadd.f32 %v1527_v40, %v767_v31  ;;  %v845_v40 = vmul.f32 %v1563_v60, %v1563_v60 }
 0x125   :  { %v769_v22 = vadd.f32 %v768_v19, %v1551_v51  ;;  %v904_v23 = vadd.f32 %v903_v18, %v841_v13  ;;  %v846_v51 = vmul.f32 %v1587_v7, %v1587_v7 }
 0x127   :  { %v905_v25 = vadd.f32 %v904_v23, %v842_v30  ;;  %v770_v26 = vadd.f32 %v1545_v50, %v769_v22  ;;  %v847_v50 = vmul.f32 %v1581_v6, %v1581_v6 }
 0x129   :  { %v771_v27 = vadd.f32 %v770_v26, %v1569_v61  ;;  %v906_v34 = vadd.f32 %v905_v25, %v843_v24  ;;  %v848_v61 = vmul.f32 %v1605_v17, %v1605_v17 }
 0x12b   :  { %v907_v35 = vadd.f32 %v906_v34, %v844_v41  ;;  %v772_v36 = vadd.f32 %v1563_v60, %v771_v27  ;;  %v849_v60 = vmul.f32 %v1599_v16, %v1599_v16 }
 0x12d   :  { %v773_v37 = vadd.f32 %v772_v36, %v1587_v7  ;;  %v908_v38 = vadd.f32 %v907_v35, %v845_v40  ;;  %v850_v7 = vmul.f32 %v1623_v29, %v1623_v29 }
 0x12f   :  { %v909_v39 = vadd.f32 %v908_v38, %v846_v51  ;;  %v774_v44 = vadd.f32 %v1581_v6, %v773_v37  ;;  %v851_v6 = vmul.f32 %v1617_v28, %v1617_v28 }
 0x131   :  { %v775_v45 = vadd.f32 %v774_v44, %v1605_v17  ;;  %v910_v48 = vadd.f32 %v909_v39, %v847_v50  ;;  %v852_v17 = vmul.f32 %v1641_v43, %v1641_v43 }
 0x133   :  { %v911_v49 = vadd.f32 %v910_v48, %v848_v61  ;;  %v776_v52 = vadd.f32 %v1599_v16, %v775_v45  ;;  %v853_v16 = vmul.f32 %v1635_v42, %v1635_v42 }
 0x135   :  { %v777_v53 = vadd.f32 %v776_v52, %v1623_v29  ;;  %v912_v56 = vadd.f32 %v911_v49, %v849_v60  ;;  %v854_v29 = vmul.f32 %v1659_v55, %v1659_v55 }
 0x137   :  { %v913_v57 = vadd.f32 %v912_v56, %v850_v7  ;;  %v778_v62 = vadd.f32 %v1617_v28, %v777_v53  ;;  %v855_v28 = vmul.f32 %v1653_v54, %v1653_v54 }
 0x139   :  { %v779_v63 = vadd.f32 %v778_v62, %v1641_v43  ;;  %v914_v0 = vadd.f32 %v913_v57, %v851_v6  ;;  %v856_v43 = vmul.f32 %v1677_v3, %v1677_v3 }
 0x13b   :  { %v915_v1 = vadd.f32 %v914_v0, %v852_v17  ;;  %v780_v21 = vadd.f32 %v1635_v42, %v779_v63  ;;  %v857_v42 = vmul.f32 %v1671_v2, %v1671_v2 }
 0x13d   :  { %v781_v4 = vadd.f32 %v780_v21, %v1659_v55  ;;  %v916_v20 = vadd.f32 %v915_v1, %v853_v16  ;;  %v858_v55 = vmul.f32 %v1695_v15, %v1695_v15 }
 0x13f   :  { %v917_v9 = vadd.f32 %v916_v20, %v854_v29  ;;  %v782_v10 = vadd.f32 %v1653_v54, %v781_v4  ;;  %v859_v54 = vmul.f32 %v1689_v14, %v1689_v14 }
 0x141   :  { %v783_v11 = vadd.f32 %v782_v10, %v1677_v3  ;;  %v918_v31 = vadd.f32 %v917_v9, %v855_v28  ;;  %v860_v3 = vmul.f32 %v1713_v33, %v1713_v33 }
 0x143   :  { %v919_v12 = vadd.f32 %v918_v31, %v856_v43  ;;  %v784_v13 = vadd.f32 %v1671_v2, %v783_v11  ;;  %v861_v2 = vmul.f32 %v1707_v32, %v1707_v32 }
 0x145   :  { %v785_v18 = vadd.f32 %v784_v13, %v1695_v15  ;;  %v920_v19 = vadd.f32 %v919_v12, %v857_v42  ;;  %v862_v15 = vmul.f32 %v1731_v47, %v1731_v47 }
 0x147   :  { %v921_v30 = vadd.f32 %v920_v19, %v858_v55  ;;  %v786_v22 = vadd.f32 %v1689_v14, %v785_v18  ;;  %v863_v14 = vmul.f32 %v1725_v46, %v1725_v46 }
 0x149   :  { %v787_v23 = vadd.f32 %v786_v22, %v1713_v33  ;;  %v922_v24 = vadd.f32 %v921_v30, %v859_v54  ;;  %v864_v33 = vmul.f32 %v1746_v59, %v1746_v59 }
 0x14b   :  { %v923_v25 = vadd.f32 %v922_v24, %v860_v3  ;;  %v788_v26 = vadd.f32 %v1707_v32, %v787_v23  ;;  %v865_v32 = vmul.f32 %v1740_v58, %v1740_v58 }
 0x14d   :  { %v789_v41 = vadd.f32 %v788_v26, %v1731_v47  ;;  %v924_v27 = vadd.f32 %v923_v25, %v861_v2  ;;  %v866_v47 = vmul.f32 %v1764_v8, %v1764_v8 }
 0x14f   :  { %v925_v34 = vadd.f32 %v924_v27, %v862_v15  ;;  %v790_v40 = vadd.f32 %v1725_v46, %v789_v41  ;;  %v867_v46 = vmul.f32 %v1758_v5, %v1758_v5 }
 0x151   :  { %v791_v35 = vadd.f32 %v790_v40, %v1746_v59  ;;  %v926_v36 = vadd.f32 %v925_v34, %v863_v14 }
 0x153   :  { %v927_v51 = vadd.f32 %v926_v36, %v864_v33  ;;  %v792_v37 = vadd.f32 %v1740_v58, %v791_v35 }
 0x155   :  { %v793_v38 = vadd.f32 %v792_v37, %v1764_v8  ;;  %v928_v50 = vadd.f32 %v927_v51, %v865_v32  ;;  %v731_v8 = vld [vmem:[%s1871_s3] sm:$0x1] }
 0x157   :  { %v794_v39 = vadd.f32 %v1758_v5, %v793_v38  ;;  %v929_v44 = vadd.f32 %v928_v50, %v866_v47  ;;  %v803_v5 = vld [vmem:[%s1872_s4] sm:$0x1] }
 0x159   :  { %v795_v59 = vrot.slane %v794_v39, 4  ;;  %v930_v61 = vadd.f32 %v929_v44, %v867_v46 }
 0x15b   :  { %v796_v45 = vadd.f32 %v795_v59, %v794_v39  ;;  %v931_v48 = vrot.slane %v930_v61, 4 }
 0x15d   :  { %v797_v60 = vrot.slane %v796_v45, 2  ;;  %v932_v49 = vadd.f32 %v931_v48, %v930_v61 }
 0x15f   :  { %v798_v52 = vadd.f32 %v797_v60, %v796_v45  ;;  %v933_v58 = vrot.slane %v932_v49, 2 }
 0x161   :  { %v799_v7 = vrot.slane %v798_v52, 1  ;;  %v934_v53 = vadd.f32 %v933_v58, %v932_v49 }
 0x163   :  { %v800_v56 = vadd.f32 %v799_v7, %v798_v52  ;;  %v935_v6 = vrot.slane %v934_v53, 1 }
 0x165   :  { %v801_v57 = vadd.f32 %v800_v56, %v731_v8  ;;  %v936_v62 = vadd.f32 %v935_v6, %v934_v53 }
 0x167   :  { %802 = vst [vmem:[%s1871_s3] sm:$0x1] %v801_v57  ;;  %v937_v17 = vadd.f32 %v936_v62, %v803_v5 }
 0x169   :  { %938 = vst [vmem:[%s1872_s4] sm:$0x1] %v937_v17 }

// kernel: basic_resnet_forward.85
= control target key start
LH: loop header
LB: loop body
LE: loop exit
PB: predicated region body
PF: predicated region fallthrough
CT: control target
= control target key end

     0   :  { %v46_v6 = vlaneseq  ;;  %s309_s1 = inlined_call_operand.vmem [shape: f32[1,128], index: 1, kind: input, shape index: {}]   ;;  %s310_s2 = inlined_call_operand.vmem [shape: f32[1,128], index: 2, kind: input, shape index: {}]   ;;  %s311_s0 = inlined_call_operand.vmem [shape: f32[128,128], index: 0, kind: input, shape index: {}]   ;;  %s312_s3 = inlined_call_operand.vmem [shape: f32[1,128], index: 3, kind: input, shape index: {}]   ;;  %s313_s4 = inlined_call_operand.vmem [shape: f32[1,128], index: 4, kind: input, shape index: {}]   ;;  %s314_s5 = inlined_call_operand.vmem [shape: f32[128,128], index: 5, kind: output, shape index: {}]  }
   0x1   :  { %v36_v0 = vld [vmem:[%s309_s1] sm:$0x1]  ;;  %v21_v14 = vld [vmem:[%s311_s0 + $0x8] sm:$0xff]  ;;  %v22_v15 = vld [vmem:[%s311_s0 + $0x10] sm:$0xff] }
   0x2   :  { %v37_v1 = vld [vmem:[%s310_s2] sm:$0x1]  ;;  %v40_v2 = vmul.f32 0.0078125, %v36_v0  ;;  %v47_v8 = vshrl.u32 %v46_v6, 7  ;;  %v23_v16 = vld [vmem:[%s311_s0 + $0x18] sm:$0xff]  ;;  %v25_v18 = vld [vmem:[%s311_s0 + $0x28] sm:$0xff] }
   0x3   :  { %v41_v3 = vmul.f32 0.0078125, %v37_v1  ;;  %v20_v11 = vld [vmem:[%s311_s0] sm:$0xff]  ;;  %v26_v19 = vld [vmem:[%s311_s0 + $0x30] sm:$0xff]  ;;  %v27_v20 = vld [vmem:[%s311_s0 + $0x38] sm:$0xff] }
   0x4   :  { %v42_v4 = vmul.f32 %v40_v2, %v40_v2  ;;  %v48_v10 = vsub.s32 0, %v47_v8  ;;  %v38_v12 = vld [vmem:[%s312_s3] sm:$0x1]  ;;  %v29_v22 = vld [vmem:[%s311_s0 + $0x48] sm:$0xff]  ;;  %v30_v26 = vld [vmem:[%s311_s0 + $0x50] sm:$0xff] }
   0x5   :  { %v24_v17 = vld [vmem:[%s311_s0 + $0x20] sm:$0xff]  ;;  %v31_v27 = vld [vmem:[%s311_s0 + $0x58] sm:$0xff]  ;;  %v33_v33 = vld [vmem:[%s311_s0 + $0x68] sm:$0xff] }
   0x6   :  { %v43_v5 = vsub.f32 %v41_v3, %v42_v4  ;;  %v195_v13 = vrot.slane %v40_v2, %v48_v10  ;;  %v28_v21 = vld [vmem:[%s311_s0 + $0x40] sm:$0xff]  ;;  %v34_v34 = vld [vmem:[%s311_s0 + $0x70] sm:$0xff]  ;;  %v35_v35 = vld [vmem:[%s311_s0 + $0x78] sm:$0xff] }
   0x7   :  { %v32_v28 = vld [vmem:[%s311_s0 + $0x60] sm:$0xff] }
   0x8   :  { %v44_v7 = vmax.f32 %v43_v5, 0.0  ;;  %v51_v24 = vsub.f32 %v20_v11, %v195_v13  ;;  %v52_v25 = vsub.f32 %v21_v14, %v195_v13  ;;  %v53_v30 = vsub.f32 %v22_v15, %v195_v13  ;;  %v150_v44 = vld [vmem:[%s313_s4] ss:$0 sm:$0xff] }
   0x9   :  { %v54_v31 = vsub.f32 %v23_v16, %v195_v13  ;;  %v55_v32 = vsub.f32 %v24_v17, %v195_v13  ;;  %v56_v36 = vsub.f32 %v25_v18, %v195_v13  ;;  %v57_v37 = vsub.f32 %v26_v19, %v195_v13 }
   0xa   :  { %v67_v9 = vadd.f32 1e-05, %v44_v7  ;;  %v58_v38 = vsub.f32 %v27_v20, %v195_v13  ;;  %v59_v39 = vsub.f32 %v28_v21, %v195_v13  ;;  %v60_v41 = vsub.f32 %v29_v22, %v195_v13 }
   0xb   :  { %v61_v42 = vsub.f32 %v30_v26, %v195_v13  ;;  %v62_v43 = vsub.f32 %v31_v27, %v195_v13  ;;  %v63_v45 = vsub.f32 %v32_v28, %v195_v13  ;;  %v64_v46 = vsub.f32 %v33_v33, %v195_v13 }
   0xc   :  { %151 = vrsqrt.f32 %v67_v9  ;;  %v65_v47 = vsub.f32 %v34_v34, %v195_v13  ;;  %v66_v48 = vsub.f32 %v35_v35, %v195_v13 }
  0x16   :  { %v152_v23 = vpop.eup %151 }
  0x17   :  { %v69_v29 = vmul.f32 %v152_v23, %v38_v12 }
  0x19   :  { %v74_v40 = vrot.slane %v69_v29, %v48_v10 }
  0x1b   :  { %v76_v49 = vmul.f32 %v74_v40, %v51_v24  ;;  %v77_v50 = vmul.f32 %v74_v40, %v52_v25  ;;  %v78_v51 = vmul.f32 %v74_v40, %v53_v30  ;;  %v79_v52 = vmul.f32 %v74_v40, %v54_v31 }
  0x1c   :  { %v80_v53 = vmul.f32 %v74_v40, %v55_v32  ;;  %v81_v54 = vmul.f32 %v74_v40, %v56_v36  ;;  %v82_v55 = vmul.f32 %v74_v40, %v57_v37  ;;  %v83_v56 = vmul.f32 %v74_v40, %v58_v38 }
  0x1d   :  { %v98_v57 = vadd.f32 %v150_v44, %v76_v49  ;;  %v99_v58 = vadd.f32 %v150_v44, %v77_v50  ;;  %v100_v59 = vadd.f32 %v150_v44, %v78_v51  ;;  %v101_v60 = vadd.f32 %v150_v44, %v79_v52 }
  0x1e   :  { %v102_v61 = vadd.f32 %v150_v44, %v80_v53  ;;  %v103_v62 = vadd.f32 %v150_v44, %v81_v54  ;;  %v104_v63 = vadd.f32 %v150_v44, %v82_v55  ;;  %v105_v0 = vadd.f32 %v150_v44, %v83_v56 }
  0x1f   :  { %v114_v1 = vmax.f32 %v98_v57, 0.0  ;;  %v115_v2 = vmax.f32 %v99_v58, 0.0  ;;  %v116_v3 = vmax.f32 %v100_v59, 0.0  ;;  %v117_v4 = vmax.f32 %v101_v60, 0.0 }
  0x20   :  { %v118_v5 = vmax.f32 %v102_v61, 0.0  ;;  %v119_v6 = vmax.f32 %v103_v62, 0.0  ;;  %v120_v7 = vmax.f32 %v104_v63, 0.0  ;;  %v121_v8 = vmax.f32 %v105_v0, 0.0 }
  0x21   :  { %130 = vst [vmem:[%s314_s5] sm:$0xff] %v114_v1  ;;  %131 = vst [vmem:[%s314_s5 + $0x8] sm:$0xff] %v115_v2  ;;  %v84_v9 = vmul.f32 %v74_v40, %v59_v39  ;;  %v85_v10 = vmul.f32 %v74_v40, %v60_v41  ;;  %v86_v11 = vmul.f32 %v74_v40, %v61_v42 }
  0x22   :  { %132 = vst [vmem:[%s314_s5 + $0x10] sm:$0xff] %v116_v3  ;;  %133 = vst [vmem:[%s314_s5 + $0x18] sm:$0xff] %v117_v4  ;;  %v87_v12 = vmul.f32 %v74_v40, %v62_v43  ;;  %v88_v13 = vmul.f32 %v74_v40, %v63_v45  ;;  %v89_v14 = vmul.f32 %v74_v40, %v64_v46 }
  0x23   :  { %134 = vst [vmem:[%s314_s5 + $0x20] sm:$0xff] %v118_v5  ;;  %135 = vst [vmem:[%s314_s5 + $0x28] sm:$0xff] %v119_v6  ;;  %v90_v15 = vmul.f32 %v74_v40, %v65_v47  ;;  %v91_v16 = vmul.f32 %v74_v40, %v66_v48  ;;  %v106_v17 = vadd.f32 %v150_v44, %v84_v9 }
  0x24   :  { %136 = vst [vmem:[%s314_s5 + $0x30] sm:$0xff] %v120_v7  ;;  %137 = vst [vmem:[%s314_s5 + $0x38] sm:$0xff] %v121_v8  ;;  %v107_v18 = vadd.f32 %v150_v44, %v85_v10  ;;  %v108_v19 = vadd.f32 %v150_v44, %v86_v11  ;;  %v109_v20 = vadd.f32 %v150_v44, %v87_v12 }
  0x25   :  { %v110_v21 = vadd.f32 %v150_v44, %v88_v13  ;;  %v111_v22 = vadd.f32 %v150_v44, %v89_v14  ;;  %v112_v23 = vadd.f32 %v150_v44, %v90_v15  ;;  %v113_v24 = vadd.f32 %v150_v44, %v91_v16 }
  0x26   :  { %v122_v25 = vmax.f32 %v106_v17, 0.0  ;;  %v123_v26 = vmax.f32 %v107_v18, 0.0  ;;  %v124_v27 = vmax.f32 %v108_v19, 0.0  ;;  %v125_v28 = vmax.f32 %v109_v20, 0.0 }
  0x27   :  { %v126_v29 = vmax.f32 %v110_v21, 0.0  ;;  %v127_v30 = vmax.f32 %v111_v22, 0.0  ;;  %v128_v31 = vmax.f32 %v112_v23, 0.0  ;;  %v129_v32 = vmax.f32 %v113_v24, 0.0 }
  0x28   :  { %138 = vst [vmem:[%s314_s5 + $0x40] sm:$0xff] %v122_v25  ;;  %139 = vst [vmem:[%s314_s5 + $0x48] sm:$0xff] %v123_v26 }
  0x29   :  { %140 = vst [vmem:[%s314_s5 + $0x50] sm:$0xff] %v124_v27  ;;  %141 = vst [vmem:[%s314_s5 + $0x58] sm:$0xff] %v125_v28 }
  0x2a   :  { %142 = vst [vmem:[%s314_s5 + $0x60] sm:$0xff] %v126_v29  ;;  %143 = vst [vmem:[%s314_s5 + $0x68] sm:$0xff] %v127_v30 }
  0x2b   :  { %144 = vst [vmem:[%s314_s5 + $0x70] sm:$0xff] %v128_v31  ;;  %145 = vst [vmem:[%s314_s5 + $0x78] sm:$0xff] %v129_v32 }

// kernel: basic_resnet_forward.84
= control target key start
LH: loop header
LB: loop body
LE: loop exit
PB: predicated region body
PF: predicated region fallthrough
CT: control target
= control target key end

     0   :  { %v419_v0 = vmov 0.0|0.0   ;;  %vm70_vm0 = vcmask 130048   ;;  %v420_v60 = vmov 0.0   ;;  %s708_s1 = inlined_call_operand.vmem [shape: f32[144,128], index: 1, kind: input, shape index: {}]   ;;  %s709_s0 = inlined_call_operand.vmem [shape: f32[128,144], index: 0, kind: input, shape index: {}]   ;;  %s710_s3 = inlined_call_operand.vmem [shape: f32[1,128], index: 3, kind: output, shape index: {1}]   ;;  %s711_s4 = inlined_call_operand.vmem [shape: f32[1,128], index: 4, kind: output, shape index: {2}]   ;;  %s712_s2 = inlined_call_operand.vmem [shape: f32[128,128], index: 2, kind: output, shape index: {0}]  }
   0x1   :  { %372 = vmatprep.subr.bf16.mxu0 %v419_v0  ;;  %v52_v1 = vld [vmem:[%s708_s1] sm:$0xff]  ;;  %v53_v2 = vld [vmem:[%s708_s1 + $0x8] sm:$0xff]  ;;  %v54_v3 = vld [vmem:[%s708_s1 + $0x10] sm:$0xff]  ;;  %399 = vmatprep.subr.bf16.mxu1 %v419_v0  ;;  %18 = vst [vmem:[%s710_s3] sm:$0x1] %v420_v60 }
   0x2   :  { %v373_v4 = vpack.c.bf16 %v53_v2, %v52_v1  ;;  %v55_v5 = vld [vmem:[%s708_s1 + $0x18] sm:$0xff]  ;;  %v56_v7 = vld [vmem:[%s708_s1 + $0x20] sm:$0xff]  ;;  %v57_v8 = vld [vmem:[%s708_s1 + $0x28] sm:$0xff]  ;;  %19 = vst [vmem:[%s711_s4] sm:$0x1] %v420_v60 }
   0x3   :  { %v376_v6 = vpack.c.bf16 %v55_v5, %v54_v3  ;;  %v21_v9 = vld [vmem:[%s709_s0 + $0x8] sm:$0xff]  ;;  %v379_v10 = vpack.c.bf16 %v57_v8, %v56_v7  ;;  %v58_v11 = vld [vmem:[%s708_s1 + $0x30] sm:$0xff]  ;;  %v59_v12 = vld [vmem:[%s708_s1 + $0x38] sm:$0xff] }
   0x4   :  { %374 = vmatpush1.bf16.msra.mxu0 %v373_v4  ;;  %408 = vmatpush1.bf16.msra.mxu1 %v373_v4  ;;  %v37_v13 = vld [vmem:[%s709_s0 + $0x88] sm:$0xff]  ;;  %v382_v14 = vpack.c.bf16 %v59_v12, %v58_v11  ;;  %v60_v15 = vld [vmem:[%s708_s1 + $0x40] sm:$0xff]  ;;  %v62_v18 = vld [vmem:[%s708_s1 + $0x50] sm:$0xff] }
   0x5   :  { %375 = vmatprep.subr.bf16.mxu0 %v419_v0  ;;  %400 = vmatprep.subr.bf16.mxu1 %v419_v0  ;;  %v61_v16 = vld [vmem:[%s708_s1 + $0x48] sm:$0xff]  ;;  %v63_v19 = vld [vmem:[%s708_s1 + $0x58] sm:$0xff]  ;;  %v64_v21 = vld [vmem:[%s708_s1 + $0x60] sm:$0xff] }
   0x6   :  { %356 = vmatprep.mubr.msk.f32.mxu0 %vm70_vm0, %v21_v9  ;;  %364 = vmatprep.mubr.msk.f32.mxu1 %vm70_vm0, %v37_v13  ;;  %v385_v17 = vpack.c.bf16 %v61_v16, %v60_v15  ;;  %v388_v20 = vpack.c.bf16 %v63_v19, %v62_v18  ;;  %v65_v22 = vld [vmem:[%s708_s1 + $0x68] sm:$0xff]  ;;  %v66_v24 = vld [vmem:[%s708_s1 + $0x70] sm:$0xff]  ;;  %v67_v25 = vld [vmem:[%s708_s1 + $0x78] sm:$0xff] }
   0x7   :  { %v391_v23 = vpack.c.bf16 %v65_v22, %v64_v21  ;;  %v394_v26 = vpack.c.bf16 %v67_v25, %v66_v24  ;;  %v68_v27 = vld [vmem:[%s708_s1 + $0x80] sm:$0xff]  ;;  %v69_v28 = vld [vmem:[%s708_s1 + $0x88] sm:$0xff]  ;;  %v23_v32 = vld [vmem:[%s709_s0 + $0x18] sm:$0xff] }
   0x8   :  { %377 = vmatpush1.bf16.msra.mxu0 %v376_v6  ;;  %409 = vmatpush1.bf16.msra.mxu1 %v376_v6  ;;  %v397_v29 = vpack.c.bf16 %v69_v28, %v68_v27  ;;  %v20_v30 = vld [vmem:[%s709_s0] sm:$0xff]  ;;  %v39_v33 = vld [vmem:[%s709_s0 + $0x98] sm:$0xff]  ;;  %v22_v34 = vld [vmem:[%s709_s0 + $0x10] sm:$0xff] }
   0x9   :  { %378 = vmatprep.subr.bf16.mxu0 %v419_v0  ;;  %401 = vmatprep.subr.bf16.mxu1 %v419_v0  ;;  %v36_v31 = vld [vmem:[%s709_s0 + $0x80] sm:$0xff]  ;;  %v38_v35 = vld [vmem:[%s709_s0 + $0x90] sm:$0xff]  ;;  %v25_v36 = vld [vmem:[%s709_s0 + $0x28] sm:$0xff] }
   0xa   :  { %v41_v37 = vld [vmem:[%s709_s0 + $0xa8] sm:$0xff]  ;;  %v24_v38 = vld [vmem:[%s709_s0 + $0x20] sm:$0xff]  ;;  %v27_v40 = vld [vmem:[%s709_s0 + $0x38] sm:$0xff] }
   0xb   :  { %v40_v39 = vld [vmem:[%s709_s0 + $0xa0] sm:$0xff]  ;;  %v43_v41 = vld [vmem:[%s709_s0 + $0xb8] sm:$0xff]  ;;  %v26_v42 = vld [vmem:[%s709_s0 + $0x30] sm:$0xff] }
   0xc   :  { %380 = vmatpush1.bf16.msra.mxu0 %v379_v10  ;;  %410 = vmatpush1.bf16.msra.mxu1 %v379_v10  ;;  %v42_v43 = vld [vmem:[%s709_s0 + $0xb0] sm:$0xff]  ;;  %v29_v44 = vld [vmem:[%s709_s0 + $0x48] sm:$0xff]  ;;  %v28_v46 = vld [vmem:[%s709_s0 + $0x40] sm:$0xff] }
   0xd   :  { %381 = vmatprep.subr.bf16.mxu0 %v419_v0  ;;  %402 = vmatprep.subr.bf16.mxu1 %v419_v0  ;;  %v45_v45 = vld [vmem:[%s709_s0 + $0xc8] sm:$0xff]  ;;  %v44_v47 = vld [vmem:[%s709_s0 + $0xc0] sm:$0xff]  ;;  %v31_v48 = vld [vmem:[%s709_s0 + $0x58] sm:$0xff] }
   0xe   :  { %v47_v49 = vld [vmem:[%s709_s0 + $0xd8] sm:$0xff]  ;;  %v30_v50 = vld [vmem:[%s709_s0 + $0x50] sm:$0xff]  ;;  %v33_v52 = vld [vmem:[%s709_s0 + $0x68] sm:$0xff] }
   0xf   :  { %v46_v51 = vld [vmem:[%s709_s0 + $0xd0] sm:$0xff]  ;;  %v49_v53 = vld [vmem:[%s709_s0 + $0xe8] sm:$0xff]  ;;  %v32_v54 = vld [vmem:[%s709_s0 + $0x60] sm:$0xff] }
  0x10   :  { %383 = vmatpush1.bf16.msra.mxu0 %v382_v14  ;;  %411 = vmatpush1.bf16.msra.mxu1 %v382_v14  ;;  %v48_v55 = vld [vmem:[%s709_s0 + $0xe0] sm:$0xff]  ;;  %v35_v56 = vld [vmem:[%s709_s0 + $0x78] sm:$0xff]  ;;  %v34_v58 = vld [vmem:[%s709_s0 + $0x70] sm:$0xff] }
  0x11   :  { %384 = vmatprep.subr.bf16.mxu0 %v419_v0  ;;  %403 = vmatprep.subr.bf16.mxu1 %v419_v0  ;;  %v51_v57 = vld [vmem:[%s709_s0 + $0xf8] sm:$0xff]  ;;  %v50_v59 = vld [vmem:[%s709_s0 + $0xf0] sm:$0xff] }
  0x14   :  { %386 = vmatpush1.bf16.msra.mxu0 %v385_v17  ;;  %412 = vmatpush1.bf16.msra.mxu1 %v385_v17 }
  0x15   :  { %387 = vmatprep.subr.bf16.mxu0 %v419_v0  ;;  %404 = vmatprep.subr.bf16.mxu1 %v419_v0 }
  0x18   :  { %389 = vmatpush1.bf16.msra.mxu0 %v388_v20  ;;  %413 = vmatpush1.bf16.msra.mxu1 %v388_v20 }
  0x19   :  { %390 = vmatprep.subr.bf16.mxu0 %v419_v0  ;;  %405 = vmatprep.subr.bf16.mxu1 %v419_v0 }
  0x1c   :  { %392 = vmatpush1.bf16.msra.mxu0 %v391_v23  ;;  %414 = vmatpush1.bf16.msra.mxu1 %v391_v23 }
  0x1d   :  { %393 = vmatprep.subr.bf16.mxu0 %v419_v0  ;;  %406 = vmatprep.subr.bf16.mxu1 %v419_v0 }
  0x20   :  { %395 = vmatpush1.bf16.msra.mxu0 %v394_v26  ;;  %415 = vmatpush1.bf16.msra.mxu1 %v394_v26 }
  0x21   :  { %396 = vmatprep.subr.bf16.mxu0 %v419_v0  ;;  %407 = vmatprep.subr.bf16.mxu1 %v419_v0 }
  0x24   :  { %398 = vmatpush1.bf16.msra.mxu0 %v397_v29  ;;  %416 = vmatpush1.bf16.msra.mxu1 %v397_v29 }
  0x27   :  { %184 = vmatmul.mubr.f32.vlgmr.msra.gmra.mrb[0].mxu0 %v20_v30  ;;  %224 = vmatmul.mubr.f32.vlgmr.msra.gmra.mrb[0].mxu1 %v36_v31 }
  0x28   :  { %357 = vmatprep.mubr.msk.f32.mxu0 %vm70_vm0, %v23_v32  ;;  %365 = vmatprep.mubr.msk.f32.mxu1 %vm70_vm0, %v39_v33 }
  0x2b   :  { %189 = vmatmul.mubr.f32.gmra.mrb[2].mxu0 %v22_v34  ;;  %229 = vmatmul.mubr.f32.gmra.mrb[2].mxu1 %v38_v35 }
  0x2c   :  { %358 = vmatprep.mubr.msk.f32.mxu0 %vm70_vm0, %v25_v36  ;;  %366 = vmatprep.mubr.msk.f32.mxu1 %vm70_vm0, %v41_v37 }
  0x2f   :  { %194 = vmatmul.mubr.f32.gmra.mrb[4].mxu0 %v24_v38  ;;  %234 = vmatmul.mubr.f32.gmra.mrb[4].mxu1 %v40_v39 }
  0x30   :  { %359 = vmatprep.mubr.msk.f32.mxu0 %vm70_vm0, %v27_v40  ;;  %367 = vmatprep.mubr.msk.f32.mxu1 %vm70_vm0, %v43_v41 }
  0x33   :  { %199 = vmatmul.mubr.f32.gmra.mrb[6].mxu0 %v26_v42  ;;  %239 = vmatmul.mubr.f32.gmra.mrb[6].mxu1 %v42_v43 }
  0x34   :  { %360 = vmatprep.mubr.msk.f32.mxu0 %vm70_vm0, %v29_v44  ;;  %368 = vmatprep.mubr.msk.f32.mxu1 %vm70_vm0, %v45_v45 }
  0x37   :  { %204 = vmatmul.mubr.f32.gmra.mrb[8].mxu0 %v28_v46  ;;  %244 = vmatmul.mubr.f32.gmra.mrb[8].mxu1 %v44_v47 }
  0x38   :  { %361 = vmatprep.mubr.msk.f32.mxu0 %vm70_vm0, %v31_v48  ;;  %369 = vmatprep.mubr.msk.f32.mxu1 %vm70_vm0, %v47_v49 }
  0x3b   :  { %209 = vmatmul.mubr.f32.gmra.mrb[10].mxu0 %v30_v50  ;;  %249 = vmatmul.mubr.f32.gmra.mrb[10].mxu1 %v46_v51 }
  0x3c   :  { %362 = vmatprep.mubr.msk.f32.mxu0 %vm70_vm0, %v33_v52  ;;  %370 = vmatprep.mubr.msk.f32.mxu1 %vm70_vm0, %v49_v53 }
  0x3f   :  { %214 = vmatmul.mubr.f32.gmra.mrb[12].mxu0 %v32_v54  ;;  %254 = vmatmul.mubr.f32.gmra.mrb[12].mxu1 %v48_v55 }
  0x40   :  { %363 = vmatprep.mubr.msk.f32.mxu0 %vm70_vm0, %v35_v56  ;;  %371 = vmatprep.mubr.msk.f32.mxu1 %vm70_vm0, %v51_v57 }
  0x43   :  { %219 = vmatmul.mubr.f32.gmra.mrb[14].mxu0 %v34_v58  ;;  %259 = vmatmul.mubr.f32.gmra.mrb[14].mxu1 %v50_v59 }
  0xfa   :  { %v185_v61 = vpop.f32.mrb[0].mxu0  ;;  %v636_v62 = vpop.f32.mrb[0].mxu1 }
  0xfb   :  { %264 = vst [vmem:[%s712_s2] sm:$0xff] %v185_v61  ;;  %v187_v63 = vpop.f32.mrb[1].mxu0  ;;  %272 = vst [vmem:[%s712_s2 + $0x40] sm:$0xff] %v636_v62  ;;  %v227_v0 = vpop.f32.mrb[1].mxu1  ;;  %v305_v3 = vmul.f32 %v185_v61, %v185_v61  ;;  %v313_v50 = vmul.f32 %v636_v62, %v636_v62 }
  0xfe   :  { %v190_v1 = vpop.f32.mrb[2].mxu0  ;;  %v645_v2 = vpop.f32.mrb[2].mxu1 }
  0xff   :  { %265 = vst [vmem:[%s712_s2 + $0x8] sm:$0xff] %v190_v1  ;;  %v281_v4 = vadd.f32 %v190_v1, %v185_v61  ;;  %v306_v5 = vmul.f32 %v190_v1, %v190_v1  ;;  %v192_v6 = vpop.f32.mrb[3].mxu0  ;;  %273 = vst [vmem:[%s712_s2 + $0x48] sm:$0xff] %v645_v2  ;;  %v232_v7 = vpop.f32.mrb[3].mxu1  ;;  %v314_v53 = vmul.f32 %v645_v2, %v645_v2 }
 0x101   :  { %v321_v8 = vadd.f32 %v306_v5, %v305_v3 }
 0x102   :  { %v195_v9 = vpop.f32.mrb[4].mxu0  ;;  %v235_v10 = vpop.f32.mrb[4].mxu1 }
 0x103   :  { %266 = vst [vmem:[%s712_s2 + $0x10] sm:$0xff] %v195_v9  ;;  %v282_v11 = vadd.f32 %v281_v4, %v195_v9  ;;  %v307_v12 = vmul.f32 %v195_v9, %v195_v9  ;;  %v197_v13 = vpop.f32.mrb[5].mxu0  ;;  %274 = vst [vmem:[%s712_s2 + $0x50] sm:$0xff] %v235_v10  ;;  %v237_v14 = vpop.f32.mrb[5].mxu1  ;;  %v315_v56 = vmul.f32 %v235_v10, %v235_v10 }
 0x105   :  { %v322_v15 = vadd.f32 %v321_v8, %v307_v12 }
 0x106   :  { %v200_v16 = vpop.f32.mrb[6].mxu0  ;;  %v240_v17 = vpop.f32.mrb[6].mxu1 }
 0x107   :  { %267 = vst [vmem:[%s712_s2 + $0x18] sm:$0xff] %v200_v16  ;;  %v283_v18 = vadd.f32 %v282_v11, %v200_v16  ;;  %v308_v19 = vmul.f32 %v200_v16, %v200_v16  ;;  %v202_v20 = vpop.f32.mrb[7].mxu0  ;;  %275 = vst [vmem:[%s712_s2 + $0x58] sm:$0xff] %v240_v17  ;;  %v242_v21 = vpop.f32.mrb[7].mxu1  ;;  %v316_v59 = vmul.f32 %v240_v17, %v240_v17 }
 0x108   :  { %v280_v20 = vld [vmem:[%s710_s3] sm:$0x1] }
 0x109   :  { %v323_v22 = vadd.f32 %v322_v15, %v308_v19 }
 0x10a   :  { %v205_v23 = vpop.f32.mrb[8].mxu0  ;;  %v245_v24 = vpop.f32.mrb[8].mxu1 }
 0x10b   :  { %268 = vst [vmem:[%s712_s2 + $0x20] sm:$0xff] %v205_v23  ;;  %v284_v25 = vadd.f32 %v283_v18, %v205_v23  ;;  %v309_v26 = vmul.f32 %v205_v23, %v205_v23  ;;  %v207_v27 = vpop.f32.mrb[9].mxu0  ;;  %276 = vst [vmem:[%s712_s2 + $0x60] sm:$0xff] %v245_v24  ;;  %v247_v28 = vpop.f32.mrb[9].mxu1  ;;  %v317_v0 = vmul.f32 %v245_v24, %v245_v24  ;;  %v304_v23 = vld [vmem:[%s711_s4] sm:$0x1] }
 0x10d   :  { %v324_v29 = vadd.f32 %v323_v22, %v309_v26 }
 0x10e   :  { %v210_v30 = vpop.f32.mrb[10].mxu0  ;;  %v250_v31 = vpop.f32.mrb[10].mxu1 }
 0x10f   :  { %269 = vst [vmem:[%s712_s2 + $0x28] sm:$0xff] %v210_v30  ;;  %v285_v32 = vadd.f32 %v284_v25, %v210_v30  ;;  %v310_v33 = vmul.f32 %v210_v30, %v210_v30  ;;  %v212_v34 = vpop.f32.mrb[11].mxu0  ;;  %277 = vst [vmem:[%s712_s2 + $0x68] sm:$0xff] %v250_v31  ;;  %v252_v35 = vpop.f32.mrb[11].mxu1  ;;  %v318_v5 = vmul.f32 %v250_v31, %v250_v31 }
 0x111   :  { %v325_v36 = vadd.f32 %v324_v29, %v310_v33 }
 0x112   :  { %v215_v37 = vpop.f32.mrb[12].mxu0  ;;  %v255_v38 = vpop.f32.mrb[12].mxu1 }
 0x113   :  { %270 = vst [vmem:[%s712_s2 + $0x30] sm:$0xff] %v215_v37  ;;  %v286_v39 = vadd.f32 %v285_v32, %v215_v37  ;;  %v311_v40 = vmul.f32 %v215_v37, %v215_v37  ;;  %v217_v41 = vpop.f32.mrb[13].mxu0  ;;  %278 = vst [vmem:[%s712_s2 + $0x70] sm:$0xff] %v255_v38  ;;  %v257_v42 = vpop.f32.mrb[13].mxu1  ;;  %v319_v7 = vmul.f32 %v255_v38, %v255_v38 }
 0x115   :  { %v326_v43 = vadd.f32 %v325_v36, %v311_v40 }
 0x116   :  { %v220_v44 = vpop.f32.mrb[14].mxu0  ;;  %v260_v45 = vpop.f32.mrb[14].mxu1 }
 0x117   :  { %271 = vst [vmem:[%s712_s2 + $0x38] sm:$0xff] %v220_v44  ;;  %v287_v46 = vadd.f32 %v286_v39, %v220_v44  ;;  %v312_v47 = vmul.f32 %v220_v44, %v220_v44  ;;  %v222_v48 = vpop.f32.mrb[15].mxu0  ;;  %279 = vst [vmem:[%s712_s2 + $0x78] sm:$0xff] %v260_v45  ;;  %v262_v49 = vpop.f32.mrb[15].mxu1  ;;  %v320_v8 = vmul.f32 %v260_v45, %v260_v45 }
 0x119   :  { %v288_v51 = vadd.f32 %v287_v46, %v636_v62  ;;  %v327_v52 = vadd.f32 %v326_v43, %v312_v47 }
 0x11b   :  { %v289_v54 = vadd.f32 %v288_v51, %v645_v2  ;;  %v328_v55 = vadd.f32 %v327_v52, %v313_v50 }
 0x11d   :  { %v329_v57 = vadd.f32 %v328_v55, %v314_v53  ;;  %v290_v58 = vadd.f32 %v289_v54, %v235_v10 }
 0x11f   :  { %v291_v60 = vadd.f32 %v290_v58, %v240_v17  ;;  %v330_v61 = vadd.f32 %v329_v57, %v315_v56 }
 0x121   :  { %v292_v63 = vadd.f32 %v291_v60, %v245_v24  ;;  %v331_v1 = vadd.f32 %v330_v61, %v316_v59 }
 0x123   :  { %v332_v3 = vadd.f32 %v331_v1, %v317_v0  ;;  %v293_v4 = vadd.f32 %v292_v63, %v250_v31 }
 0x125   :  { %v333_v62 = vadd.f32 %v332_v3, %v318_v5  ;;  %v294_v6 = vadd.f32 %v293_v4, %v255_v38 }
 0x127   :  { %v334_v9 = vadd.f32 %v333_v62, %v319_v7  ;;  %v295_v11 = vadd.f32 %v294_v6, %v260_v45 }
 0x129   :  { %v296_v2 = vrot.slane %v295_v11, 4  ;;  %v335_v12 = vadd.f32 %v334_v9, %v320_v8 }
 0x12b   :  { %v297_v13 = vadd.f32 %v296_v2, %v295_v11  ;;  %v336_v14 = vrot.slane %v335_v12, 4 }
 0x12d   :  { %v298_v10 = vrot.slane %v297_v13, 2  ;;  %v337_v15 = vadd.f32 %v336_v14, %v335_v12 }
 0x12f   :  { %v299_v16 = vadd.f32 %v298_v10, %v297_v13  ;;  %v338_v17 = vrot.slane %v337_v15, 2 }
 0x131   :  { %v300_v18 = vrot.slane %v299_v16, 1  ;;  %v339_v19 = vadd.f32 %v338_v17, %v337_v15 }
 0x133   :  { %v301_v21 = vadd.f32 %v300_v18, %v299_v16  ;;  %v340_v22 = vrot.slane %v339_v19, 1 }
 0x135   :  { %v302_v24 = vadd.f32 %v301_v21, %v280_v20  ;;  %v341_v25 = vadd.f32 %v340_v22, %v339_v19 }
 0x137   :  { %303 = vst [vmem:[%s710_s3] sm:$0x1] %v302_v24  ;;  %v342_v26 = vadd.f32 %v341_v25, %v304_v23 }
 0x139   :  { %343 = vst [vmem:[%s711_s4] sm:$0x1] %v342_v26 }

// kernel: basic_resnet_forward.86
= control target key start
LH: loop header
LB: loop body
LE: loop exit
PB: predicated region body
PF: predicated region fallthrough
CT: control target
= control target key end

     0   :  { %vm38_vm0 = vcmask 130048   ;;  %v393_v19 = vmov 0.0   ;;  %s555_s1 = inlined_call_operand.vmem [shape: f32[16,128], index: 1, kind: input, shape index: {}]   ;;  %s556_s0 = inlined_call_operand.vmem [shape: f32[128,16], index: 0, kind: input, shape index: {}]   ;;  %s557_s3 = inlined_call_operand.vmem [shape: f32[1,128], index: 3, kind: output, shape index: {1}]   ;;  %s558_s4 = inlined_call_operand.vmem [shape: f32[1,128], index: 4, kind: output, shape index: {2}]   ;;  %s559_s2 = inlined_call_operand.vmem [shape: f32[128,128], index: 2, kind: output, shape index: {0}]  }
   0x1   :  { %v36_v0 = vld [vmem:[%s555_s1] sm:$0xff]  ;;  %v37_v1 = vld [vmem:[%s555_s1 + $0x8] sm:$0xff]  ;;  %v22_v7 = vld [vmem:[%s556_s0 + $0x10] sm:$0xff]  ;;  %18 = vst [vmem:[%s557_s3] sm:$0x1] %v393_v19 }
   0x2   :  { %v20_v2 = vld [vmem:[%s556_s0] sm:$0xff]  ;;  %v386_v3 = vpack.c.bf16 %v37_v1, %v36_v0  ;;  %v21_v5 = vld [vmem:[%s556_s0 + $0x8] sm:$0xff]  ;;  %v30_v8 = vld [vmem:[%s556_s0 + $0x50] sm:$0xff]  ;;  %19 = vst [vmem:[%s558_s4] sm:$0x1] %v393_v19 }
   0x3   :  { %362 = vmatprep.mubr.msk.f32.mxu0 %vm38_vm0, %v20_v2  ;;  %v28_v4 = vld [vmem:[%s556_s0 + $0x40] sm:$0xff]  ;;  %v29_v6 = vld [vmem:[%s556_s0 + $0x48] sm:$0xff]  ;;  %v23_v9 = vld [vmem:[%s556_s0 + $0x18] sm:$0xff] }
   0x4   :  { %387 = vmatprep.subr.bf16.mxu0 %v386_v3  ;;  %390 = vmatprep.subr.bf16.mxu1 %v386_v3  ;;  %v31_v10 = vld [vmem:[%s556_s0 + $0x58] sm:$0xff]  ;;  %v24_v11 = vld [vmem:[%s556_s0 + $0x20] sm:$0xff]  ;;  %v25_v13 = vld [vmem:[%s556_s0 + $0x28] sm:$0xff] }
   0x5   :  { %389 = vmatpush3.bf16.msra.mxu0 %v386_v3  ;;  %391 = vmatpush3.bf16.msra.mxu1 %v386_v3  ;;  %v32_v12 = vld [vmem:[%s556_s0 + $0x60] sm:$0xff]  ;;  %v33_v14 = vld [vmem:[%s556_s0 + $0x68] sm:$0xff]  ;;  %v26_v15 = vld [vmem:[%s556_s0 + $0x30] sm:$0xff] }
   0x6   :  { %374 = vmatprep.mubr.msk.f32.mxu1 %vm38_vm0, %v28_v4  ;;  %v34_v16 = vld [vmem:[%s556_s0 + $0x70] sm:$0xff]  ;;  %v27_v17 = vld [vmem:[%s556_s0 + $0x38] sm:$0xff] }
   0x7   :  { %v35_v18 = vld [vmem:[%s556_s0 + $0x78] sm:$0xff] }
   0x8   :  { %363 = vmatmul.mubr.msk.f32.vlgmr.msra.gmra.mrb[0].mxu0 %vm38_vm0, %v21_v5  ;;  %375 = vmatmul.mubr.msk.f32.vlgmr.msra.gmra.mrb[0].mxu1 %vm38_vm0, %v29_v6 }
   0x9   :  { %365 = vmatprep.mubr.msk.f32.mxu0 %vm38_vm0, %v22_v7  ;;  %377 = vmatprep.mubr.msk.f32.mxu1 %vm38_vm0, %v30_v8 }
   0xc   :  { %366 = vmatmul.mubr.msk.f32.gmra.mrb[2].mxu0 %vm38_vm0, %v23_v9  ;;  %378 = vmatmul.mubr.msk.f32.gmra.mrb[2].mxu1 %vm38_vm0, %v31_v10 }
   0xd   :  { %368 = vmatprep.mubr.msk.f32.mxu0 %vm38_vm0, %v24_v11  ;;  %380 = vmatprep.mubr.msk.f32.mxu1 %vm38_vm0, %v32_v12 }
  0x10   :  { %369 = vmatmul.mubr.msk.f32.gmra.mrb[4].mxu0 %vm38_vm0, %v25_v13  ;;  %381 = vmatmul.mubr.msk.f32.gmra.mrb[4].mxu1 %vm38_vm0, %v33_v14 }
  0x11   :  { %371 = vmatprep.mubr.msk.f32.mxu0 %vm38_vm0, %v26_v15  ;;  %383 = vmatprep.mubr.msk.f32.mxu1 %vm38_vm0, %v34_v16 }
  0x14   :  { %372 = vmatmul.mubr.msk.f32.gmra.mrb[6].mxu0 %vm38_vm0, %v27_v17  ;;  %384 = vmatmul.mubr.msk.f32.gmra.mrb[6].mxu1 %vm38_vm0, %v35_v18 }
  0xdb   :  { %v364_v20 = vpop.f32.mrb[0].mxu0  ;;  %v376_v21 = vpop.f32.mrb[0].mxu1 }
  0xdc   :  { %233 = vst [vmem:[%s559_s2 + $0x8] sm:$0xff] %v364_v20  ;;  %v274_v22 = vmul.f32 %v364_v20, %v364_v20  ;;  %v153_v23 = vpop.f32.mrb[1].mxu0  ;;  %241 = vst [vmem:[%s559_s2 + $0x48] sm:$0xff] %v376_v21  ;;  %v193_v24 = vpop.f32.mrb[1].mxu1  ;;  %v282_v60 = vmul.f32 %v376_v21, %v376_v21 }
  0xdd   :  { %232 = vst [vmem:[%s559_s2] sm:$0xff] %v153_v23  ;;  %v249_v25 = vadd.f32 %v364_v20, %v153_v23  ;;  %v273_v26 = vmul.f32 %v153_v23, %v153_v23  ;;  %240 = vst [vmem:[%s559_s2 + $0x40] sm:$0xff] %v193_v24  ;;  %v281_v57 = vmul.f32 %v193_v24, %v193_v24 }
  0xdf   :  { %v289_v27 = vadd.f32 %v274_v22, %v273_v26  ;;  %v367_v28 = vpop.f32.mrb[2].mxu0  ;;  %v379_v29 = vpop.f32.mrb[2].mxu1 }
  0xe0   :  { %235 = vst [vmem:[%s559_s2 + $0x18] sm:$0xff] %v367_v28  ;;  %v163_v30 = vpop.f32.mrb[3].mxu0  ;;  %243 = vst [vmem:[%s559_s2 + $0x58] sm:$0xff] %v379_v29  ;;  %v203_v31 = vpop.f32.mrb[3].mxu1  ;;  %v276_v34 = vmul.f32 %v367_v28, %v367_v28  ;;  %v284_v2 = vmul.f32 %v379_v29, %v379_v29 }
  0xe1   :  { %234 = vst [vmem:[%s559_s2 + $0x10] sm:$0xff] %v163_v30  ;;  %v250_v32 = vadd.f32 %v249_v25, %v163_v30  ;;  %v275_v33 = vmul.f32 %v163_v30, %v163_v30  ;;  %242 = vst [vmem:[%s559_s2 + $0x50] sm:$0xff] %v203_v31  ;;  %v283_v63 = vmul.f32 %v203_v31, %v203_v31  ;;  %v272_v30 = vld [vmem:[%s558_s4] sm:$0x1] }
  0xe3   :  { %v290_v35 = vadd.f32 %v289_v27, %v275_v33  ;;  %v370_v36 = vpop.f32.mrb[4].mxu0  ;;  %v251_v37 = vadd.f32 %v367_v28, %v250_v32  ;;  %v382_v38 = vpop.f32.mrb[4].mxu1  ;;  %v248_v27 = vld [vmem:[%s557_s3] sm:$0x1] }
  0xe4   :  { %237 = vst [vmem:[%s559_s2 + $0x28] sm:$0xff] %v370_v36  ;;  %v173_v39 = vpop.f32.mrb[5].mxu0  ;;  %245 = vst [vmem:[%s559_s2 + $0x68] sm:$0xff] %v382_v38  ;;  %v213_v40 = vpop.f32.mrb[5].mxu1  ;;  %v278_v44 = vmul.f32 %v370_v36, %v370_v36  ;;  %v286_v8 = vmul.f32 %v382_v38, %v382_v38 }
  0xe5   :  { %236 = vst [vmem:[%s559_s2 + $0x20] sm:$0xff] %v173_v39  ;;  %v252_v41 = vadd.f32 %v251_v37, %v173_v39  ;;  %v277_v42 = vmul.f32 %v173_v39, %v173_v39  ;;  %v291_v43 = vadd.f32 %v290_v35, %v276_v34  ;;  %244 = vst [vmem:[%s559_s2 + $0x60] sm:$0xff] %v213_v40 }
  0xe6   :  { %v285_v5 = vmul.f32 %v213_v40, %v213_v40 }
  0xe7   :  { %v292_v45 = vadd.f32 %v291_v43, %v277_v42  ;;  %v373_v46 = vpop.f32.mrb[6].mxu0  ;;  %v253_v47 = vadd.f32 %v370_v36, %v252_v41  ;;  %v385_v48 = vpop.f32.mrb[6].mxu1 }
  0xe8   :  { %239 = vst [vmem:[%s559_s2 + $0x38] sm:$0xff] %v373_v46  ;;  %v183_v49 = vpop.f32.mrb[7].mxu0  ;;  %247 = vst [vmem:[%s559_s2 + $0x78] sm:$0xff] %v385_v48  ;;  %v223_v50 = vpop.f32.mrb[7].mxu1  ;;  %v280_v54 = vmul.f32 %v373_v46, %v373_v46  ;;  %v288_v14 = vmul.f32 %v385_v48, %v385_v48 }
  0xe9   :  { %238 = vst [vmem:[%s559_s2 + $0x30] sm:$0xff] %v183_v49  ;;  %v254_v51 = vadd.f32 %v253_v47, %v183_v49  ;;  %v279_v52 = vmul.f32 %v183_v49, %v183_v49  ;;  %v293_v53 = vadd.f32 %v292_v45, %v278_v44  ;;  %246 = vst [vmem:[%s559_s2 + $0x70] sm:$0xff] %v223_v50 }
  0xea   :  { %v287_v11 = vmul.f32 %v223_v50, %v223_v50 }
  0xeb   :  { %v255_v55 = vadd.f32 %v373_v46, %v254_v51  ;;  %v294_v56 = vadd.f32 %v293_v53, %v279_v52 }
  0xed   :  { %v295_v58 = vadd.f32 %v294_v56, %v280_v54  ;;  %v256_v59 = vadd.f32 %v255_v55, %v193_v24 }
  0xef   :  { %v296_v61 = vadd.f32 %v295_v58, %v281_v57  ;;  %v257_v62 = vadd.f32 %v376_v21, %v256_v59 }
  0xf1   :  { %v258_v0 = vadd.f32 %v257_v62, %v203_v31  ;;  %v297_v1 = vadd.f32 %v296_v61, %v282_v60 }
  0xf3   :  { %v298_v3 = vadd.f32 %v297_v1, %v283_v63  ;;  %v259_v4 = vadd.f32 %v379_v29, %v258_v0 }
  0xf5   :  { %v260_v6 = vadd.f32 %v259_v4, %v213_v40  ;;  %v299_v7 = vadd.f32 %v298_v3, %v284_v2 }
  0xf7   :  { %v300_v9 = vadd.f32 %v299_v7, %v285_v5  ;;  %v261_v10 = vadd.f32 %v382_v38, %v260_v6 }
  0xf9   :  { %v262_v12 = vadd.f32 %v261_v10, %v223_v50  ;;  %v301_v13 = vadd.f32 %v300_v9, %v286_v8 }
  0xfb   :  { %v263_v15 = vadd.f32 %v385_v48, %v262_v12  ;;  %v302_v16 = vadd.f32 %v301_v13, %v287_v11 }
  0xfd   :  { %v264_v17 = vrot.slane %v263_v15, 4  ;;  %v303_v18 = vadd.f32 %v302_v16, %v288_v14 }
  0xff   :  { %v265_v19 = vadd.f32 %v264_v17, %v263_v15  ;;  %v304_v20 = vrot.slane %v303_v18, 4 }
 0x101   :  { %v266_v21 = vrot.slane %v265_v19, 2  ;;  %v305_v22 = vadd.f32 %v304_v20, %v303_v18 }
 0x103   :  { %v267_v23 = vadd.f32 %v266_v21, %v265_v19  ;;  %v306_v24 = vrot.slane %v305_v22, 2 }
 0x105   :  { %v268_v25 = vrot.slane %v267_v23, 1  ;;  %v307_v26 = vadd.f32 %v306_v24, %v305_v22 }
 0x107   :  { %v269_v28 = vadd.f32 %v268_v25, %v267_v23  ;;  %v308_v29 = vrot.slane %v307_v26, 1 }
 0x109   :  { %v270_v31 = vadd.f32 %v269_v28, %v248_v27  ;;  %v309_v32 = vadd.f32 %v308_v29, %v307_v26 }
 0x10b   :  { %271 = vst [vmem:[%s557_s3] sm:$0x1] %v270_v31  ;;  %v310_v33 = vadd.f32 %v309_v32, %v272_v30 }
 0x10d   :  { %311 = vst [vmem:[%s558_s4] sm:$0x1] %v310_v33 }

// kernel: basic_resnet_forward.87
= control target key start
LH: loop header
LB: loop body
LE: loop exit
PB: predicated region body
PF: predicated region fallthrough
CT: control target
= control target key end

     0   :  { %vm86_vm0 = vcmask 1041408   ;;  %vm37_vm1 = vcmask 15360   ;;  %v390_v17 = vmov 0.0   ;;  %s549_s1 = inlined_call_operand.vmem [shape: f32[2,128], index: 1, kind: input, shape index: {}]   ;;  %s550_s0 = inlined_call_operand.vmem [shape: f32[128,2], index: 0, kind: input, shape index: {}]   ;;  %s551_s3 = inlined_call_operand.vmem [shape: f32[1,128], index: 3, kind: output, shape index: {1}]   ;;  %s552_s4 = inlined_call_operand.vmem [shape: f32[1,128], index: 4, kind: output, shape index: {2}]   ;;  %s553_s2 = inlined_call_operand.vmem [shape: f32[128,128], index: 2, kind: output, shape index: {0}]  }
   0x1   :  { %v36_v0 = vld [vmem:[%s549_s1] sm:$0x3]  ;;  %v21_v2 = vld [vmem:[%s550_s0 + $0x8] sm:$0xff]  ;;  %v22_v3 = vld [vmem:[%s550_s0 + $0x10] sm:$0xff]  ;;  %18 = vst [vmem:[%s551_s3] sm:$0x1] %v390_v17 }
   0x2   :  { %v20_v1 = vld [vmem:[%s550_s0] sm:$0xff]  ;;  %361 = vmatprep.subr.msk.mxu0 %vm86_vm0, %v36_v0  ;;  %387 = vmatprep.subr.msk.mxu1 %vm86_vm0, %v36_v0  ;;  %v29_v5 = vld [vmem:[%s550_s0 + $0x48] sm:$0xff]  ;;  %v30_v6 = vld [vmem:[%s550_s0 + $0x50] sm:$0xff]  ;;  %19 = vst [vmem:[%s552_s4] sm:$0x1] %v390_v17 }
   0x3   :  { %363 = vmatprep.mubr.msk.f32.mxu0 %vm37_vm1, %v20_v1  ;;  %362 = vmatpush3.msk.msra.mxu0 %vm86_vm0, %v36_v0  ;;  %v28_v4 = vld [vmem:[%s550_s0 + $0x40] sm:$0xff]  ;;  %v23_v7 = vld [vmem:[%s550_s0 + $0x18] sm:$0xff]  ;;  %v25_v11 = vld [vmem:[%s550_s0 + $0x28] sm:$0xff] }
   0x4   :  { %364 = vmatmul.mubr.msk.f32.vlgmr.msra.gmra.mrb[0].mxu0 %vm37_vm1, %v21_v2  ;;  %388 = vmatpush3.msk.msra.mxu1 %vm86_vm0, %v36_v0  ;;  %v24_v8 = vld [vmem:[%s550_s0 + $0x20] sm:$0xff]  ;;  %v31_v9 = vld [vmem:[%s550_s0 + $0x58] sm:$0xff]  ;;  %v26_v12 = vld [vmem:[%s550_s0 + $0x30] sm:$0xff] }
   0x5   :  { %366 = vmatprep.mubr.msk.f32.mxu0 %vm37_vm1, %v22_v3  ;;  %375 = vmatprep.mubr.msk.f32.mxu1 %vm37_vm1, %v28_v4  ;;  %v32_v10 = vld [vmem:[%s550_s0 + $0x60] sm:$0xff]  ;;  %v33_v13 = vld [vmem:[%s550_s0 + $0x68] sm:$0xff]  ;;  %v34_v14 = vld [vmem:[%s550_s0 + $0x70] sm:$0xff] }
   0x6   :  { %376 = vmatmul.mubr.msk.f32.vlgmr.msra.gmra.mrb[0].mxu1 %vm37_vm1, %v29_v5  ;;  %v27_v15 = vld [vmem:[%s550_s0 + $0x38] sm:$0xff] }
   0x7   :  { %378 = vmatprep.mubr.msk.f32.mxu1 %vm37_vm1, %v30_v6  ;;  %v35_v16 = vld [vmem:[%s550_s0 + $0x78] sm:$0xff] }
   0x8   :  { %367 = vmatmul.mubr.msk.f32.gmra.mrb[2].mxu0 %vm37_vm1, %v23_v7 }
   0x9   :  { %369 = vmatprep.mubr.msk.f32.mxu0 %vm37_vm1, %v24_v8 }
   0xa   :  { %379 = vmatmul.mubr.msk.f32.gmra.mrb[2].mxu1 %vm37_vm1, %v31_v9 }
   0xb   :  { %381 = vmatprep.mubr.msk.f32.mxu1 %vm37_vm1, %v32_v10 }
   0xc   :  { %370 = vmatmul.mubr.msk.f32.gmra.mrb[4].mxu0 %vm37_vm1, %v25_v11 }
   0xd   :  { %372 = vmatprep.mubr.msk.f32.mxu0 %vm37_vm1, %v26_v12 }
   0xe   :  { %382 = vmatmul.mubr.msk.f32.gmra.mrb[4].mxu1 %vm37_vm1, %v33_v13 }
   0xf   :  { %384 = vmatprep.mubr.msk.f32.mxu1 %vm37_vm1, %v34_v14 }
  0x10   :  { %373 = vmatmul.mubr.msk.f32.gmra.mrb[6].mxu0 %vm37_vm1, %v27_v15 }
  0x12   :  { %385 = vmatmul.mubr.msk.f32.gmra.mrb[6].mxu1 %vm37_vm1, %v35_v16 }
  0xd7   :  { %v365_v18 = vpop.f32.mrb[0].mxu0 }
  0xd8   :  { %236 = vst [vmem:[%s553_s2 + $0x8] sm:$0xff] %v365_v18  ;;  %v277_v19 = vmul.f32 %v365_v18, %v365_v18  ;;  %v156_v20 = vpop.f32.mrb[1].mxu0 }
  0xd9   :  { %235 = vst [vmem:[%s553_s2] sm:$0xff] %v156_v20  ;;  %v252_v21 = vadd.f32 %v365_v18, %v156_v20  ;;  %v276_v22 = vmul.f32 %v156_v20, %v156_v20  ;;  %v377_v23 = vpop.f32.mrb[0].mxu1 }
  0xda   :  { %244 = vst [vmem:[%s553_s2 + $0x48] sm:$0xff] %v377_v23  ;;  %v196_v24 = vpop.f32.mrb[1].mxu1  ;;  %v285_v58 = vmul.f32 %v377_v23, %v377_v23 }
  0xdb   :  { %v292_v25 = vadd.f32 %v277_v19, %v276_v22  ;;  %v368_v26 = vpop.f32.mrb[2].mxu0  ;;  %243 = vst [vmem:[%s553_s2 + $0x40] sm:$0xff] %v196_v24  ;;  %v284_v55 = vmul.f32 %v196_v24, %v196_v24 }
  0xdc   :  { %238 = vst [vmem:[%s553_s2 + $0x18] sm:$0xff] %v368_v26  ;;  %v166_v27 = vpop.f32.mrb[3].mxu0  ;;  %v279_v32 = vmul.f32 %v368_v26, %v368_v26 }
  0xdd   :  { %237 = vst [vmem:[%s553_s2 + $0x10] sm:$0xff] %v166_v27  ;;  %v253_v28 = vadd.f32 %v252_v21, %v166_v27  ;;  %v278_v29 = vmul.f32 %v166_v27, %v166_v27  ;;  %v380_v30 = vpop.f32.mrb[2].mxu1 }
  0xde   :  { %246 = vst [vmem:[%s553_s2 + $0x58] sm:$0xff] %v380_v30  ;;  %v206_v31 = vpop.f32.mrb[3].mxu1  ;;  %v287_v0 = vmul.f32 %v380_v30, %v380_v30 }
  0xdf   :  { %v293_v33 = vadd.f32 %v292_v25, %v278_v29  ;;  %v371_v34 = vpop.f32.mrb[4].mxu0  ;;  %v254_v35 = vadd.f32 %v368_v26, %v253_v28  ;;  %245 = vst [vmem:[%s553_s2 + $0x50] sm:$0xff] %v206_v31  ;;  %v286_v61 = vmul.f32 %v206_v31, %v206_v31  ;;  %v251_v25 = vld [vmem:[%s551_s3] sm:$0x1] }
  0xe0   :  { %240 = vst [vmem:[%s553_s2 + $0x28] sm:$0xff] %v371_v34  ;;  %v176_v36 = vpop.f32.mrb[5].mxu0  ;;  %v281_v42 = vmul.f32 %v371_v34, %v371_v34  ;;  %v275_v28 = vld [vmem:[%s552_s4] sm:$0x1] }
  0xe1   :  { %239 = vst [vmem:[%s553_s2 + $0x20] sm:$0xff] %v176_v36  ;;  %v255_v37 = vadd.f32 %v254_v35, %v176_v36  ;;  %v280_v38 = vmul.f32 %v176_v36, %v176_v36  ;;  %v294_v39 = vadd.f32 %v293_v33, %v279_v32  ;;  %v383_v40 = vpop.f32.mrb[4].mxu1 }
  0xe2   :  { %248 = vst [vmem:[%s553_s2 + $0x68] sm:$0xff] %v383_v40  ;;  %v216_v41 = vpop.f32.mrb[5].mxu1  ;;  %v289_v6 = vmul.f32 %v383_v40, %v383_v40 }
  0xe3   :  { %v295_v43 = vadd.f32 %v294_v39, %v280_v38  ;;  %v374_v44 = vpop.f32.mrb[6].mxu0  ;;  %v256_v45 = vadd.f32 %v371_v34, %v255_v37  ;;  %247 = vst [vmem:[%s553_s2 + $0x60] sm:$0xff] %v216_v41  ;;  %v288_v3 = vmul.f32 %v216_v41, %v216_v41 }
  0xe4   :  { %242 = vst [vmem:[%s553_s2 + $0x38] sm:$0xff] %v374_v44  ;;  %v186_v46 = vpop.f32.mrb[7].mxu0  ;;  %v283_v52 = vmul.f32 %v374_v44, %v374_v44 }
  0xe5   :  { %241 = vst [vmem:[%s553_s2 + $0x30] sm:$0xff] %v186_v46  ;;  %v257_v47 = vadd.f32 %v256_v45, %v186_v46  ;;  %v282_v48 = vmul.f32 %v186_v46, %v186_v46  ;;  %v296_v49 = vadd.f32 %v295_v43, %v281_v42  ;;  %v386_v50 = vpop.f32.mrb[6].mxu1 }
  0xe6   :  { %250 = vst [vmem:[%s553_s2 + $0x78] sm:$0xff] %v386_v50  ;;  %v226_v51 = vpop.f32.mrb[7].mxu1  ;;  %v291_v12 = vmul.f32 %v386_v50, %v386_v50 }
  0xe7   :  { %v258_v53 = vadd.f32 %v374_v44, %v257_v47  ;;  %v297_v54 = vadd.f32 %v296_v49, %v282_v48  ;;  %249 = vst [vmem:[%s553_s2 + $0x70] sm:$0xff] %v226_v51  ;;  %v290_v9 = vmul.f32 %v226_v51, %v226_v51 }
  0xe9   :  { %v298_v56 = vadd.f32 %v297_v54, %v283_v52  ;;  %v259_v57 = vadd.f32 %v258_v53, %v196_v24 }
  0xeb   :  { %v299_v59 = vadd.f32 %v298_v56, %v284_v55  ;;  %v260_v60 = vadd.f32 %v377_v23, %v259_v57 }
  0xed   :  { %v261_v62 = vadd.f32 %v260_v60, %v206_v31  ;;  %v300_v63 = vadd.f32 %v299_v59, %v285_v58 }
  0xef   :  { %v301_v1 = vadd.f32 %v300_v63, %v286_v61  ;;  %v262_v2 = vadd.f32 %v380_v30, %v261_v62 }
  0xf1   :  { %v263_v4 = vadd.f32 %v262_v2, %v216_v41  ;;  %v302_v5 = vadd.f32 %v301_v1, %v287_v0 }
  0xf3   :  { %v303_v7 = vadd.f32 %v302_v5, %v288_v3  ;;  %v264_v8 = vadd.f32 %v383_v40, %v263_v4 }
  0xf5   :  { %v265_v10 = vadd.f32 %v264_v8, %v226_v51  ;;  %v304_v11 = vadd.f32 %v303_v7, %v289_v6 }
  0xf7   :  { %v266_v13 = vadd.f32 %v386_v50, %v265_v10  ;;  %v305_v14 = vadd.f32 %v304_v11, %v290_v9 }
  0xf9   :  { %v267_v15 = vrot.slane %v266_v13, 4  ;;  %v306_v16 = vadd.f32 %v305_v14, %v291_v12 }
  0xfb   :  { %v268_v17 = vadd.f32 %v267_v15, %v266_v13  ;;  %v307_v18 = vrot.slane %v306_v16, 4 }
  0xfd   :  { %v269_v19 = vrot.slane %v268_v17, 2  ;;  %v308_v20 = vadd.f32 %v307_v18, %v306_v16 }
  0xff   :  { %v270_v21 = vadd.f32 %v269_v19, %v268_v17  ;;  %v309_v22 = vrot.slane %v308_v20, 2 }
 0x101   :  { %v271_v23 = vrot.slane %v270_v21, 1  ;;  %v310_v24 = vadd.f32 %v309_v22, %v308_v20 }
 0x103   :  { %v272_v26 = vadd.f32 %v271_v23, %v270_v21  ;;  %v311_v27 = vrot.slane %v310_v24, 1 }
 0x105   :  { %v273_v29 = vadd.f32 %v272_v26, %v251_v25  ;;  %v312_v30 = vadd.f32 %v311_v27, %v310_v24 }
 0x107   :  { %274 = vst [vmem:[%s551_s3] sm:$0x1] %v273_v29  ;;  %v313_v31 = vadd.f32 %v312_v30, %v275_v28 }
 0x109   :  { %314 = vst [vmem:[%s552_s4] sm:$0x1] %v313_v31 }

// kernel: basic_resnet_forward.88
= control target key start
LH: loop header
LB: loop body
LE: loop exit
PB: predicated region body
PF: predicated region fallthrough
CT: control target
= control target key end

     0   :  { %v61_v4 = vlaneseq  ;;  %s783_s2 = inlined_call_operand.vmem [shape: f32[1,128], index: 2, kind: input, shape index: {}]   ;;  %s784_s3 = inlined_call_operand.vmem [shape: f32[1,128], index: 3, kind: input, shape index: {}]   ;;  %s785_s6 = inlined_call_operand.vmem [shape: f32[1,128], index: 6, kind: input, shape index: {}]   ;;  %s786_s7 = inlined_call_operand.vmem [shape: f32[1,128], index: 7, kind: input, shape index: {}]   ;;  %s787_s0 = inlined_call_operand.vmem [shape: f32[128,128], index: 0, kind: input, shape index: {}]   ;;  %s788_s1 = inlined_call_operand.vmem [shape: f32[128,128], index: 1, kind: input, shape index: {}]   ;;  %s789_s4 = inlined_call_operand.vmem [shape: f32[1,128], index: 4, kind: input, shape index: {}]   ;;  %s790_s8 = inlined_call_operand.vmem [shape: f32[1,128], index: 8, kind: input, shape index: {}]   ;;  %s791_s5 = inlined_call_operand.vmem [shape: f32[1,128], index: 5, kind: input, shape index: {}]   ;;  %s792_s9 = inlined_call_operand.vmem [shape: f32[1,128], index: 9, kind: input, shape index: {}]   ;;  %s793_s10 = inlined_call_operand.vmem [shape: f32[128,128], index: 10, kind: output, shape index: {}]  }
   0x1   :  { %v51_v0 = vld [vmem:[%s783_s2] sm:$0x1]  ;;  %v369_v23 = vld [vmem:[%s787_s0 + $0x8] sm:$0xff]  ;;  %v379_v25 = vld [vmem:[%s787_s0 + $0x10] sm:$0xff] }
   0x2   :  { %v52_v1 = vld [vmem:[%s784_s3] sm:$0x1]  ;;  %v55_v2 = vmul.f32 0.0078125, %v51_v0  ;;  %v62_v11 = vshrl.u32 %v61_v4, 7  ;;  %v374_v24 = vld [vmem:[%s788_s1 + $0x8] sm:$0xff]  ;;  %v384_v26 = vld [vmem:[%s788_s1 + $0x10] sm:$0xff] }
   0x3   :  { %v56_v3 = vmul.f32 0.0078125, %v52_v1  ;;  %v145_v5 = vld [vmem:[%s785_s6] sm:$0x1]  ;;  %v389_v27 = vld [vmem:[%s787_s0 + $0x18] sm:$0xff]  ;;  %v409_v31 = vld [vmem:[%s787_s0 + $0x28] sm:$0xff] }
   0x4   :  { %v146_v6 = vld [vmem:[%s786_s7] sm:$0x1]  ;;  %v57_v7 = vmul.f32 %v55_v2, %v55_v2  ;;  %v149_v8 = vmul.f32 0.0078125, %v145_v5  ;;  %v348_v15 = vsub.s32 0, %v62_v11  ;;  %v394_v28 = vld [vmem:[%s788_s1 + $0x18] sm:$0xff]  ;;  %v414_v32 = vld [vmem:[%s788_s1 + $0x28] sm:$0xff] }
   0x5   :  { %v150_v9 = vmul.f32 0.0078125, %v146_v6  ;;  %v353_v19 = vld [vmem:[%s787_s0] sm:$0xff]  ;;  %v419_v33 = vld [vmem:[%s787_s0 + $0x30] sm:$0xff]  ;;  %v438_v39 = vld [vmem:[%s787_s0 + $0x38] sm:$0xff] }
   0x6   :  { %v58_v10 = vsub.f32 %v56_v3, %v57_v7  ;;  %v151_v12 = vmul.f32 %v149_v8, %v149_v8  ;;  %v358_v20 = vld [vmem:[%s788_s1] sm:$0xff]  ;;  %v361_v21 = vrot.slane %v55_v2, %v348_v15  ;;  %v364_v22 = vrot.slane %v149_v8, %v348_v15  ;;  %v424_v34 = vld [vmem:[%s788_s1 + $0x30] sm:$0xff]  ;;  %v443_v40 = vld [vmem:[%s788_s1 + $0x38] sm:$0xff] }
   0x7   :  { %v399_v29 = vld [vmem:[%s787_s0 + $0x20] sm:$0xff]  ;;  %v466_v47 = vld [vmem:[%s787_s0 + $0x48] sm:$0xff]  ;;  %v487_v54 = vld [vmem:[%s787_s0 + $0x50] sm:$0xff] }
   0x8   :  { %v59_v13 = vmax.f32 %v58_v10, 0.0  ;;  %v152_v14 = vsub.f32 %v150_v9, %v151_v12  ;;  %v404_v30 = vld [vmem:[%s788_s1 + $0x20] sm:$0xff]  ;;  %v66_v36 = vsub.f32 %v353_v19, %v361_v21  ;;  %v160_v37 = vsub.f32 %v358_v20, %v364_v22  ;;  %v471_v48 = vld [vmem:[%s788_s1 + $0x48] sm:$0xff]  ;;  %v492_v55 = vld [vmem:[%s788_s1 + $0x50] sm:$0xff] }
   0x9   :  { %v53_v35 = vld [vmem:[%s789_s4] sm:$0x1]  ;;  %v67_v38 = vsub.f32 %v369_v23, %v361_v21  ;;  %v161_v42 = vsub.f32 %v374_v24, %v364_v22  ;;  %v68_v43 = vsub.f32 %v379_v25, %v361_v21  ;;  %v162_v44 = vsub.f32 %v384_v26, %v364_v22  ;;  %v497_v56 = vld [vmem:[%s787_s0 + $0x58] sm:$0xff]  ;;  %v533_v5 = vld [vmem:[%s787_s0 + $0x68] sm:$0xff] }
   0xa   :  { %v82_v16 = vadd.f32 1e-05, %v59_v13  ;;  %v153_v17 = vmax.f32 %v152_v14, 0.0  ;;  %v448_v41 = vld [vmem:[%s787_s0 + $0x40] sm:$0xff]  ;;  %v69_v45 = vsub.f32 %v389_v27, %v361_v21  ;;  %v163_v50 = vsub.f32 %v394_v28, %v364_v22  ;;  %v510_v61 = vld [vmem:[%s788_s1 + $0x58] sm:$0xff]  ;;  %v538_v6 = vld [vmem:[%s788_s1 + $0x68] sm:$0xff] }
   0xb   :  { %v461_v46 = vld [vmem:[%s788_s1 + $0x40] sm:$0xff]  ;;  %v70_v51 = vsub.f32 %v399_v29, %v361_v21  ;;  %v164_v52 = vsub.f32 %v404_v30, %v364_v22  ;;  %v71_v53 = vsub.f32 %v409_v31, %v361_v21  ;;  %v165_v57 = vsub.f32 %v414_v32, %v364_v22  ;;  %v543_v7 = vld [vmem:[%s787_s0 + $0x70] sm:$0xff]  ;;  %v559_v13 = vld [vmem:[%s787_s0 + $0x78] sm:$0xff] }
   0xc   :  { %277 = vrsqrt.f32 %v82_v16  ;;  %v176_v18 = vadd.f32 1e-05, %v153_v17  ;;  %v147_v49 = vld [vmem:[%s790_s8] sm:$0x1]  ;;  %v72_v58 = vsub.f32 %v419_v33, %v361_v21  ;;  %v166_v59 = vsub.f32 %v424_v34, %v364_v22  ;;  %v554_v12 = vld [vmem:[%s788_s1 + $0x70] sm:$0xff]  ;;  %v564_v14 = vld [vmem:[%s788_s1 + $0x78] sm:$0xff] }
   0xd   :  { %v73_v60 = vsub.f32 %v438_v39, %v361_v21  ;;  %v515_v62 = vld [vmem:[%s787_s0 + $0x60] sm:$0xff]  ;;  %v167_v1 = vsub.f32 %v443_v40, %v364_v22  ;;  %v74_v2 = vsub.f32 %v448_v41, %v361_v21  ;;  %v168_v3 = vsub.f32 %v461_v46, %v364_v22 }
   0xe   :  { %279 = vrsqrt.f32 %v176_v18  ;;  %v520_v63 = vld [vmem:[%s788_s1 + $0x60] sm:$0xff]  ;;  %v75_v4 = vsub.f32 %v466_v47, %v361_v21  ;;  %v169_v9 = vsub.f32 %v471_v48, %v364_v22  ;;  %v76_v10 = vsub.f32 %v487_v54, %v361_v21 }
   0xf   :  { %v170_v11 = vsub.f32 %v492_v55, %v364_v22  ;;  %v77_v17 = vsub.f32 %v497_v56, %v361_v21  ;;  %v171_v18 = vsub.f32 %v510_v61, %v364_v22  ;;  %v78_v19 = vsub.f32 %v515_v62, %v361_v21  ;;  %v584_v31 = vld [vmem:[%s791_s5] ss:$0 sm:$0xff] }
  0x10   :  { %v172_v23 = vsub.f32 %v520_v63, %v364_v22  ;;  %v79_v28 = vsub.f32 %v533_v5, %v361_v21  ;;  %v603_v32 = vld [vmem:[%s792_s9] ss:$0 sm:$0xff]  ;;  %v796_v5 = vsub.f32 %v554_v12, %v364_v22 }
  0x16   :  { %v278_v0 = vpop.eup %277 }
  0x17   :  { %v84_v8 = vmul.f32 %v278_v0, %v53_v35 }
  0x18   :  { %v280_v16 = vpop.eup %279 }
  0x19   :  { %v575_v25 = vrot.slane %v84_v8, %v348_v15  ;;  %v178_v27 = vmul.f32 %v280_v16, %v147_v49 }
  0x1b   :  { %v91_v0 = vmul.f32 %v575_v25, %v66_v36  ;;  %v596_v8 = vrot.slane %v178_v27, %v348_v15  ;;  %v92_v16 = vmul.f32 %v575_v25, %v67_v38  ;;  %v93_v29 = vmul.f32 %v575_v25, %v68_v43 }
  0x1c   :  { %v94_v33 = vmul.f32 %v575_v25, %v69_v45  ;;  %v95_v35 = vmul.f32 %v575_v25, %v70_v51  ;;  %v96_v49 = vmul.f32 %v575_v25, %v71_v53  ;;  %v97_v36 = vmul.f32 %v575_v25, %v72_v58 }
  0x1d   :  { %v113_v15 = vadd.f32 %v584_v31, %v91_v0  ;;  %v185_v38 = vmul.f32 %v596_v8, %v160_v37  ;;  %v114_v43 = vadd.f32 %v584_v31, %v92_v16  ;;  %v186_v45 = vmul.f32 %v596_v8, %v161_v42 }
  0x1e   :  { %v115_v51 = vadd.f32 %v584_v31, %v93_v29  ;;  %v187_v53 = vmul.f32 %v596_v8, %v162_v44  ;;  %v116_v58 = vadd.f32 %v584_v31, %v94_v33  ;;  %v188_v20 = vmul.f32 %v596_v8, %v163_v50 }
  0x1f   :  { %v207_v37 = vadd.f32 %v603_v32, %v185_v38  ;;  %v208_v27 = vadd.f32 %v603_v32, %v186_v45  ;;  %v117_v0 = vadd.f32 %v584_v31, %v95_v35  ;;  %v189_v24 = vmul.f32 %v596_v8, %v164_v52 }
  0x20   :  { %v209_v42 = vadd.f32 %v603_v32, %v187_v53  ;;  %v210_v26 = vadd.f32 %v603_v32, %v188_v20  ;;  %v118_v44 = vadd.f32 %v584_v31, %v96_v49  ;;  %v190_v29 = vmul.f32 %v596_v8, %v165_v57 }
  0x21   :  { %v223_v50 = vadd.f32 %v207_v37, %v113_v15  ;;  %v224_v33 = vadd.f32 %v208_v27, %v114_v43  ;;  %v211_v16 = vadd.f32 %v603_v32, %v189_v24  ;;  %v119_v38 = vadd.f32 %v584_v31, %v97_v36 }
  0x22   :  { %v225_v35 = vadd.f32 %v209_v42, %v115_v51  ;;  %v226_v45 = vadd.f32 %v210_v26, %v116_v58  ;;  %v212_v30 = vadd.f32 %v603_v32, %v190_v29  ;;  %v191_v52 = vmul.f32 %v596_v8, %v166_v59 }
  0x23   :  { %v239_v53 = vmax.f32 %v223_v50, 0.0  ;;  %v240_v20 = vmax.f32 %v224_v33, 0.0  ;;  %v227_v49 = vadd.f32 %v211_v16, %v117_v0  ;;  %v98_v57 = vmul.f32 %v575_v25, %v73_v60 }
  0x24   :  { %v241_v15 = vmax.f32 %v225_v35, 0.0  ;;  %v242_v43 = vmax.f32 %v226_v45, 0.0  ;;  %v228_v36 = vadd.f32 %v212_v30, %v118_v44  ;;  %v213_v51 = vadd.f32 %v603_v32, %v191_v52 }
  0x25   :  { %255 = vst [vmem:[%s793_s10] sm:$0xff] %v239_v53  ;;  %256 = vst [vmem:[%s793_s10 + $0x8] sm:$0xff] %v240_v20  ;;  %v243_v34 = vmax.f32 %v227_v49, 0.0  ;;  %v120_v59 = vadd.f32 %v584_v31, %v98_v57  ;;  %v192_v39 = vmul.f32 %v596_v8, %v167_v1  ;;  %v99_v60 = vmul.f32 %v575_v25, %v74_v2 }
  0x26   :  { %257 = vst [vmem:[%s793_s10 + $0x10] sm:$0xff] %v241_v15  ;;  %258 = vst [vmem:[%s793_s10 + $0x18] sm:$0xff] %v242_v43  ;;  %v244_v58 = vmax.f32 %v228_v36, 0.0  ;;  %v229_v37 = vadd.f32 %v213_v51, %v119_v38  ;;  %v193_v40 = vmul.f32 %v596_v8, %v168_v3  ;;  %v100_v41 = vmul.f32 %v575_v25, %v75_v4 }
  0x27   :  { %259 = vst [vmem:[%s793_s10 + $0x20] sm:$0xff] %v243_v34  ;;  %v214_v1 = vadd.f32 %v603_v32, %v192_v39  ;;  %v121_v2 = vadd.f32 %v584_v31, %v99_v60  ;;  %v194_v46 = vmul.f32 %v596_v8, %v169_v9  ;;  %v101_v47 = vmul.f32 %v575_v25, %v76_v10 }
  0x28   :  { %260 = vst [vmem:[%s793_s10 + $0x28] sm:$0xff] %v244_v58  ;;  %v245_v3 = vmax.f32 %v229_v37, 0.0  ;;  %v215_v4 = vadd.f32 %v603_v32, %v193_v40  ;;  %v122_v27 = vadd.f32 %v584_v31, %v100_v41  ;;  %v195_v48 = vmul.f32 %v596_v8, %v170_v11 }
  0x29   :  { %v230_v9 = vadd.f32 %v214_v1, %v120_v59  ;;  %v216_v0 = vadd.f32 %v603_v32, %v194_v46  ;;  %v123_v54 = vadd.f32 %v584_v31, %v101_v47  ;;  %v102_v10 = vmul.f32 %v575_v25, %v77_v17 }
  0x2a   :  { %261 = vst [vmem:[%s793_s10 + $0x30] sm:$0xff] %v245_v3  ;;  %v231_v24 = vadd.f32 %v215_v4, %v121_v2  ;;  %v217_v42 = vadd.f32 %v603_v32, %v195_v48  ;;  %v196_v55 = vmul.f32 %v596_v8, %v171_v18  ;;  %v103_v11 = vmul.f32 %v575_v25, %v78_v19 }
  0x2b   :  { %v246_v56 = vmax.f32 %v230_v9, 0.0  ;;  %v232_v26 = vadd.f32 %v216_v0, %v122_v27  ;;  %v124_v17 = vadd.f32 %v584_v31, %v102_v10  ;;  %v197_v44 = vmul.f32 %v596_v8, %v172_v23 }
  0x2c   :  { %v247_v29 = vmax.f32 %v231_v24, 0.0  ;;  %v233_v50 = vadd.f32 %v217_v42, %v123_v54  ;;  %v218_v61 = vadd.f32 %v603_v32, %v196_v55  ;;  %v125_v18 = vadd.f32 %v584_v31, %v103_v11 }
  0x2d   :  { %262 = vst [vmem:[%s793_s10 + $0x38] sm:$0xff] %v246_v56  ;;  %v248_v62 = vmax.f32 %v232_v26, 0.0  ;;  %v219_v19 = vadd.f32 %v603_v32, %v197_v44  ;;  %v104_v63 = vmul.f32 %v575_v25, %v79_v28  ;;  %v794_v23 = vsub.f32 %v538_v6, %v364_v22 }
  0x2e   :  { %263 = vst [vmem:[%s793_s10 + $0x40] sm:$0xff] %v247_v29  ;;  %v249_v16 = vmax.f32 %v233_v50, 0.0  ;;  %v234_v38 = vadd.f32 %v218_v61, %v124_v17  ;;  %v795_v35 = vsub.f32 %v543_v7, %v361_v21  ;;  %v199_v28 = vmul.f32 %v596_v8, %v796_v5 }
  0x2f   :  { %v198_v33 = vmul.f32 %v596_v8, %v794_v23  ;;  %264 = vst [vmem:[%s793_s10 + $0x48] sm:$0xff] %v248_v62  ;;  %v235_v6 = vadd.f32 %v219_v19, %v125_v18  ;;  %v126_v30 = vadd.f32 %v584_v31, %v104_v63  ;;  %v797_v53 = vsub.f32 %v559_v13, %v361_v21 }
  0x30   :  { %v105_v45 = vmul.f32 %v575_v25, %v795_v35  ;;  %265 = vst [vmem:[%s793_s10 + $0x50] sm:$0xff] %v249_v16  ;;  %v250_v12 = vmax.f32 %v234_v38, 0.0  ;;  %v221_v49 = vadd.f32 %v603_v32, %v199_v28  ;;  %v798_v57 = vsub.f32 %v564_v14, %v364_v22 }
  0x31   :  { %v220_v52 = vadd.f32 %v603_v32, %v198_v33  ;;  %v106_v7 = vmul.f32 %v575_v25, %v797_v53  ;;  %v251_v43 = vmax.f32 %v235_v6, 0.0 }
  0x32   :  { %v127_v20 = vadd.f32 %v584_v31, %v105_v45  ;;  %v200_v15 = vmul.f32 %v596_v8, %v798_v57  ;;  %266 = vst [vmem:[%s793_s10 + $0x58] sm:$0xff] %v250_v12 }
  0x33   :  { %v236_v36 = vadd.f32 %v220_v52, %v126_v30  ;;  %v128_v21 = vadd.f32 %v584_v31, %v106_v7  ;;  %267 = vst [vmem:[%s793_s10 + $0x60] sm:$0xff] %v251_v43 }
  0x34   :  { %v237_v13 = vadd.f32 %v221_v49, %v127_v20  ;;  %v222_v25 = vadd.f32 %v603_v32, %v200_v15 }
  0x35   :  { %v252_v51 = vmax.f32 %v236_v36, 0.0 }
  0x36   :  { %v253_v34 = vmax.f32 %v237_v13, 0.0  ;;  %v238_v22 = vadd.f32 %v222_v25, %v128_v21 }
  0x37   :  { %268 = vst [vmem:[%s793_s10 + $0x68] sm:$0xff] %v252_v51 }
  0x38   :  { %269 = vst [vmem:[%s793_s10 + $0x70] sm:$0xff] %v253_v34  ;;  %v254_v14 = vmax.f32 %v238_v22, 0.0 }
  0x3a   :  { %270 = vst [vmem:[%s793_s10 + $0x78] sm:$0xff] %v254_v14 }

// kernel: basic_resnet_forward.89
= control target key start
LH: loop header
LB: loop body
LE: loop exit
PB: predicated region body
PF: predicated region fallthrough
CT: control target
= control target key end

     0   :  { %vm40_vm0 = vcmask 261120   ;;  %v407_v22 = vmov 0.0   ;;  %s575_s1 = inlined_call_operand.vmem [shape: f32[32,128], index: 1, kind: input, shape index: {}]   ;;  %s576_s0 = inlined_call_operand.vmem [shape: f32[128,32], index: 0, kind: input, shape index: {}]   ;;  %s577_s3 = inlined_call_operand.vmem [shape: f32[1,128], index: 3, kind: output, shape index: {1}]   ;;  %s578_s4 = inlined_call_operand.vmem [shape: f32[1,128], index: 4, kind: output, shape index: {2}]   ;;  %s579_s2 = inlined_call_operand.vmem [shape: f32[128,128], index: 2, kind: output, shape index: {0}]  }
   0x1   :  { %v36_v0 = vld [vmem:[%s575_s1] sm:$0xff]  ;;  %v37_v1 = vld [vmem:[%s575_s1 + $0x8] sm:$0xff]  ;;  %v38_v2 = vld [vmem:[%s575_s1 + $0x10] sm:$0xff]  ;;  %18 = vst [vmem:[%s577_s3] sm:$0x1] %v407_v22 }
   0x2   :  { %v394_v3 = vpack.c.bf16 %v37_v1, %v36_v0  ;;  %v39_v4 = vld [vmem:[%s575_s1 + $0x18] sm:$0xff]  ;;  %v20_v5 = vld [vmem:[%s576_s0] sm:$0xff]  ;;  %v21_v8 = vld [vmem:[%s576_s0 + $0x8] sm:$0xff]  ;;  %19 = vst [vmem:[%s578_s4] sm:$0x1] %v407_v22 }
   0x3   :  { %v398_v6 = vpack.c.bf16 %v39_v4, %v38_v2  ;;  %370 = vmatprep.mubr.msk.f32.mxu0 %vm40_vm0, %v20_v5  ;;  %v28_v7 = vld [vmem:[%s576_s0 + $0x40] sm:$0xff]  ;;  %v29_v9 = vld [vmem:[%s576_s0 + $0x48] sm:$0xff]  ;;  %v22_v10 = vld [vmem:[%s576_s0 + $0x10] sm:$0xff] }
   0x4   :  { %395 = vmatprep.subr.bf16.mxu0 %v394_v3  ;;  %402 = vmatprep.subr.bf16.mxu1 %v394_v3  ;;  %v30_v11 = vld [vmem:[%s576_s0 + $0x50] sm:$0xff]  ;;  %v23_v12 = vld [vmem:[%s576_s0 + $0x18] sm:$0xff]  ;;  %v24_v14 = vld [vmem:[%s576_s0 + $0x20] sm:$0xff] }
   0x5   :  { %397 = vmatpush3.bf16.msra.mxu0 %v394_v3  ;;  %404 = vmatpush3.bf16.msra.mxu1 %v394_v3  ;;  %v31_v13 = vld [vmem:[%s576_s0 + $0x58] sm:$0xff]  ;;  %v32_v15 = vld [vmem:[%s576_s0 + $0x60] sm:$0xff]  ;;  %v25_v16 = vld [vmem:[%s576_s0 + $0x28] sm:$0xff] }
   0x6   :  { %399 = vmatprep.subr.bf16.mxu0 %v398_v6  ;;  %403 = vmatprep.subr.bf16.mxu1 %v398_v6  ;;  %v33_v17 = vld [vmem:[%s576_s0 + $0x68] sm:$0xff]  ;;  %v26_v18 = vld [vmem:[%s576_s0 + $0x30] sm:$0xff]  ;;  %v27_v20 = vld [vmem:[%s576_s0 + $0x38] sm:$0xff] }
   0x7   :  { %382 = vmatprep.mubr.msk.f32.mxu1 %vm40_vm0, %v28_v7  ;;  %v34_v19 = vld [vmem:[%s576_s0 + $0x70] sm:$0xff]  ;;  %v35_v21 = vld [vmem:[%s576_s0 + $0x78] sm:$0xff] }
   0x9   :  { %401 = vmatpush3.bf16.msra.mxu0 %v398_v6  ;;  %405 = vmatpush3.bf16.msra.mxu1 %v398_v6 }
   0xc   :  { %371 = vmatmul.mubr.msk.f32.vlgmr.msra.gmra.mrb[0].mxu0 %vm40_vm0, %v21_v8  ;;  %383 = vmatmul.mubr.msk.f32.vlgmr.msra.gmra.mrb[0].mxu1 %vm40_vm0, %v29_v9 }
   0xd   :  { %373 = vmatprep.mubr.msk.f32.mxu0 %vm40_vm0, %v22_v10  ;;  %385 = vmatprep.mubr.msk.f32.mxu1 %vm40_vm0, %v30_v11 }
  0x10   :  { %374 = vmatmul.mubr.msk.f32.gmra.mrb[2].mxu0 %vm40_vm0, %v23_v12  ;;  %386 = vmatmul.mubr.msk.f32.gmra.mrb[2].mxu1 %vm40_vm0, %v31_v13 }
  0x11   :  { %376 = vmatprep.mubr.msk.f32.mxu0 %vm40_vm0, %v24_v14  ;;  %388 = vmatprep.mubr.msk.f32.mxu1 %vm40_vm0, %v32_v15 }
  0x14   :  { %377 = vmatmul.mubr.msk.f32.gmra.mrb[4].mxu0 %vm40_vm0, %v25_v16  ;;  %389 = vmatmul.mubr.msk.f32.gmra.mrb[4].mxu1 %vm40_vm0, %v33_v17 }
  0x15   :  { %379 = vmatprep.mubr.msk.f32.mxu0 %vm40_vm0, %v26_v18  ;;  %391 = vmatprep.mubr.msk.f32.mxu1 %vm40_vm0, %v34_v19 }
  0x18   :  { %380 = vmatmul.mubr.msk.f32.gmra.mrb[6].mxu0 %vm40_vm0, %v27_v20  ;;  %392 = vmatmul.mubr.msk.f32.gmra.mrb[6].mxu1 %vm40_vm0, %v35_v21 }
  0xdf   :  { %v372_v23 = vpop.f32.mrb[0].mxu0  ;;  %v384_v24 = vpop.f32.mrb[0].mxu1 }
  0xe0   :  { %235 = vst [vmem:[%s579_s2 + $0x8] sm:$0xff] %v372_v23  ;;  %v276_v25 = vmul.f32 %v372_v23, %v372_v23  ;;  %v155_v26 = vpop.f32.mrb[1].mxu0  ;;  %243 = vst [vmem:[%s579_s2 + $0x48] sm:$0xff] %v384_v24  ;;  %v195_v27 = vpop.f32.mrb[1].mxu1  ;;  %v284_v63 = vmul.f32 %v384_v24, %v384_v24 }
  0xe1   :  { %234 = vst [vmem:[%s579_s2] sm:$0xff] %v155_v26  ;;  %v251_v28 = vadd.f32 %v372_v23, %v155_v26  ;;  %v275_v29 = vmul.f32 %v155_v26, %v155_v26  ;;  %242 = vst [vmem:[%s579_s2 + $0x40] sm:$0xff] %v195_v27  ;;  %v283_v60 = vmul.f32 %v195_v27, %v195_v27 }
  0xe3   :  { %v291_v30 = vadd.f32 %v276_v25, %v275_v29  ;;  %v375_v31 = vpop.f32.mrb[2].mxu0  ;;  %v387_v32 = vpop.f32.mrb[2].mxu1 }
  0xe4   :  { %237 = vst [vmem:[%s579_s2 + $0x18] sm:$0xff] %v375_v31  ;;  %v165_v33 = vpop.f32.mrb[3].mxu0  ;;  %245 = vst [vmem:[%s579_s2 + $0x58] sm:$0xff] %v387_v32  ;;  %v205_v34 = vpop.f32.mrb[3].mxu1  ;;  %v278_v37 = vmul.f32 %v375_v31, %v375_v31  ;;  %v286_v5 = vmul.f32 %v387_v32, %v387_v32 }
  0xe5   :  { %236 = vst [vmem:[%s579_s2 + $0x10] sm:$0xff] %v165_v33  ;;  %v252_v35 = vadd.f32 %v251_v28, %v165_v33  ;;  %v277_v36 = vmul.f32 %v165_v33, %v165_v33  ;;  %244 = vst [vmem:[%s579_s2 + $0x50] sm:$0xff] %v205_v34  ;;  %v285_v2 = vmul.f32 %v205_v34, %v205_v34  ;;  %v274_v33 = vld [vmem:[%s578_s4] sm:$0x1] }
  0xe7   :  { %v292_v38 = vadd.f32 %v291_v30, %v277_v36  ;;  %v378_v39 = vpop.f32.mrb[4].mxu0  ;;  %v253_v40 = vadd.f32 %v375_v31, %v252_v35  ;;  %v390_v41 = vpop.f32.mrb[4].mxu1  ;;  %v250_v30 = vld [vmem:[%s577_s3] sm:$0x1] }
  0xe8   :  { %239 = vst [vmem:[%s579_s2 + $0x28] sm:$0xff] %v378_v39  ;;  %v175_v42 = vpop.f32.mrb[5].mxu0  ;;  %247 = vst [vmem:[%s579_s2 + $0x68] sm:$0xff] %v390_v41  ;;  %v215_v43 = vpop.f32.mrb[5].mxu1  ;;  %v280_v47 = vmul.f32 %v378_v39, %v378_v39  ;;  %v288_v11 = vmul.f32 %v390_v41, %v390_v41 }
  0xe9   :  { %238 = vst [vmem:[%s579_s2 + $0x20] sm:$0xff] %v175_v42  ;;  %v254_v44 = vadd.f32 %v253_v40, %v175_v42  ;;  %v279_v45 = vmul.f32 %v175_v42, %v175_v42  ;;  %v293_v46 = vadd.f32 %v292_v38, %v278_v37  ;;  %246 = vst [vmem:[%s579_s2 + $0x60] sm:$0xff] %v215_v43 }
  0xea   :  { %v287_v8 = vmul.f32 %v215_v43, %v215_v43 }
  0xeb   :  { %v294_v48 = vadd.f32 %v293_v46, %v279_v45  ;;  %v381_v49 = vpop.f32.mrb[6].mxu0  ;;  %v255_v50 = vadd.f32 %v378_v39, %v254_v44  ;;  %v393_v51 = vpop.f32.mrb[6].mxu1 }
  0xec   :  { %241 = vst [vmem:[%s579_s2 + $0x38] sm:$0xff] %v381_v49  ;;  %v185_v52 = vpop.f32.mrb[7].mxu0  ;;  %249 = vst [vmem:[%s579_s2 + $0x78] sm:$0xff] %v393_v51  ;;  %v225_v53 = vpop.f32.mrb[7].mxu1  ;;  %v282_v57 = vmul.f32 %v381_v49, %v381_v49  ;;  %v290_v17 = vmul.f32 %v393_v51, %v393_v51 }
  0xed   :  { %240 = vst [vmem:[%s579_s2 + $0x30] sm:$0xff] %v185_v52  ;;  %v256_v54 = vadd.f32 %v255_v50, %v185_v52  ;;  %v281_v55 = vmul.f32 %v185_v52, %v185_v52  ;;  %v295_v56 = vadd.f32 %v294_v48, %v280_v47  ;;  %248 = vst [vmem:[%s579_s2 + $0x70] sm:$0xff] %v225_v53 }
  0xee   :  { %v289_v14 = vmul.f32 %v225_v53, %v225_v53 }
  0xef   :  { %v257_v58 = vadd.f32 %v381_v49, %v256_v54  ;;  %v296_v59 = vadd.f32 %v295_v56, %v281_v55 }
  0xf1   :  { %v297_v61 = vadd.f32 %v296_v59, %v282_v57  ;;  %v258_v62 = vadd.f32 %v257_v58, %v195_v27 }
  0xf3   :  { %v298_v0 = vadd.f32 %v297_v61, %v283_v60  ;;  %v259_v1 = vadd.f32 %v384_v24, %v258_v62 }
  0xf5   :  { %v260_v3 = vadd.f32 %v259_v1, %v205_v34  ;;  %v299_v4 = vadd.f32 %v298_v0, %v284_v63 }
  0xf7   :  { %v300_v6 = vadd.f32 %v299_v4, %v285_v2  ;;  %v261_v7 = vadd.f32 %v387_v32, %v260_v3 }
  0xf9   :  { %v262_v9 = vadd.f32 %v261_v7, %v215_v43  ;;  %v301_v10 = vadd.f32 %v300_v6, %v286_v5 }
  0xfb   :  { %v302_v12 = vadd.f32 %v301_v10, %v287_v8  ;;  %v263_v13 = vadd.f32 %v390_v41, %v262_v9 }
  0xfd   :  { %v264_v15 = vadd.f32 %v263_v13, %v225_v53  ;;  %v303_v16 = vadd.f32 %v302_v12, %v288_v11 }
  0xff   :  { %v265_v18 = vadd.f32 %v393_v51, %v264_v15  ;;  %v304_v19 = vadd.f32 %v303_v16, %v289_v14 }
 0x101   :  { %v266_v20 = vrot.slane %v265_v18, 4  ;;  %v305_v21 = vadd.f32 %v304_v19, %v290_v17 }
 0x103   :  { %v267_v22 = vadd.f32 %v266_v20, %v265_v18  ;;  %v306_v23 = vrot.slane %v305_v21, 4 }
 0x105   :  { %v268_v24 = vrot.slane %v267_v22, 2  ;;  %v307_v25 = vadd.f32 %v306_v23, %v305_v21 }
 0x107   :  { %v269_v26 = vadd.f32 %v268_v24, %v267_v22  ;;  %v308_v27 = vrot.slane %v307_v25, 2 }
 0x109   :  { %v270_v28 = vrot.slane %v269_v26, 1  ;;  %v309_v29 = vadd.f32 %v308_v27, %v307_v25 }
 0x10b   :  { %v271_v31 = vadd.f32 %v270_v28, %v269_v26  ;;  %v310_v32 = vrot.slane %v309_v29, 1 }
 0x10d   :  { %v272_v34 = vadd.f32 %v271_v31, %v250_v30  ;;  %v311_v35 = vadd.f32 %v310_v32, %v309_v29 }
 0x10f   :  { %273 = vst [vmem:[%s577_s3] sm:$0x1] %v272_v34  ;;  %v312_v36 = vadd.f32 %v311_v35, %v274_v33 }
 0x111   :  { %313 = vst [vmem:[%s578_s4] sm:$0x1] %v312_v36 }

// kernel: basic_resnet_forward.94
= control target key start
LH: loop header
LB: loop body
LE: loop exit
PB: predicated region body
PF: predicated region fallthrough
CT: control target
= control target key end

     0   :  { %v49_v6 = vlaneseq  ;;  %s457_s2 = inlined_call_operand.vmem [shape: f32[1,128], index: 2, kind: input, shape index: {}]   ;;  %s458_s3 = inlined_call_operand.vmem [shape: f32[1,128], index: 3, kind: input, shape index: {}]   ;;  %s459_s0 = inlined_call_operand.vmem [shape: f32[128,128], index: 0, kind: input, shape index: {}]   ;;  %s460_s4 = inlined_call_operand.vmem [shape: f32[1,128], index: 4, kind: input, shape index: {}]   ;;  %s461_s5 = inlined_call_operand.vmem [shape: f32[1,128], index: 5, kind: input, shape index: {}]   ;;  %s462_s1 = inlined_call_operand.vmem [shape: f32[128,128], index: 1, kind: input, shape index: {}]   ;;  %s463_s6 = inlined_call_operand.vmem [shape: f32[128,128], index: 6, kind: output, shape index: {}]  }
   0x1   :  { %v39_v0 = vld [vmem:[%s457_s2] sm:$0x1]  ;;  %v24_v14 = vld [vmem:[%s459_s0 + $0x8] sm:$0xff]  ;;  %v25_v15 = vld [vmem:[%s459_s0 + $0x10] sm:$0xff] }
   0x2   :  { %v40_v1 = vld [vmem:[%s458_s3] sm:$0x1]  ;;  %v43_v2 = vmul.f32 0.0078125, %v39_v0  ;;  %v50_v8 = vshrl.u32 %v49_v6, 7  ;;  %v26_v16 = vld [vmem:[%s459_s0 + $0x18] sm:$0xff]  ;;  %v28_v18 = vld [vmem:[%s459_s0 + $0x28] sm:$0xff] }
   0x3   :  { %v44_v3 = vmul.f32 0.0078125, %v40_v1  ;;  %v23_v11 = vld [vmem:[%s459_s0] sm:$0xff]  ;;  %v29_v19 = vld [vmem:[%s459_s0 + $0x30] sm:$0xff]  ;;  %v30_v20 = vld [vmem:[%s459_s0 + $0x38] sm:$0xff] }
   0x4   :  { %v45_v4 = vmul.f32 %v43_v2, %v43_v2  ;;  %v51_v10 = vsub.s32 0, %v50_v8  ;;  %v41_v12 = vld [vmem:[%s460_s4] sm:$0x1]  ;;  %v266_v22 = vld [vmem:[%s459_s0 + $0x48] sm:$0xff]  ;;  %v273_v26 = vld [vmem:[%s459_s0 + $0x50] sm:$0xff] }
   0x5   :  { %v27_v17 = vld [vmem:[%s459_s0 + $0x20] sm:$0xff]  ;;  %v278_v27 = vld [vmem:[%s459_s0 + $0x58] sm:$0xff]  ;;  %v291_v33 = vld [vmem:[%s459_s0 + $0x68] sm:$0xff] }
   0x6   :  { %v46_v5 = vsub.f32 %v44_v3, %v45_v4  ;;  %v235_v13 = vrot.slane %v43_v2, %v51_v10  ;;  %v261_v21 = vld [vmem:[%s459_s0 + $0x40] sm:$0xff]  ;;  %v296_v34 = vld [vmem:[%s459_s0 + $0x70] sm:$0xff]  ;;  %v301_v35 = vld [vmem:[%s459_s0 + $0x78] sm:$0xff] }
   0x7   :  { %v283_v28 = vld [vmem:[%s459_s0 + $0x60] sm:$0xff]  ;;  %v118_v52 = vld [vmem:[%s462_s1 + $0x8] sm:$0xff]  ;;  %v119_v55 = vld [vmem:[%s462_s1 + $0x10] sm:$0xff] }
   0x8   :  { %v47_v7 = vmax.f32 %v46_v5, 0.0  ;;  %v54_v24 = vsub.f32 %v23_v11, %v235_v13  ;;  %v55_v25 = vsub.f32 %v24_v14, %v235_v13  ;;  %v56_v30 = vsub.f32 %v25_v15, %v235_v13  ;;  %v319_v44 = vld [vmem:[%s461_s5] ss:$0 sm:$0xff]  ;;  %v120_v56 = vld [vmem:[%s462_s1 + $0x18] sm:$0xff]  ;;  %v122_v2 = vld [vmem:[%s462_s1 + $0x28] sm:$0xff] }
   0x9   :  { %v57_v31 = vsub.f32 %v26_v16, %v235_v13  ;;  %v58_v32 = vsub.f32 %v27_v17, %v235_v13  ;;  %v59_v36 = vsub.f32 %v28_v18, %v235_v13  ;;  %v60_v37 = vsub.f32 %v29_v19, %v235_v13  ;;  %v117_v50 = vld [vmem:[%s462_s1] sm:$0xff]  ;;  %v123_v3 = vld [vmem:[%s462_s1 + $0x30] sm:$0xff]  ;;  %v124_v4 = vld [vmem:[%s462_s1 + $0x38] sm:$0xff] }
   0xa   :  { %v70_v9 = vadd.f32 1e-05, %v47_v7  ;;  %v61_v38 = vsub.f32 %v30_v20, %v235_v13  ;;  %v62_v39 = vsub.f32 %v261_v21, %v235_v13  ;;  %v63_v41 = vsub.f32 %v266_v22, %v235_v13  ;;  %v121_v58 = vld [vmem:[%s462_s1 + $0x20] sm:$0xff] }
   0xb   :  { %v64_v42 = vsub.f32 %v273_v26, %v235_v13  ;;  %v65_v43 = vsub.f32 %v278_v27, %v235_v13  ;;  %v66_v45 = vsub.f32 %v283_v28, %v235_v13  ;;  %v67_v46 = vsub.f32 %v291_v33, %v235_v13  ;;  %v125_v26 = vld [vmem:[%s462_s1 + $0x40] sm:$0xff]  ;;  %v126_v28 = vld [vmem:[%s462_s1 + $0x48] sm:$0xff] }
   0xc   :  { %186 = vrsqrt.f32 %v70_v9  ;;  %v68_v47 = vsub.f32 %v296_v34, %v235_v13  ;;  %v69_v48 = vsub.f32 %v301_v35, %v235_v13  ;;  %v129_v34 = vld [vmem:[%s462_s1 + $0x60] sm:$0xff] }
  0x16   :  { %v187_v23 = vpop.eup %186 }
  0x17   :  { %v72_v29 = vmul.f32 %v187_v23, %v41_v12 }
  0x19   :  { %v308_v40 = vrot.slane %v72_v29, %v51_v10 }
  0x1b   :  { %v79_v49 = vmul.f32 %v308_v40, %v54_v24  ;;  %v80_v51 = vmul.f32 %v308_v40, %v55_v25  ;;  %v81_v53 = vmul.f32 %v308_v40, %v56_v30  ;;  %v82_v54 = vmul.f32 %v308_v40, %v57_v31  ;;  %v127_v31 = vld [vmem:[%s462_s1 + $0x50] sm:$0xff] }
  0x1c   :  { %v83_v57 = vmul.f32 %v308_v40, %v58_v32  ;;  %v84_v59 = vmul.f32 %v308_v40, %v59_v36  ;;  %v85_v60 = vmul.f32 %v308_v40, %v60_v37  ;;  %v86_v61 = vmul.f32 %v308_v40, %v61_v38  ;;  %v128_v32 = vld [vmem:[%s462_s1 + $0x58] sm:$0xff] }
  0x1d   :  { %v101_v62 = vadd.f32 %v319_v44, %v79_v49  ;;  %v102_v63 = vadd.f32 %v319_v44, %v80_v51  ;;  %v103_v0 = vadd.f32 %v319_v44, %v81_v53  ;;  %v104_v1 = vadd.f32 %v319_v44, %v82_v54 }
  0x1e   :  { %v105_v5 = vadd.f32 %v319_v44, %v83_v57  ;;  %v106_v6 = vadd.f32 %v319_v44, %v84_v59  ;;  %v107_v7 = vadd.f32 %v319_v44, %v85_v60  ;;  %v108_v8 = vadd.f32 %v319_v44, %v86_v61 }
  0x1f   :  { %v133_v9 = vadd.f32 %v117_v50, %v101_v62  ;;  %v134_v10 = vadd.f32 %v118_v52, %v102_v63  ;;  %v135_v11 = vadd.f32 %v119_v55, %v103_v0  ;;  %v136_v12 = vadd.f32 %v120_v56, %v104_v1 }
  0x20   :  { %v137_v13 = vadd.f32 %v121_v58, %v105_v5  ;;  %v138_v14 = vadd.f32 %v122_v2, %v106_v6  ;;  %v139_v15 = vadd.f32 %v123_v3, %v107_v7  ;;  %v140_v16 = vadd.f32 %v124_v4, %v108_v8 }
  0x21   :  { %v149_v17 = vmax.f32 %v133_v9, 0.0  ;;  %v150_v18 = vmax.f32 %v134_v10, 0.0  ;;  %v151_v19 = vmax.f32 %v135_v11, 0.0  ;;  %v152_v20 = vmax.f32 %v136_v12, 0.0 }
  0x22   :  { %v153_v21 = vmax.f32 %v137_v13, 0.0  ;;  %v154_v22 = vmax.f32 %v138_v14, 0.0  ;;  %v155_v23 = vmax.f32 %v139_v15, 0.0  ;;  %v156_v24 = vmax.f32 %v140_v16, 0.0 }
  0x23   :  { %165 = vst [vmem:[%s463_s6] sm:$0xff] %v149_v17  ;;  %166 = vst [vmem:[%s463_s6 + $0x8] sm:$0xff] %v150_v18  ;;  %v87_v25 = vmul.f32 %v308_v40, %v62_v39  ;;  %v88_v27 = vmul.f32 %v308_v40, %v63_v41  ;;  %v89_v29 = vmul.f32 %v308_v40, %v64_v42 }
  0x24   :  { %167 = vst [vmem:[%s463_s6 + $0x10] sm:$0xff] %v151_v19  ;;  %168 = vst [vmem:[%s463_s6 + $0x18] sm:$0xff] %v152_v20  ;;  %v90_v30 = vmul.f32 %v308_v40, %v65_v43  ;;  %v91_v33 = vmul.f32 %v308_v40, %v66_v45  ;;  %v92_v35 = vmul.f32 %v308_v40, %v67_v46  ;;  %v130_v43 = vld [vmem:[%s462_s1 + $0x68] sm:$0xff]  ;;  %v131_v45 = vld [vmem:[%s462_s1 + $0x70] sm:$0xff] }
  0x25   :  { %169 = vst [vmem:[%s463_s6 + $0x20] sm:$0xff] %v153_v21  ;;  %170 = vst [vmem:[%s463_s6 + $0x28] sm:$0xff] %v154_v22  ;;  %v93_v36 = vmul.f32 %v308_v40, %v68_v47  ;;  %v94_v37 = vmul.f32 %v308_v40, %v69_v48  ;;  %v109_v38 = vadd.f32 %v319_v44, %v87_v25  ;;  %v132_v40 = vld [vmem:[%s462_s1 + $0x78] sm:$0xff] }
  0x26   :  { %171 = vst [vmem:[%s463_s6 + $0x30] sm:$0xff] %v155_v23  ;;  %172 = vst [vmem:[%s463_s6 + $0x38] sm:$0xff] %v156_v24  ;;  %v110_v39 = vadd.f32 %v319_v44, %v88_v27  ;;  %v111_v41 = vadd.f32 %v319_v44, %v89_v29  ;;  %v112_v42 = vadd.f32 %v319_v44, %v90_v30 }
  0x27   :  { %v113_v46 = vadd.f32 %v319_v44, %v91_v33  ;;  %v114_v47 = vadd.f32 %v319_v44, %v92_v35  ;;  %v115_v48 = vadd.f32 %v319_v44, %v93_v36  ;;  %v116_v49 = vadd.f32 %v319_v44, %v94_v37 }
  0x28   :  { %v141_v50 = vadd.f32 %v125_v26, %v109_v38  ;;  %v142_v51 = vadd.f32 %v126_v28, %v110_v39  ;;  %v143_v52 = vadd.f32 %v127_v31, %v111_v41  ;;  %v144_v53 = vadd.f32 %v128_v32, %v112_v42 }
  0x29   :  { %v145_v54 = vadd.f32 %v129_v34, %v113_v46  ;;  %v146_v55 = vadd.f32 %v130_v43, %v114_v47  ;;  %v147_v56 = vadd.f32 %v131_v45, %v115_v48  ;;  %v148_v57 = vadd.f32 %v132_v40, %v116_v49 }
  0x2a   :  { %v157_v58 = vmax.f32 %v141_v50, 0.0  ;;  %v158_v59 = vmax.f32 %v142_v51, 0.0  ;;  %v159_v60 = vmax.f32 %v143_v52, 0.0  ;;  %v160_v61 = vmax.f32 %v144_v53, 0.0 }
  0x2b   :  { %v161_v62 = vmax.f32 %v145_v54, 0.0  ;;  %v162_v63 = vmax.f32 %v146_v55, 0.0  ;;  %v163_v0 = vmax.f32 %v147_v56, 0.0  ;;  %v164_v1 = vmax.f32 %v148_v57, 0.0 }
  0x2c   :  { %173 = vst [vmem:[%s463_s6 + $0x40] sm:$0xff] %v157_v58  ;;  %174 = vst [vmem:[%s463_s6 + $0x48] sm:$0xff] %v158_v59 }
  0x2d   :  { %175 = vst [vmem:[%s463_s6 + $0x50] sm:$0xff] %v159_v60  ;;  %176 = vst [vmem:[%s463_s6 + $0x58] sm:$0xff] %v160_v61 }
  0x2e   :  { %177 = vst [vmem:[%s463_s6 + $0x60] sm:$0xff] %v161_v62  ;;  %178 = vst [vmem:[%s463_s6 + $0x68] sm:$0xff] %v162_v63 }
  0x2f   :  { %179 = vst [vmem:[%s463_s6 + $0x70] sm:$0xff] %v163_v0  ;;  %180 = vst [vmem:[%s463_s6 + $0x78] sm:$0xff] %v164_v1 }

// kernel: basic_resnet_forward.98
= control target key start
LH: loop header
LB: loop body
LE: loop exit
PB: predicated region body
PF: predicated region fallthrough
CT: control target
= control target key end

     0   :  { %v34_v6 = vlaneseq  ;;  %s147_s1 = inlined_call_operand.vmem [shape: f32[1,128], index: 1, kind: input, shape index: {}]   ;;  %s148_s2 = inlined_call_operand.vmem [shape: f32[1,128], index: 2, kind: input, shape index: {}]   ;;  %s149_s0 = inlined_call_operand.vmem [shape: f32[32,128], index: 0, kind: input, shape index: {}]   ;;  %s150_s3 = inlined_call_operand.vmem [shape: f32[1,128], index: 3, kind: input, shape index: {}]   ;;  %s151_s4 = inlined_call_operand.vmem [shape: f32[1,128], index: 4, kind: input, shape index: {}]   ;;  %s152_s5 = inlined_call_operand.vmem [shape: f32[32,128], index: 5, kind: output, shape index: {}]  }
   0x1   :  { %v24_v0 = vld [vmem:[%s147_s1] sm:$0x1]  ;;  %v21_v14 = vld [vmem:[%s149_s0 + $0x8] sm:$0xff]  ;;  %v22_v15 = vld [vmem:[%s149_s0 + $0x10] sm:$0xff] }
   0x2   :  { %v25_v1 = vld [vmem:[%s148_s2] sm:$0x1]  ;;  %v28_v2 = vmul.f32 0.03125, %v24_v0  ;;  %v35_v8 = vshrl.u32 %v34_v6, 7  ;;  %v23_v16 = vld [vmem:[%s149_s0 + $0x18] sm:$0xff] }
   0x3   :  { %v29_v3 = vmul.f32 0.03125, %v25_v1  ;;  %v20_v12 = vld [vmem:[%s149_s0] sm:$0xff] }
   0x4   :  { %v30_v4 = vmul.f32 %v28_v2, %v28_v2  ;;  %v36_v10 = vsub.s32 0, %v35_v8  ;;  %v26_v13 = vld [vmem:[%s150_s3] sm:$0x1] }
   0x5   :  { %v78_v24 = vld [vmem:[%s151_s4] ss:$0 sm:$0xff] }
   0x6   :  { %v31_v5 = vsub.f32 %v29_v3, %v30_v4  ;;  %v37_v11 = vrot.slane %v28_v2, %v36_v10 }
   0x8   :  { %v32_v7 = vmax.f32 %v31_v5, 0.0  ;;  %v39_v18 = vsub.f32 %v20_v12, %v37_v11  ;;  %v40_v20 = vsub.f32 %v21_v14, %v37_v11  ;;  %v41_v21 = vsub.f32 %v22_v15, %v37_v11 }
   0x9   :  { %v42_v22 = vsub.f32 %v23_v16, %v37_v11 }
   0xa   :  { %v43_v9 = vadd.f32 1e-05, %v32_v7 }
   0xc   :  { %79 = vrsqrt.f32 %v43_v9 }
  0x16   :  { %v80_v17 = vpop.eup %79 }
  0x17   :  { %v45_v19 = vmul.f32 %v80_v17, %v26_v13 }
  0x19   :  { %v50_v23 = vrot.slane %v45_v19, %v36_v10 }
  0x1b   :  { %v52_v25 = vmul.f32 %v50_v23, %v39_v18  ;;  %v53_v26 = vmul.f32 %v50_v23, %v40_v20  ;;  %v54_v27 = vmul.f32 %v50_v23, %v41_v21  ;;  %v55_v28 = vmul.f32 %v50_v23, %v42_v22 }
  0x1d   :  { %v62_v29 = vadd.f32 %v78_v24, %v52_v25  ;;  %v63_v30 = vadd.f32 %v78_v24, %v53_v26  ;;  %v64_v31 = vadd.f32 %v78_v24, %v54_v27  ;;  %v65_v32 = vadd.f32 %v78_v24, %v55_v28 }
  0x1f   :  { %v66_v33 = vmax.f32 %v62_v29, 0.0  ;;  %v67_v34 = vmax.f32 %v63_v30, 0.0  ;;  %v68_v35 = vmax.f32 %v64_v31, 0.0  ;;  %v69_v36 = vmax.f32 %v65_v32, 0.0 }
  0x21   :  { %70 = vst [vmem:[%s152_s5] sm:$0xff] %v66_v33  ;;  %71 = vst [vmem:[%s152_s5 + $0x8] sm:$0xff] %v67_v34 }
  0x22   :  { %72 = vst [vmem:[%s152_s5 + $0x10] sm:$0xff] %v68_v35  ;;  %73 = vst [vmem:[%s152_s5 + $0x18] sm:$0xff] %v69_v36 }

// kernel: basic_resnet_forward.97
= control target key start
LH: loop header
LB: loop body
LE: loop exit
PB: predicated region body
PF: predicated region fallthrough
CT: control target
= control target key end

     0   :  { %vm68_vm0 = vcmask 261120   ;;  %s610_s1 = inlined_call_operand.vmem [shape: f32[288,128], index: 1, kind: input, shape index: {}]   ;;  %s611_s0 = inlined_call_operand.vmem [shape: f32[32,288], index: 0, kind: input, shape index: {}]   ;;  %s612_s3 = inlined_call_operand.vmem [shape: f32[1,128], index: 3, kind: output, shape index: {1}]   ;;  %s613_s4 = inlined_call_operand.vmem [shape: f32[1,128], index: 4, kind: output, shape index: {2}]   ;;  %s614_s2 = inlined_call_operand.vmem [shape: f32[32,128], index: 2, kind: output, shape index: {0}]  }
   0x1   :  { %v48_v0 = vld [vmem:[%s610_s1 + $0x80] sm:$0xff]  ;;  %v49_v1 = vld [vmem:[%s610_s1 + $0x88] sm:$0xff]  ;;  %v50_v5 = vld [vmem:[%s610_s1 + $0x90] sm:$0xff] }
   0x2   :  { %v32_v2 = vld [vmem:[%s610_s1] sm:$0xff]  ;;  %v365_v3 = vpack.c.bf16 %v49_v1, %v48_v0  ;;  %v33_v4 = vld [vmem:[%s610_s1 + $0x8] sm:$0xff]  ;;  %v51_v6 = vld [vmem:[%s610_s1 + $0x98] sm:$0xff] }
   0x3   :  { %v367_v7 = vpack.c.bf16 %v33_v4, %v32_v2  ;;  %v369_v8 = vpack.c.bf16 %v51_v6, %v50_v5  ;;  %v34_v9 = vld [vmem:[%s610_s1 + $0x10] sm:$0xff]  ;;  %v35_v10 = vld [vmem:[%s610_s1 + $0x18] sm:$0xff]  ;;  %v52_v11 = vld [vmem:[%s610_s1 + $0xa0] sm:$0xff]  ;;  %v406_v2 = vmov 0.0  }
   0x4   :  { %366 = vmatprep.subr.bf16.mxu0 %v365_v3  ;;  %v53_v12 = vld [vmem:[%s610_s1 + $0xa8] sm:$0xff]  ;;  %v371_v13 = vpack.c.bf16 %v35_v10, %v34_v9  ;;  %v36_v15 = vld [vmem:[%s610_s1 + $0x20] sm:$0xff]  ;;  %v54_v17 = vld [vmem:[%s610_s1 + $0xb0] sm:$0xff]  ;;  %18 = vst [vmem:[%s612_s3] sm:$0x1] %v406_v2 }
   0x5   :  { %368 = vmatpush3.bf16.msra.mxu0 %v367_v7  ;;  %v373_v14 = vpack.c.bf16 %v53_v12, %v52_v11  ;;  %v37_v16 = vld [vmem:[%s610_s1 + $0x28] sm:$0xff]  ;;  %v55_v18 = vld [vmem:[%s610_s1 + $0xb8] sm:$0xff]  ;;  %v38_v20 = vld [vmem:[%s610_s1 + $0x30] sm:$0xff]  ;;  %19 = vst [vmem:[%s613_s4] sm:$0x1] %v406_v2 }
   0x6   :  { %370 = vmatprep.subr.bf16.mxu0 %v369_v8  ;;  %v375_v19 = vpack.c.bf16 %v37_v16, %v36_v15  ;;  %v377_v21 = vpack.c.bf16 %v55_v18, %v54_v17  ;;  %v39_v22 = vld [vmem:[%s610_s1 + $0x38] sm:$0xff]  ;;  %v64_v23 = vld [vmem:[%s610_s1 + $0x100] sm:$0xff]  ;;  %v65_v24 = vld [vmem:[%s610_s1 + $0x108] sm:$0xff] }
   0x7   :  { %v56_v25 = vld [vmem:[%s610_s1 + $0xc0] sm:$0xff]  ;;  %v57_v26 = vld [vmem:[%s610_s1 + $0xc8] sm:$0xff]  ;;  %v397_v27 = vpack.c.bf16 %v65_v24, %v64_v23  ;;  %v66_v28 = vld [vmem:[%s610_s1 + $0x110] sm:$0xff]  ;;  %v379_v30 = vpack.c.bf16 %v39_v22, %v38_v20 }
   0x8   :  { %v67_v29 = vld [vmem:[%s610_s1 + $0x118] sm:$0xff]  ;;  %v21_v32 = vld [vmem:[%s611_s0 + $0x8] sm:$0xff]  ;;  %v22_v33 = vld [vmem:[%s611_s0 + $0x10] sm:$0xff]  ;;  %v381_v34 = vpack.c.bf16 %v57_v26, %v56_v25 }
   0x9   :  { %372 = vmatpush3.bf16.msra.mxu0 %v371_v13  ;;  %398 = vmatprep.subr.bf16.mxu1 %v397_v27  ;;  %v401_v31 = vpack.c.bf16 %v67_v29, %v66_v28  ;;  %v40_v35 = vld [vmem:[%s610_s1 + $0x40] sm:$0xff]  ;;  %v41_v36 = vld [vmem:[%s610_s1 + $0x48] sm:$0xff]  ;;  %v58_v37 = vld [vmem:[%s610_s1 + $0xd0] sm:$0xff] }
   0xa   :  { %374 = vmatprep.subr.bf16.mxu0 %v373_v14  ;;  %400 = vmatpush3.bf16.msra.mxu1 %v397_v27  ;;  %v59_v38 = vld [vmem:[%s610_s1 + $0xd8] sm:$0xff]  ;;  %v383_v39 = vpack.c.bf16 %v41_v36, %v40_v35  ;;  %v42_v41 = vld [vmem:[%s610_s1 + $0x50] sm:$0xff]  ;;  %v25_v43 = vld [vmem:[%s611_s0 + $0x28] sm:$0xff] }
   0xb   :  { %402 = vmatprep.subr.bf16.mxu1 %v401_v31  ;;  %145 = vmatprep.mubr.f32.mxu0 %v21_v32  ;;  %v385_v40 = vpack.c.bf16 %v59_v38, %v58_v37  ;;  %v43_v42 = vld [vmem:[%s610_s1 + $0x58] sm:$0xff]  ;;  %v60_v44 = vld [vmem:[%s610_s1 + $0xe0] sm:$0xff]  ;;  %v61_v45 = vld [vmem:[%s610_s1 + $0xe8] sm:$0xff] }
   0xc   :  { %359 = vmatprep.mubr.msk.f32.mxu1 %vm68_vm0, %v22_v33  ;;  %v28_v46 = vld [vmem:[%s611_s0 + $0x40] sm:$0xff]  ;;  %v387_v47 = vpack.c.bf16 %v43_v42, %v42_v41  ;;  %v389_v48 = vpack.c.bf16 %v61_v45, %v60_v44  ;;  %v45_v50 = vld [vmem:[%s610_s1 + $0x68] sm:$0xff]  ;;  %v31_v51 = vld [vmem:[%s611_s0 + $0x58] sm:$0xff] }
   0xd   :  { %376 = vmatpush3.bf16.msra.mxu0 %v375_v19  ;;  %v44_v49 = vld [vmem:[%s610_s1 + $0x60] sm:$0xff]  ;;  %v62_v52 = vld [vmem:[%s610_s1 + $0xf0] sm:$0xff]  ;;  %v63_v53 = vld [vmem:[%s610_s1 + $0xf8] sm:$0xff] }
   0xe   :  { %378 = vmatprep.subr.bf16.mxu0 %v377_v21  ;;  %404 = vmatpush3.bf16.msra.mxu1 %v401_v31  ;;  %v391_v54 = vpack.c.bf16 %v45_v50, %v44_v49  ;;  %v393_v55 = vpack.c.bf16 %v63_v53, %v62_v52  ;;  %v46_v56 = vld [vmem:[%s610_s1 + $0x70] sm:$0xff]  ;;  %v47_v57 = vld [vmem:[%s610_s1 + $0x78] sm:$0xff]  ;;  %v20_v59 = vld [vmem:[%s611_s0] sm:$0xff] }
   0xf   :  { %v395_v58 = vpack.c.bf16 %v47_v57, %v46_v56  ;;  %v24_v60 = vld [vmem:[%s611_s0 + $0x20] sm:$0xff]  ;;  %v23_v61 = vld [vmem:[%s611_s0 + $0x18] sm:$0xff]  ;;  %v26_v63 = vld [vmem:[%s611_s0 + $0x30] sm:$0xff] }
  0x10   :  { %v27_v62 = vld [vmem:[%s611_s0 + $0x38] sm:$0xff]  ;;  %v30_v0 = vld [vmem:[%s611_s0 + $0x50] sm:$0xff]  ;;  %v29_v1 = vld [vmem:[%s611_s0 + $0x48] sm:$0xff] }
  0x11   :  { %380 = vmatpush3.bf16.msra.mxu0 %v379_v30  ;;  %360 = vmatmul.mubr.msk.f32.vlgmr.msra.gmra.mrb[0].mxu1 %vm68_vm0, %v25_v43  ;;  %v255_v42 = vld [vmem:[%s612_s3] sm:$0x1] }
  0x12   :  { %382 = vmatprep.subr.bf16.mxu0 %v381_v34  ;;  %362 = vmatprep.mubr.msk.f32.mxu1 %vm68_vm0, %v28_v46  ;;  %v267_v45 = vld [vmem:[%s613_s4] sm:$0x1] }
  0x15   :  { %384 = vmatpush3.bf16.msra.mxu0 %v383_v39  ;;  %363 = vmatmul.mubr.msk.f32.gmra.mrb[2].mxu1 %vm68_vm0, %v31_v51 }
  0x16   :  { %386 = vmatprep.subr.bf16.mxu0 %v385_v40 }
  0x19   :  { %388 = vmatpush3.bf16.msra.mxu0 %v387_v47 }
  0x1a   :  { %390 = vmatprep.subr.bf16.mxu0 %v389_v48 }
  0x1d   :  { %392 = vmatpush3.bf16.msra.mxu0 %v391_v54 }
  0x1e   :  { %394 = vmatprep.subr.bf16.mxu0 %v393_v55 }
  0x21   :  { %396 = vmatpush3.bf16.msra.mxu0 %v395_v58 }
  0x24   :  { %146 = vmatmul.mubr.f32.vlgmr.msra.gmra.mrb[0].mxu0 %v20_v59 }
  0x25   :  { %150 = vmatprep.mubr.f32.mxu0 %v24_v60 }
  0x28   :  { %151 = vmatmul.mubr.f32.gmra.mrb[2].mxu0 %v23_v61 }
  0x29   :  { %155 = vmatprep.mubr.f32.mxu0 %v27_v62 }
  0x2c   :  { %156 = vmatmul.mubr.f32.gmra.mrb[4].mxu0 %v26_v63 }
  0x2d   :  { %160 = vmatprep.mubr.f32.mxu0 %v30_v0 }
  0x30   :  { %161 = vmatmul.mubr.f32.gmra.mrb[6].mxu0 %v29_v1 }
  0xe4   :  { %v361_v3 = vpop.f32.mrb[0].mxu1 }
  0xe5   :  { %v232_v4 = vpop.f32.mrb[1].mxu1 }
  0xe8   :  { %v364_v5 = vpop.f32.mrb[2].mxu1 }
  0xe9   :  { %v242_v6 = vpop.f32.mrb[3].mxu1 }
  0xf7   :  { %v331_v7 = vpop.f32.mrb[0].mxu0 }
  0xf8   :  { %v332_v8 = vpop.f32.mrb[1].mxu0 }
  0xf9   :  { %v333_v9 = vadd.f32 %v332_v8, %v331_v7 }
  0xfb   :  { %v233_v10 = vadd.f32 %v333_v9, %v232_v4  ;;  %v334_v11 = vpop.f32.mrb[2].mxu0 }
  0xfc   :  { %v335_v12 = vpop.f32.mrb[3].mxu0 }
  0xfd   :  { %251 = vst [vmem:[%s614_s2] sm:$0xff] %v233_v10  ;;  %v336_v13 = vadd.f32 %v335_v12, %v334_v11  ;;  %v268_v17 = vmul.f32 %v233_v10, %v233_v10 }
  0xff   :  { %v238_v14 = vadd.f32 %v361_v3, %v336_v13  ;;  %v337_v15 = vpop.f32.mrb[4].mxu0 }
 0x100   :  { %v338_v16 = vpop.f32.mrb[5].mxu0 }
 0x101   :  { %252 = vst [vmem:[%s614_s2 + $0x8] sm:$0xff] %v238_v14  ;;  %v269_v18 = vmul.f32 %v238_v14, %v238_v14  ;;  %v339_v19 = vadd.f32 %v338_v16, %v337_v15  ;;  %v256_v20 = vadd.f32 %v238_v14, %v233_v10 }
 0x103   :  { %v243_v21 = vadd.f32 %v339_v19, %v242_v6  ;;  %v272_v22 = vadd.f32 %v269_v18, %v268_v17  ;;  %v340_v23 = vpop.f32.mrb[6].mxu0 }
 0x104   :  { %v341_v24 = vpop.f32.mrb[7].mxu0 }
 0x105   :  { %253 = vst [vmem:[%s614_s2 + $0x10] sm:$0xff] %v243_v21  ;;  %v257_v25 = vadd.f32 %v256_v20, %v243_v21  ;;  %v270_v26 = vmul.f32 %v243_v21, %v243_v21  ;;  %v342_v27 = vadd.f32 %v341_v24, %v340_v23 }
 0x107   :  { %v273_v28 = vadd.f32 %v272_v22, %v270_v26  ;;  %v248_v29 = vadd.f32 %v364_v5, %v342_v27 }
 0x109   :  { %254 = vst [vmem:[%s614_s2 + $0x18] sm:$0xff] %v248_v29  ;;  %v258_v30 = vadd.f32 %v257_v25, %v248_v29  ;;  %v271_v31 = vmul.f32 %v248_v29, %v248_v29 }
 0x10b   :  { %v259_v32 = vrot.slane %v258_v30, 4  ;;  %v274_v33 = vadd.f32 %v273_v28, %v271_v31 }
 0x10d   :  { %v260_v34 = vadd.f32 %v259_v32, %v258_v30  ;;  %v275_v35 = vrot.slane %v274_v33, 4 }
 0x10f   :  { %v261_v36 = vrot.slane %v260_v34, 2  ;;  %v276_v37 = vadd.f32 %v275_v35, %v274_v33 }
 0x111   :  { %v262_v38 = vadd.f32 %v261_v36, %v260_v34  ;;  %v277_v39 = vrot.slane %v276_v37, 2 }
 0x113   :  { %v263_v40 = vrot.slane %v262_v38, 1  ;;  %v278_v41 = vadd.f32 %v277_v39, %v276_v37 }
 0x115   :  { %v264_v43 = vadd.f32 %v263_v40, %v262_v38  ;;  %v279_v44 = vrot.slane %v278_v41, 1 }
 0x117   :  { %v265_v46 = vadd.f32 %v264_v43, %v255_v42  ;;  %v280_v47 = vadd.f32 %v279_v44, %v278_v41 }
 0x119   :  { %266 = vst [vmem:[%s612_s3] sm:$0x1] %v265_v46  ;;  %v281_v48 = vadd.f32 %v280_v47, %v267_v45 }
 0x11b   :  { %282 = vst [vmem:[%s613_s4] sm:$0x1] %v281_v48 }

// kernel: basic_resnet_forward.99
= control target key start
LH: loop header
LB: loop body
LE: loop exit
PB: predicated region body
PF: predicated region fallthrough
CT: control target
= control target key end

     0   :  { %vm28_vm0 = vcmask 261120   ;;  %v209_v10 = vmov 0.0   ;;  %s293_s1 = inlined_call_operand.vmem [shape: f32[32,128], index: 1, kind: input, shape index: {}]   ;;  %s294_s0 = inlined_call_operand.vmem [shape: f32[32,32], index: 0, kind: input, shape index: {}]   ;;  %s295_s3 = inlined_call_operand.vmem [shape: f32[1,128], index: 3, kind: output, shape index: {1}]   ;;  %s296_s4 = inlined_call_operand.vmem [shape: f32[1,128], index: 4, kind: output, shape index: {2}]   ;;  %s297_s2 = inlined_call_operand.vmem [shape: f32[32,128], index: 2, kind: output, shape index: {0}]  }
   0x1   :  { %v24_v0 = vld [vmem:[%s293_s1] sm:$0xff]  ;;  %v25_v1 = vld [vmem:[%s293_s1 + $0x8] sm:$0xff]  ;;  %v26_v2 = vld [vmem:[%s293_s1 + $0x10] sm:$0xff]  ;;  %18 = vst [vmem:[%s295_s3] sm:$0x1] %v209_v10 }
   0x2   :  { %v196_v3 = vpack.c.bf16 %v25_v1, %v24_v0  ;;  %v27_v4 = vld [vmem:[%s293_s1 + $0x18] sm:$0xff]  ;;  %v20_v5 = vld [vmem:[%s294_s0] sm:$0xff]  ;;  %v22_v7 = vld [vmem:[%s294_s0 + $0x10] sm:$0xff]  ;;  %19 = vst [vmem:[%s296_s4] sm:$0x1] %v209_v10 }
   0x3   :  { %v200_v6 = vpack.c.bf16 %v27_v4, %v26_v2  ;;  %190 = vmatprep.mubr.msk.f32.mxu0 %vm28_vm0, %v20_v5  ;;  %193 = vmatprep.mubr.msk.f32.mxu1 %vm28_vm0, %v22_v7  ;;  %v21_v8 = vld [vmem:[%s294_s0 + $0x8] sm:$0xff]  ;;  %v23_v9 = vld [vmem:[%s294_s0 + $0x18] sm:$0xff] }
   0x4   :  { %197 = vmatprep.subr.bf16.mxu0 %v196_v3  ;;  %204 = vmatprep.subr.bf16.mxu1 %v196_v3 }
   0x5   :  { %199 = vmatpush3.bf16.msra.mxu0 %v196_v3  ;;  %206 = vmatpush3.bf16.msra.mxu1 %v196_v3 }
   0x6   :  { %201 = vmatprep.subr.bf16.mxu0 %v200_v6  ;;  %205 = vmatprep.subr.bf16.mxu1 %v200_v6 }
   0x8   :  { %v130_v34 = vld [vmem:[%s295_s3] sm:$0x1] }
   0x9   :  { %203 = vmatpush3.bf16.msra.mxu0 %v200_v6  ;;  %207 = vmatpush3.bf16.msra.mxu1 %v200_v6  ;;  %v142_v37 = vld [vmem:[%s296_s4] sm:$0x1] }
   0xc   :  { %191 = vmatmul.mubr.msk.f32.vlgmr.msra.gmra.mrb[0].mxu0 %vm28_vm0, %v21_v8  ;;  %194 = vmatmul.mubr.msk.f32.vlgmr.msra.gmra.mrb[0].mxu1 %vm28_vm0, %v23_v9 }
  0xdf   :  { %v192_v11 = vpop.f32.mrb[0].mxu0  ;;  %v195_v12 = vpop.f32.mrb[0].mxu1 }
  0xe0   :  { %127 = vst [vmem:[%s297_s2 + $0x8] sm:$0xff] %v192_v11  ;;  %v144_v13 = vmul.f32 %v192_v11, %v192_v11  ;;  %v107_v14 = vpop.f32.mrb[1].mxu0  ;;  %129 = vst [vmem:[%s297_s2 + $0x18] sm:$0xff] %v195_v12  ;;  %v117_v15 = vpop.f32.mrb[1].mxu1  ;;  %v146_v21 = vmul.f32 %v195_v12, %v195_v12 }
  0xe1   :  { %126 = vst [vmem:[%s297_s2] sm:$0xff] %v107_v14  ;;  %v131_v16 = vadd.f32 %v192_v11, %v107_v14  ;;  %v143_v17 = vmul.f32 %v107_v14, %v107_v14  ;;  %128 = vst [vmem:[%s297_s2 + $0x10] sm:$0xff] %v117_v15  ;;  %v145_v18 = vmul.f32 %v117_v15, %v117_v15 }
  0xe3   :  { %v147_v19 = vadd.f32 %v144_v13, %v143_v17  ;;  %v132_v20 = vadd.f32 %v131_v16, %v117_v15 }
  0xe5   :  { %v133_v22 = vadd.f32 %v195_v12, %v132_v20  ;;  %v148_v23 = vadd.f32 %v147_v19, %v145_v18 }
  0xe7   :  { %v134_v24 = vrot.slane %v133_v22, 4  ;;  %v149_v25 = vadd.f32 %v148_v23, %v146_v21 }
  0xe9   :  { %v135_v26 = vadd.f32 %v134_v24, %v133_v22  ;;  %v150_v27 = vrot.slane %v149_v25, 4 }
  0xeb   :  { %v136_v28 = vrot.slane %v135_v26, 2  ;;  %v151_v29 = vadd.f32 %v150_v27, %v149_v25 }
  0xed   :  { %v137_v30 = vadd.f32 %v136_v28, %v135_v26  ;;  %v152_v31 = vrot.slane %v151_v29, 2 }
  0xef   :  { %v138_v32 = vrot.slane %v137_v30, 1  ;;  %v153_v33 = vadd.f32 %v152_v31, %v151_v29 }
  0xf1   :  { %v139_v35 = vadd.f32 %v138_v32, %v137_v30  ;;  %v154_v36 = vrot.slane %v153_v33, 1 }
  0xf3   :  { %v140_v38 = vadd.f32 %v139_v35, %v130_v34  ;;  %v155_v39 = vadd.f32 %v154_v36, %v153_v33 }
  0xf5   :  { %141 = vst [vmem:[%s295_s3] sm:$0x1] %v140_v38  ;;  %v156_v40 = vadd.f32 %v155_v39, %v142_v37 }
  0xf7   :  { %157 = vst [vmem:[%s296_s4] sm:$0x1] %v156_v40 }

// kernel: basic_resnet_forward.101
= control target key start
LH: loop header
LB: loop body
LE: loop exit
PB: predicated region body
PF: predicated region fallthrough
CT: control target
= control target key end

     0   :  { %v49_v11 = vlaneseq  ;;  %s264_s2 = inlined_call_operand.vmem [shape: f32[1,128], index: 2, kind: input, shape index: {}]   ;;  %s265_s3 = inlined_call_operand.vmem [shape: f32[1,128], index: 3, kind: input, shape index: {}]   ;;  %s266_s6 = inlined_call_operand.vmem [shape: f32[1,128], index: 6, kind: input, shape index: {}]   ;;  %s267_s7 = inlined_call_operand.vmem [shape: f32[1,128], index: 7, kind: input, shape index: {}]   ;;  %s268_s0 = inlined_call_operand.vmem [shape: f32[32,128], index: 0, kind: input, shape index: {}]   ;;  %s269_s4 = inlined_call_operand.vmem [shape: f32[1,128], index: 4, kind: input, shape index: {}]   ;;  %s270_s1 = inlined_call_operand.vmem [shape: f32[32,128], index: 1, kind: input, shape index: {}]   ;;  %s271_s8 = inlined_call_operand.vmem [shape: f32[1,128], index: 8, kind: input, shape index: {}]   ;;  %s272_s5 = inlined_call_operand.vmem [shape: f32[1,128], index: 5, kind: input, shape index: {}]   ;;  %s273_s9 = inlined_call_operand.vmem [shape: f32[1,128], index: 9, kind: input, shape index: {}]   ;;  %s274_s10 = inlined_call_operand.vmem [shape: f32[32,128], index: 10, kind: output, shape index: {}]  }
   0x1   :  { %v39_v0 = vld [vmem:[%s264_s2] sm:$0x1]  ;;  %v36_v22 = vld [vmem:[%s268_s0 + $0x8] sm:$0xff]  ;;  %v37_v23 = vld [vmem:[%s268_s0 + $0x10] sm:$0xff] }
   0x2   :  { %v40_v1 = vld [vmem:[%s265_s3] sm:$0x1]  ;;  %v43_v2 = vmul.f32 0.03125, %v39_v0  ;;  %v50_v16 = vshrl.u32 %v49_v11, 7  ;;  %v38_v25 = vld [vmem:[%s268_s0 + $0x18] sm:$0xff]  ;;  %v82_v29 = vld [vmem:[%s270_s1 + $0x8] sm:$0xff] }
   0x3   :  { %v44_v3 = vmul.f32 0.03125, %v40_v1  ;;  %v85_v4 = vld [vmem:[%s266_s6] sm:$0x1]  ;;  %v83_v34 = vld [vmem:[%s270_s1 + $0x10] sm:$0xff]  ;;  %v84_v35 = vld [vmem:[%s270_s1 + $0x18] sm:$0xff] }
   0x4   :  { %v86_v5 = vld [vmem:[%s267_s7] sm:$0x1]  ;;  %v45_v6 = vmul.f32 %v43_v2, %v43_v2  ;;  %v89_v7 = vmul.f32 0.03125, %v85_v4  ;;  %v51_v18 = vsub.s32 0, %v50_v16 }
   0x5   :  { %v90_v8 = vmul.f32 0.03125, %v86_v5  ;;  %v35_v19 = vld [vmem:[%s268_s0] sm:$0xff] }
   0x6   :  { %v46_v9 = vsub.f32 %v44_v3, %v45_v6  ;;  %v91_v10 = vmul.f32 %v89_v7, %v89_v7  ;;  %v52_v20 = vrot.slane %v43_v2, %v51_v18  ;;  %v41_v21 = vld [vmem:[%s269_s4] sm:$0x1]  ;;  %v98_v24 = vrot.slane %v89_v7, %v51_v18 }
   0x7   :  { %v81_v27 = vld [vmem:[%s270_s1] sm:$0xff] }
   0x8   :  { %v47_v12 = vmax.f32 %v46_v9, 0.0  ;;  %v92_v13 = vsub.f32 %v90_v8, %v91_v10  ;;  %v87_v28 = vld [vmem:[%s271_s8] sm:$0x1]  ;;  %v54_v30 = vsub.f32 %v35_v19, %v52_v20  ;;  %v55_v32 = vsub.f32 %v36_v22, %v52_v20 }
   0x9   :  { %v56_v33 = vsub.f32 %v37_v23, %v52_v20  ;;  %v57_v37 = vsub.f32 %v38_v25, %v52_v20  ;;  %v100_v39 = vsub.f32 %v81_v27, %v98_v24  ;;  %v101_v41 = vsub.f32 %v82_v29, %v98_v24  ;;  %v143_v42 = vld [vmem:[%s272_s5] ss:$0 sm:$0xff] }
   0xa   :  { %v58_v14 = vadd.f32 1e-05, %v47_v12  ;;  %v93_v15 = vmax.f32 %v92_v13, 0.0  ;;  %v102_v43 = vsub.f32 %v83_v34, %v98_v24  ;;  %v103_v44 = vsub.f32 %v84_v35, %v98_v24  ;;  %v144_v49 = vld [vmem:[%s273_s9] ss:$0 sm:$0xff] }
   0xc   :  { %145 = vrsqrt.f32 %v58_v14  ;;  %v104_v17 = vadd.f32 1e-05, %v93_v15 }
   0xe   :  { %147 = vrsqrt.f32 %v104_v17 }
  0x16   :  { %v146_v26 = vpop.eup %145 }
  0x17   :  { %v60_v31 = vmul.f32 %v146_v26, %v41_v21 }
  0x18   :  { %v148_v36 = vpop.eup %147 }
  0x19   :  { %v65_v38 = vrot.slane %v60_v31, %v51_v18  ;;  %v106_v40 = vmul.f32 %v148_v36, %v87_v28 }
  0x1b   :  { %v67_v45 = vmul.f32 %v65_v38, %v54_v30  ;;  %v111_v46 = vrot.slane %v106_v40, %v51_v18  ;;  %v68_v47 = vmul.f32 %v65_v38, %v55_v32  ;;  %v69_v48 = vmul.f32 %v65_v38, %v56_v33 }
  0x1c   :  { %v70_v50 = vmul.f32 %v65_v38, %v57_v37 }
  0x1d   :  { %v77_v51 = vadd.f32 %v143_v42, %v67_v45  ;;  %v113_v52 = vmul.f32 %v111_v46, %v100_v39  ;;  %v78_v53 = vadd.f32 %v143_v42, %v68_v47  ;;  %v114_v54 = vmul.f32 %v111_v46, %v101_v41 }
  0x1e   :  { %v79_v55 = vadd.f32 %v143_v42, %v69_v48  ;;  %v115_v56 = vmul.f32 %v111_v46, %v102_v43  ;;  %v80_v57 = vadd.f32 %v143_v42, %v70_v50  ;;  %v116_v58 = vmul.f32 %v111_v46, %v103_v44 }
  0x1f   :  { %v123_v59 = vadd.f32 %v144_v49, %v113_v52  ;;  %v124_v60 = vadd.f32 %v144_v49, %v114_v54 }
  0x20   :  { %v125_v61 = vadd.f32 %v144_v49, %v115_v56  ;;  %v126_v62 = vadd.f32 %v144_v49, %v116_v58 }
  0x21   :  { %v127_v63 = vadd.f32 %v123_v59, %v77_v51  ;;  %v128_v0 = vadd.f32 %v124_v60, %v78_v53 }
  0x22   :  { %v129_v1 = vadd.f32 %v125_v61, %v79_v55  ;;  %v130_v2 = vadd.f32 %v126_v62, %v80_v57 }
  0x23   :  { %v131_v3 = vmax.f32 %v127_v63, 0.0  ;;  %v132_v4 = vmax.f32 %v128_v0, 0.0 }
  0x24   :  { %v133_v5 = vmax.f32 %v129_v1, 0.0  ;;  %v134_v6 = vmax.f32 %v130_v2, 0.0 }
  0x25   :  { %135 = vst [vmem:[%s274_s10] sm:$0xff] %v131_v3  ;;  %136 = vst [vmem:[%s274_s10 + $0x8] sm:$0xff] %v132_v4 }
  0x26   :  { %137 = vst [vmem:[%s274_s10 + $0x10] sm:$0xff] %v133_v5  ;;  %138 = vst [vmem:[%s274_s10 + $0x18] sm:$0xff] %v134_v6 }

// kernel: basic_resnet_forward.102
= control target key start
LH: loop header
LB: loop body
LE: loop exit
PB: predicated region body
PF: predicated region fallthrough
CT: control target
= control target key end

     0   :  { %vm32_vm0 = vcmask 523264   ;;  %v237_v16 = vmov 0.0   ;;  %s333_s1 = inlined_call_operand.vmem [shape: f32[64,128], index: 1, kind: input, shape index: {}]   ;;  %s334_s0 = inlined_call_operand.vmem [shape: f32[32,64], index: 0, kind: input, shape index: {}]   ;;  %s335_s3 = inlined_call_operand.vmem [shape: f32[1,128], index: 3, kind: output, shape index: {1}]   ;;  %s336_s4 = inlined_call_operand.vmem [shape: f32[1,128], index: 4, kind: output, shape index: {2}]   ;;  %s337_s2 = inlined_call_operand.vmem [shape: f32[32,128], index: 2, kind: output, shape index: {0}]  }
   0x1   :  { %v24_v0 = vld [vmem:[%s333_s1] sm:$0xff]  ;;  %v25_v1 = vld [vmem:[%s333_s1 + $0x8] sm:$0xff]  ;;  %v26_v2 = vld [vmem:[%s333_s1 + $0x10] sm:$0xff]  ;;  %18 = vst [vmem:[%s335_s3] sm:$0x1] %v237_v16 }
   0x2   :  { %v212_v3 = vpack.c.bf16 %v25_v1, %v24_v0  ;;  %v27_v4 = vld [vmem:[%s333_s1 + $0x18] sm:$0xff]  ;;  %v28_v6 = vld [vmem:[%s333_s1 + $0x20] sm:$0xff]  ;;  %v29_v7 = vld [vmem:[%s333_s1 + $0x28] sm:$0xff]  ;;  %19 = vst [vmem:[%s336_s4] sm:$0x1] %v237_v16 }
   0x3   :  { %v216_v5 = vpack.c.bf16 %v27_v4, %v26_v2  ;;  %v20_v8 = vld [vmem:[%s334_s0] sm:$0xff]  ;;  %v22_v9 = vld [vmem:[%s334_s0 + $0x10] sm:$0xff]  ;;  %v220_v10 = vpack.c.bf16 %v29_v7, %v28_v6  ;;  %v31_v12 = vld [vmem:[%s333_s1 + $0x38] sm:$0xff] }
   0x4   :  { %213 = vmatprep.subr.bf16.mxu0 %v212_v3  ;;  %228 = vmatprep.subr.bf16.mxu1 %v212_v3  ;;  %v30_v11 = vld [vmem:[%s333_s1 + $0x30] sm:$0xff]  ;;  %v21_v14 = vld [vmem:[%s334_s0 + $0x8] sm:$0xff]  ;;  %v23_v15 = vld [vmem:[%s334_s0 + $0x18] sm:$0xff] }
   0x5   :  { %215 = vmatpush3.bf16.msra.mxu0 %v212_v3  ;;  %232 = vmatpush3.bf16.msra.mxu1 %v212_v3  ;;  %v224_v13 = vpack.c.bf16 %v31_v12, %v30_v11 }
   0x6   :  { %217 = vmatprep.subr.bf16.mxu0 %v216_v5  ;;  %229 = vmatprep.subr.bf16.mxu1 %v216_v5 }
   0x7   :  { %206 = vmatprep.mubr.msk.f32.mxu0 %vm32_vm0, %v20_v8  ;;  %209 = vmatprep.mubr.msk.f32.mxu1 %vm32_vm0, %v22_v9 }
   0x8   :  { %v134_v40 = vld [vmem:[%s335_s3] sm:$0x1] }
   0x9   :  { %219 = vmatpush3.bf16.msra.mxu0 %v216_v5  ;;  %233 = vmatpush3.bf16.msra.mxu1 %v216_v5  ;;  %v146_v43 = vld [vmem:[%s336_s4] sm:$0x1] }
   0xa   :  { %221 = vmatprep.subr.bf16.mxu0 %v220_v10  ;;  %230 = vmatprep.subr.bf16.mxu1 %v220_v10 }
   0xd   :  { %223 = vmatpush3.bf16.msra.mxu0 %v220_v10  ;;  %234 = vmatpush3.bf16.msra.mxu1 %v220_v10 }
   0xe   :  { %225 = vmatprep.subr.bf16.mxu0 %v224_v13  ;;  %231 = vmatprep.subr.bf16.mxu1 %v224_v13 }
  0x11   :  { %227 = vmatpush3.bf16.msra.mxu0 %v224_v13  ;;  %235 = vmatpush3.bf16.msra.mxu1 %v224_v13 }
  0x14   :  { %207 = vmatmul.mubr.msk.f32.vlgmr.msra.gmra.mrb[0].mxu0 %vm32_vm0, %v21_v14  ;;  %210 = vmatmul.mubr.msk.f32.vlgmr.msra.gmra.mrb[0].mxu1 %vm32_vm0, %v23_v15 }
  0xe7   :  { %v208_v17 = vpop.f32.mrb[0].mxu0  ;;  %v211_v18 = vpop.f32.mrb[0].mxu1 }
  0xe8   :  { %131 = vst [vmem:[%s337_s2 + $0x8] sm:$0xff] %v208_v17  ;;  %v148_v19 = vmul.f32 %v208_v17, %v208_v17  ;;  %v111_v20 = vpop.f32.mrb[1].mxu0  ;;  %133 = vst [vmem:[%s337_s2 + $0x18] sm:$0xff] %v211_v18  ;;  %v121_v21 = vpop.f32.mrb[1].mxu1  ;;  %v150_v27 = vmul.f32 %v211_v18, %v211_v18 }
  0xe9   :  { %130 = vst [vmem:[%s337_s2] sm:$0xff] %v111_v20  ;;  %v135_v22 = vadd.f32 %v208_v17, %v111_v20  ;;  %v147_v23 = vmul.f32 %v111_v20, %v111_v20  ;;  %132 = vst [vmem:[%s337_s2 + $0x10] sm:$0xff] %v121_v21  ;;  %v149_v24 = vmul.f32 %v121_v21, %v121_v21 }
  0xeb   :  { %v151_v25 = vadd.f32 %v148_v19, %v147_v23  ;;  %v136_v26 = vadd.f32 %v135_v22, %v121_v21 }
  0xed   :  { %v137_v28 = vadd.f32 %v211_v18, %v136_v26  ;;  %v152_v29 = vadd.f32 %v151_v25, %v149_v24 }
  0xef   :  { %v138_v30 = vrot.slane %v137_v28, 4  ;;  %v153_v31 = vadd.f32 %v152_v29, %v150_v27 }
  0xf1   :  { %v139_v32 = vadd.f32 %v138_v30, %v137_v28  ;;  %v154_v33 = vrot.slane %v153_v31, 4 }
  0xf3   :  { %v140_v34 = vrot.slane %v139_v32, 2  ;;  %v155_v35 = vadd.f32 %v154_v33, %v153_v31 }
  0xf5   :  { %v141_v36 = vadd.f32 %v140_v34, %v139_v32  ;;  %v156_v37 = vrot.slane %v155_v35, 2 }
  0xf7   :  { %v142_v38 = vrot.slane %v141_v36, 1  ;;  %v157_v39 = vadd.f32 %v156_v37, %v155_v35 }
  0xf9   :  { %v143_v41 = vadd.f32 %v142_v38, %v141_v36  ;;  %v158_v42 = vrot.slane %v157_v39, 1 }
  0xfb   :  { %v144_v44 = vadd.f32 %v143_v41, %v134_v40  ;;  %v159_v45 = vadd.f32 %v158_v42, %v157_v39 }
  0xfd   :  { %145 = vst [vmem:[%s335_s3] sm:$0x1] %v144_v44  ;;  %v160_v46 = vadd.f32 %v159_v45, %v146_v43 }
  0xff   :  { %161 = vst [vmem:[%s336_s4] sm:$0x1] %v160_v46 }

// kernel: basic_resnet_forward.108
= control target key start
LH: loop header
LB: loop body
LE: loop exit
PB: predicated region body
PF: predicated region fallthrough
CT: control target
= control target key end

     0   :  { %s41_s0 = inlined_call_operand.vmem [shape: f32[16,128], index: 0, kind: input, shape index: {}]   ;;  %s42_s1 = inlined_call_operand.vmem [shape: f32[1,128], index: 1, kind: output, shape index: {}]  }
   0x1   :  { %v8_v0 = vld [vmem:[%s41_s0] sm:$0xff]  ;;  %v9_v1 = vld [vmem:[%s41_s0 + $0x8] sm:$0xff] }
   0x2   :  { %v10_v2 = vmax.f32 %v8_v0, %v9_v1 }
   0x4   :  { %v11_v3 = vrot.slane %v10_v2, 4 }
   0x6   :  { %v12_v4 = vmax.f32 %v10_v2, %v11_v3 }
   0x8   :  { %v13_v5 = vrot.slane %v12_v4, 2 }
   0xa   :  { %v14_v6 = vmax.f32 %v12_v4, %v13_v5 }
   0xc   :  { %v15_v7 = vrot.slane %v14_v6, 1 }
   0xe   :  { %v16_v8 = vmax.f32 %v14_v6, %v15_v7 }
  0x10   :  { %17 = vst [vmem:[%s42_s1] sm:$0x1] %v16_v8 }

// kernel: basic_resnet_forward.107
= control target key start
LH: loop header
LB: loop body
LE: loop exit
PB: predicated region body
PF: predicated region fallthrough
CT: control target
= control target key end

     0   :  { %v37_v6 = vlaneseq  ;;  %s175_s2 = inlined_call_operand.vmem [shape: f32[1,128], index: 2, kind: input, shape index: {}]   ;;  %s176_s3 = inlined_call_operand.vmem [shape: f32[1,128], index: 3, kind: input, shape index: {}]   ;;  %s177_s0 = inlined_call_operand.vmem [shape: f32[32,128], index: 0, kind: input, shape index: {}]   ;;  %s178_s4 = inlined_call_operand.vmem [shape: f32[1,128], index: 4, kind: input, shape index: {}]   ;;  %s179_s5 = inlined_call_operand.vmem [shape: f32[1,128], index: 5, kind: input, shape index: {}]   ;;  %s180_s1 = inlined_call_operand.vmem [shape: f32[32,128], index: 1, kind: input, shape index: {}]   ;;  %s181_s6 = inlined_call_operand.vmem [shape: f32[32,128], index: 6, kind: output, shape index: {}]  }
   0x1   :  { %v27_v0 = vld [vmem:[%s175_s2] sm:$0x1]  ;;  %v24_v14 = vld [vmem:[%s177_s0 + $0x8] sm:$0xff]  ;;  %v25_v15 = vld [vmem:[%s177_s0 + $0x10] sm:$0xff] }
   0x2   :  { %v28_v1 = vld [vmem:[%s176_s3] sm:$0x1]  ;;  %v31_v2 = vmul.f32 0.03125, %v27_v0  ;;  %v38_v8 = vshrl.u32 %v37_v6, 7  ;;  %v26_v16 = vld [vmem:[%s177_s0 + $0x18] sm:$0xff]  ;;  %v70_v30 = vld [vmem:[%s180_s1 + $0x8] sm:$0xff] }
   0x3   :  { %v32_v3 = vmul.f32 0.03125, %v28_v1  ;;  %v23_v12 = vld [vmem:[%s177_s0] sm:$0xff]  ;;  %v71_v31 = vld [vmem:[%s180_s1 + $0x10] sm:$0xff]  ;;  %v72_v32 = vld [vmem:[%s180_s1 + $0x18] sm:$0xff] }
   0x4   :  { %v33_v4 = vmul.f32 %v31_v2, %v31_v2  ;;  %v39_v10 = vsub.s32 0, %v38_v8  ;;  %v29_v13 = vld [vmem:[%s178_s4] sm:$0x1] }
   0x5   :  { %v89_v24 = vld [vmem:[%s179_s5] ss:$0 sm:$0xff] }
   0x6   :  { %v34_v5 = vsub.f32 %v32_v3, %v33_v4  ;;  %v40_v11 = vrot.slane %v31_v2, %v39_v10  ;;  %v69_v26 = vld [vmem:[%s180_s1] sm:$0xff] }
   0x8   :  { %v35_v7 = vmax.f32 %v34_v5, 0.0  ;;  %v42_v18 = vsub.f32 %v23_v12, %v40_v11  ;;  %v43_v20 = vsub.f32 %v24_v14, %v40_v11  ;;  %v44_v21 = vsub.f32 %v25_v15, %v40_v11 }
   0x9   :  { %v45_v22 = vsub.f32 %v26_v16, %v40_v11 }
   0xa   :  { %v46_v9 = vadd.f32 1e-05, %v35_v7 }
   0xc   :  { %90 = vrsqrt.f32 %v46_v9 }
  0x16   :  { %v91_v17 = vpop.eup %90 }
  0x17   :  { %v48_v19 = vmul.f32 %v91_v17, %v29_v13 }
  0x19   :  { %v53_v23 = vrot.slane %v48_v19, %v39_v10 }
  0x1b   :  { %v55_v25 = vmul.f32 %v53_v23, %v42_v18  ;;  %v56_v27 = vmul.f32 %v53_v23, %v43_v20  ;;  %v57_v28 = vmul.f32 %v53_v23, %v44_v21  ;;  %v58_v29 = vmul.f32 %v53_v23, %v45_v22 }
  0x1d   :  { %v65_v33 = vadd.f32 %v89_v24, %v55_v25  ;;  %v66_v34 = vadd.f32 %v89_v24, %v56_v27  ;;  %v67_v35 = vadd.f32 %v89_v24, %v57_v28  ;;  %v68_v36 = vadd.f32 %v89_v24, %v58_v29 }
  0x1f   :  { %v73_v37 = vadd.f32 %v69_v26, %v65_v33  ;;  %v74_v38 = vadd.f32 %v70_v30, %v66_v34  ;;  %v75_v39 = vadd.f32 %v71_v31, %v67_v35  ;;  %v76_v40 = vadd.f32 %v72_v32, %v68_v36 }
  0x21   :  { %v77_v41 = vmax.f32 %v73_v37, 0.0  ;;  %v78_v42 = vmax.f32 %v74_v38, 0.0  ;;  %v79_v43 = vmax.f32 %v75_v39, 0.0  ;;  %v80_v44 = vmax.f32 %v76_v40, 0.0 }
  0x23   :  { %81 = vst [vmem:[%s181_s6] sm:$0xff] %v77_v41  ;;  %82 = vst [vmem:[%s181_s6 + $0x8] sm:$0xff] %v78_v42 }
  0x24   :  { %83 = vst [vmem:[%s181_s6 + $0x10] sm:$0xff] %v79_v43  ;;  %84 = vst [vmem:[%s181_s6 + $0x18] sm:$0xff] %v80_v44 }

// kernel: basic_resnet_forward.163
= control target key start
LH: loop header
LB: loop body
LE: loop exit
PB: predicated region body
PF: predicated region fallthrough
CT: control target
= control target key end

     0   :  { %v185_v0 = vmov 0.0|0.0   ;;  %vm56_vm0 = vcmask 523264   ;;  %s299_s1 = inlined_call_operand.vmem [shape: f32[192,128], index: 1, kind: input, shape index: {}]   ;;  %s300_s0 = inlined_call_operand.vmem [shape: f32[2,192], index: 0, kind: input, shape index: {}]   ;;  %s301_s2 = inlined_call_operand.vmem [shape: f32[1,128], index: 2, kind: input, shape index: {}]   ;;  %s302_s3 = inlined_call_operand.vmem [shape: f32[2,128], index: 3, kind: output, shape index: {}]  }
   0x1   :  { %144 = vmatprep.subr.bf16.mxu0 %v185_v0  ;;  %v15_v1 = vld [vmem:[%s299_s1] sm:$0xff]  ;;  %v16_v2 = vld [vmem:[%s299_s1 + $0x8] sm:$0xff]  ;;  %v17_v3 = vld [vmem:[%s299_s1 + $0x10] sm:$0xff] }
   0x2   :  { %v145_v4 = vpack.c.bf16 %v16_v2, %v15_v1  ;;  %v18_v5 = vld [vmem:[%s299_s1 + $0x18] sm:$0xff]  ;;  %v19_v7 = vld [vmem:[%s299_s1 + $0x20] sm:$0xff]  ;;  %v20_v8 = vld [vmem:[%s299_s1 + $0x28] sm:$0xff] }
   0x3   :  { %v148_v6 = vpack.c.bf16 %v18_v5, %v17_v3  ;;  %v151_v9 = vpack.c.bf16 %v20_v8, %v19_v7  ;;  %v21_v10 = vld [vmem:[%s299_s1 + $0x30] sm:$0xff]  ;;  %v22_v11 = vld [vmem:[%s299_s1 + $0x38] sm:$0xff]  ;;  %v141_v12 = vld.sshfl [vmem:[%s300_s0] sm:$0x33 pattern:$0x76325410] }
   0x4   :  { %146 = vmatpush1.bf16.msra.mxu0 %v145_v4  ;;  %v54_v13 = vcombine.high %v141_v12, %v141_v12  ;;  %v154_v14 = vpack.c.bf16 %v22_v11, %v21_v10  ;;  %v23_v15 = vld [vmem:[%s299_s1 + $0x40] sm:$0xff]  ;;  %v24_v16 = vld [vmem:[%s299_s1 + $0x48] sm:$0xff]  ;;  %v25_v18 = vld [vmem:[%s299_s1 + $0x50] sm:$0xff] }
   0x5   :  { %147 = vmatprep.subr.bf16.mxu0 %v185_v0  ;;  %v157_v17 = vpack.c.bf16 %v24_v16, %v23_v15  ;;  %v26_v19 = vld [vmem:[%s299_s1 + $0x58] sm:$0xff]  ;;  %v27_v21 = vld [vmem:[%s299_s1 + $0x60] sm:$0xff]  ;;  %v28_v22 = vld [vmem:[%s299_s1 + $0x68] sm:$0xff] }
   0x6   :  { %142 = vmatprep.mubr.msk.f32.mxu0 %vm56_vm0, %v54_v13  ;;  %v160_v20 = vpack.c.bf16 %v26_v19, %v25_v18  ;;  %v163_v23 = vpack.c.bf16 %v28_v22, %v27_v21  ;;  %v29_v24 = vld [vmem:[%s299_s1 + $0x70] sm:$0xff]  ;;  %v30_v25 = vld [vmem:[%s299_s1 + $0x78] sm:$0xff]  ;;  %v31_v27 = vld [vmem:[%s299_s1 + $0x80] sm:$0xff] }
   0x7   :  { %v166_v26 = vpack.c.bf16 %v30_v25, %v29_v24  ;;  %v32_v28 = vld [vmem:[%s299_s1 + $0x88] sm:$0xff]  ;;  %v33_v30 = vld [vmem:[%s299_s1 + $0x90] sm:$0xff]  ;;  %v34_v31 = vld [vmem:[%s299_s1 + $0x98] sm:$0xff] }
   0x8   :  { %149 = vmatpush1.bf16.msra.mxu0 %v148_v6  ;;  %v169_v29 = vpack.c.bf16 %v32_v28, %v31_v27  ;;  %v172_v32 = vpack.c.bf16 %v34_v31, %v33_v30  ;;  %v35_v33 = vld [vmem:[%s299_s1 + $0xa0] sm:$0xff]  ;;  %v36_v34 = vld [vmem:[%s299_s1 + $0xa8] sm:$0xff]  ;;  %v37_v36 = vld [vmem:[%s299_s1 + $0xb0] sm:$0xff] }
   0x9   :  { %150 = vmatprep.subr.bf16.mxu0 %v185_v0  ;;  %v175_v35 = vpack.c.bf16 %v36_v34, %v35_v33  ;;  %v38_v37 = vld [vmem:[%s299_s1 + $0xb8] sm:$0xff]  ;;  %v140_v39 = vld [vmem:[%s301_s2] ss:$0 sm:$0xff] }
   0xa   :  { %v178_v38 = vpack.c.bf16 %v38_v37, %v37_v36 }
   0xc   :  { %152 = vmatpush1.bf16.msra.mxu0 %v151_v9 }
   0xd   :  { %153 = vmatprep.subr.bf16.mxu0 %v185_v0 }
  0x10   :  { %155 = vmatpush1.bf16.msra.mxu0 %v154_v14 }
  0x11   :  { %156 = vmatprep.subr.bf16.mxu0 %v185_v0 }
  0x14   :  { %158 = vmatpush1.bf16.msra.mxu0 %v157_v17 }
  0x15   :  { %159 = vmatprep.subr.bf16.mxu0 %v185_v0 }
  0x18   :  { %161 = vmatpush1.bf16.msra.mxu0 %v160_v20 }
  0x19   :  { %162 = vmatprep.subr.bf16.mxu0 %v185_v0 }
  0x1c   :  { %164 = vmatpush1.bf16.msra.mxu0 %v163_v23 }
  0x1d   :  { %165 = vmatprep.subr.bf16.mxu0 %v185_v0 }
  0x20   :  { %167 = vmatpush1.bf16.msra.mxu0 %v166_v26 }
  0x21   :  { %168 = vmatprep.subr.bf16.mxu0 %v185_v0 }
  0x24   :  { %170 = vmatpush1.bf16.msra.mxu0 %v169_v29 }
  0x25   :  { %171 = vmatprep.subr.bf16.mxu0 %v185_v0 }
  0x28   :  { %173 = vmatpush1.bf16.msra.mxu0 %v172_v32 }
  0x29   :  { %174 = vmatprep.subr.bf16.mxu0 %v185_v0 }
  0x2c   :  { %176 = vmatpush1.bf16.msra.mxu0 %v175_v35 }
  0x2d   :  { %177 = vmatprep.subr.bf16.mxu0 %v185_v0 }
  0x30   :  { %179 = vmatpush1.bf16.msra.mxu0 %v178_v38 }
  0x33   :  { %124 = vmatmul.mubr.f32.vlgmr.msra.gmra.mrb[0].mxu0 %v141_v12 }
 0x106   :  { %v125_v40 = vpop.f32.mrb[0].mxu0 }
 0x107   :  { %v126_v41 = vadd.f32 %v140_v39, %v125_v40  ;;  %v127_v42 = vpop.f32.mrb[1].mxu0 }
 0x109   :  { %v143_v43 = vmul.f32 -1.442695, %v126_v41 }
 0x10b   :  { %181 = vpow2.f32 %v143_v43 }
 0x115   :  { %v182_v44 = vpop.eup %181 }
 0x116   :  { %v132_v45 = vadd.f32 1.0, %v182_v44 }
 0x118   :  { %183 = vrcp.f32 %v132_v45 }
 0x122   :  { %v184_v46 = vpop.eup %183 }
 0x123   :  { %135 = vst [vmem:[%s302_s3] sm:$0x3] %v184_v46 }

</bundles_post_ra>
